<compile_context>
chip_gen: v6e
topology: v6e:2x2x1
jax: 0.10.0
libtpu: 0.0.40
codegen_flags: <defaults>
</compile_context>

<pallas_src>
import functools
import math

import jax
import jax.numpy as jnp
from jax.experimental import pallas as pl
from jax.experimental.pallas import tpu as pltpu

HIDDEN = 32
N_HEADS = 4
NUM_R_GAUSSIAN = 4
EDGE_FEAT_DIM = 4                     # edge_attr has 4 channels (edge types)
R_FEAT_DIM = NUM_R_GAUSSIAN * 4       # r_feat_dim = num_r_gaussian * 4
ER_DIM = EDGE_FEAT_DIM + R_FEAT_DIM   # [edge_feat | r_feat] block of kv_input
LN_EPS = 1e-5


def _vmem():
    return pl.BlockSpec(memory_space=pltpu.MemorySpace.VMEM)


def _dot(a, b):
    return jnp.dot(a, b, preferred_element_type=jnp.float32)


def _layernorm(z, gamma, beta):
    mu = jnp.mean(z, axis=-1, keepdims=True)
    var = jnp.mean((z - mu) ** 2, axis=-1, keepdims=True)
    return (z - mu) * jax.lax.rsqrt(var + LN_EPS) * gamma + beta


# ----------------------------------------------------------------------------
# In-kernel building blocks (traced inline inside the fused kernels)
# ----------------------------------------------------------------------------
def _build_onehots(dst_row, dst_col, src_col, n, e):
    """Build scatter/gather one-hot masks in-kernel from int32 index vectors."""
    iota_ne = jax.lax.broadcasted_iota(jnp.int32, (n, e), 0)
    iota_en = jax.lax.broadcasted_iota(jnp.int32, (e, n), 1)
    oh_ne = (iota_ne == dst_row).astype(jnp.float32)      # (N, E): scatter-by-dst
    oh_en_dst = (iota_en == dst_col).astype(jnp.float32)  # (E, N): gather h[dst]
    oh_en_src = (iota_en == src_col).astype(jnp.float32)  # (E, N): gather h[src]
    return oh_ne, oh_en_dst, oh_en_src


def _scatter_softmax(s, oh_ne, oh_en_dst, n_heads):
    """scatter_softmax(s, dst) for s: (E, H). All-head matmuls; max uses a tiny
    unrolled head loop (segment-max is not expressible as a matmul)."""
    s_t = jnp.transpose(s)                                # (H, E)
    neg = jnp.float32(-1e30)
    cols = []
    for hh in range(n_heads):
        masked = jnp.where(oh_ne > 0.5, s_t[hh:hh + 1, :], neg)   # (N, E)
        cols.append(jnp.max(masked, axis=1, keepdims=True))       # (N, 1)
    segmax = jnp.concatenate(cols, axis=1)                        # (N, H)
    es = jnp.exp(s - _dot(oh_en_dst, segmax))                     # (E, H)
    denom = _dot(oh_ne, es)                                       # (N, H)
    return es / _dot(oh_en_dst, denom)                            # (E, H)


def _kv_q_alpha(h, er, oh_ne, oh_en_dst, oh_en_src,
                wkv1_er, wkv1_hi, wkv1_hj, bkv1, gkv, bekv,
                wk2, bk2, wv2, bv2,
                wq1, bq1, gq, beq, wq2, bq2,
                eww, ewb, sel, n_heads):
    """Shared front end: k, v (e_w-gated) and attention weights alpha."""
    hidden = h.shape[1]
    # gather h[dst], h[src] in-kernel (one-hot matmuls)
    hi = _dot(oh_en_dst, h)                               # (E, hidden)
    hj = _dot(oh_en_src, h)                               # (E, hidden)
    # combined [k|v] first layer, kv_input partitioned -> no in-kernel concat
    z1 = _dot(er, wkv1_er) + _dot(hi, wkv1_hi) + _dot(hj, wkv1_hj) + bkv1   # (E, 2*hidden)
    zk = jnp.maximum(_layernorm(z1[:, :hidden], gkv[:, :hidden], bekv[:, :hidden]), 0.0)
    zv = jnp.maximum(_layernorm(z1[:, hidden:], gkv[:, hidden:], bekv[:, hidden:]), 0.0)
    k = _dot(zk, wk2) + bk2                               # (E, hidden)
    v = _dot(zv, wv2) + bv2                               # (E, hidden) or (E, n_heads)
    # edge-weight gate (ew_net_type == 'r'): sigmoid on the EUP, folded in
    e_w = jax.nn.sigmoid(_dot(er, eww) + ewb)             # (E, 1)
    v = v * e_w
    # q MLP on nodes, gathered to edges
    q1 = jnp.maximum(_layernorm(_dot(h, wq1) + bq1, gq, beq), 0.0)
    q = _dot(q1, wq2) + bq2                               # (N, hidden)
    q_dst = _dot(oh_en_dst, q)                            # (E, hidden)
    # per-head scores via one matmul against the head selector
    head_dim = hidden // n_heads
    s = _dot(q_dst * k, sel) * (1.0 / math.sqrt(head_dim))   # (E, H)
    alpha = _scatter_softmax(s, oh_ne, oh_en_dst, n_heads)   # (E, H)
    return alpha, v


# ----------------------------------------------------------------------------
# Fused BaseX2HAttLayer kernel
# ----------------------------------------------------------------------------
def _x2h_fused_kernel(*refs, n_heads):
    (h_ref, er_ref, dstr_ref, dstc_ref, srcc_ref, sel_ref, selt_ref,
     wkv1_er, wkv1_hi, wkv1_hj, bkv1, gkv, bekv,
     wk2, bk2, wv2, bv2,
     wq1, bq1, gq, beq, wq2, bq2,
     eww, ewb,
     wo1a, wo1h, bo1, go, beo, wo2, bo2,
     o_ref) = refs
    h = h_ref[...]
    er = er_ref[...]
    n, hidden = h.shape
    e = er.shape[0]
    oh_ne, oh_en_dst, oh_en_src = _build_onehots(
        dstr_ref[...], dstc_ref[...], srcc_ref[...], n, e)
    alpha, v = _kv_q_alpha(
        h, er, oh_ne, oh_en_dst, oh_en_src,
        wkv1_er[...], wkv1_hi[...], wkv1_hj[...], bkv1[...], gkv[...], bekv[...],
        wk2[...], bk2[...], wv2[...], bv2[...],
        wq1[...], bq1[...], gq[...], beq[...], wq2[...], bq2[...],
        eww[...], ewb[...], sel_ref[...], n_heads)
    # broadcast alpha per head-dim and scatter-sum in one wide matmul
    alpha_full = _dot(alpha, selt_ref[...])               # (E, hidden)
    attn = _dot(oh_ne, alpha_full * v)                    # (N, hidden)
    # node_output MLP on [attn | h] (weights pre-split -> no concat) + residual
    z = _dot(attn, wo1a[...]) + _dot(h, wo1h[...]) + bo1[...]
    z = jnp.maximum(_layernorm(z, go[...], beo[...]), 0.0)
    o_ref[...] = _dot(z, wo2[...]) + bo2[...] + h


def x2h_fused(pk, h, er_feat, dst_row, dst_col, src_col, sel, sel_t, n_heads):
    n, hidden = h.shape
    args = (h, er_feat, dst_row, dst_col, src_col, sel, sel_t,
            pk["wkv1_er"], pk["wkv1_hi"], pk["wkv1_hj"], pk["bkv1"], pk["gkv"], pk["bekv"],
            pk["wk2"], pk["bk2"], pk["wv2"], pk["bv2"],
            pk["wq1"], pk["bq1"], pk["gq"], pk["beq"], pk["wq2"], pk["bq2"],
            pk["eww"], pk["ewb"],
            pk["wo1a"], pk["wo1h"], pk["bo1"], pk["go"], pk["beo"], pk["wo2"], pk["bo2"])
    return pl.pallas_call(
        functools.partial(_x2h_fused_kernel, n_heads=n_heads),
        out_shape=jax.ShapeDtypeStruct((n, hidden), jnp.float32),
        in_specs=[_vmem()] * len(args),
        out_specs=_vmem(),
    )(*args)


# ----------------------------------------------------------------------------
# Fused BaseH2XAttLayer kernel
# ----------------------------------------------------------------------------
def _h2x_fused_kernel(*refs, n_heads):
    (h_ref, er_ref, relx_ref, dstr_ref, dstc_ref, srcc_ref, sel_ref,
     wkv1_er, wkv1_hi, wkv1_hj, bkv1, gkv, bekv,
     wk2, bk2, wv2, bv2,
     wq1, bq1, gq, beq, wq2, bq2,
     eww, ewb,
     o_ref) = refs
    h = h_ref[...]
    er = er_ref[...]
    n, _ = h.shape
    e = er.shape[0]
    oh_ne, oh_en_dst, oh_en_src = _build_onehots(
        dstr_ref[...], dstc_ref[...], srcc_ref[...], n, e)
    alpha, v = _kv_q_alpha(
        h, er, oh_ne, oh_en_dst, oh_en_src,
        wkv1_er[...], wkv1_hi[...], wkv1_hj[...], bkv1[...], gkv[...], bekv[...],
        wk2[...], bk2[...], wv2[...], bv2[...],
        wq1[...], bq1[...], gq[...], beq[...], wq2[...], bq2[...],
        eww[...], ewb[...], sel_ref[...], n_heads)          # v: (E, n_heads)
    # mean over heads of scatter_sum(alpha * v * rel_x, dst)
    w = jnp.sum(alpha * v, axis=1, keepdims=True)           # (E, 1)
    o_ref[...] = _dot(oh_ne, w * relx_ref[...]) * (1.0 / n_heads)   # (N, 3)


def h2x_fused(pk, h, rel_x, er_feat, dst_row, dst_col, src_col, sel, n_heads):
    n, _ = h.shape
    args = (h, er_feat, rel_x, dst_row, dst_col, src_col, sel,
            pk["wkv1_er"], pk["wkv1_hi"], pk["wkv1_hj"], pk["bkv1"], pk["gkv"], pk["bekv"],
            pk["wk2"], pk["bk2"], pk["wv2"], pk["bv2"],
            pk["wq1"], pk["bq1"], pk["gq"], pk["beq"], pk["wq2"], pk["bq2"],
            pk["eww"], pk["ewb"])
    return pl.pallas_call(
        functools.partial(_h2x_fused_kernel, n_heads=n_heads),
        out_shape=jax.ShapeDtypeStruct((n, rel_x.shape[1]), jnp.float32),
        in_specs=[_vmem()] * len(args),
        out_specs=_vmem(),
    )(*args)


# ----------------------------------------------------------------------------
# Small fused fusion kernels
# ----------------------------------------------------------------------------
def _sub_int_fusion_kernel(hs_ref, ip_ref, w1a_ref, w1b_ref, b1_ref, w2_ref, b2_ref, o_ref):
    hs = hs_ref[...]
    z = _dot(hs, w1a_ref[...]) + _dot(ip_ref[...], w1b_ref[...]) + b1_ref[...]
    a = z * jax.nn.sigmoid(z)                              # SiLU
    o_ref[...] = _dot(a, w2_ref[...]) + b2_ref[...] + hs   # + residual


def sub_int_fusion(h_sub, intnode_pad, w1a, w1b, b1, w2, b2):
    return pl.pallas_call(
        _sub_int_fusion_kernel,
        out_shape=jax.ShapeDtypeStruct(h_sub.shape, jnp.float32),
        in_specs=[_vmem()] * 7,
        out_specs=_vmem(),
    )(h_sub, intnode_pad, w1a, w1b, b1, w2, b2)


def _graph_fusion_kernel(ha_ref, hb_ref, wa_ref, wb_ref, b_ref, o_ref):
    o_ref[...] = _dot(ha_ref[...], wa_ref[...]) + _dot(hb_ref[...], wb_ref[...]) + b_ref[...]


def graph_fusion(ha, hb, wa, wb, b):
    return pl.pallas_call(
        _graph_fusion_kernel,
        out_shape=jax.ShapeDtypeStruct((ha.shape[0], wa.shape[1]), jnp.float32),
        in_specs=[_vmem()] * 5,
        out_specs=_vmem(),
    )(ha, hb, wa, wb, b)


# ----------------------------------------------------------------------------
# Parameter initialisation (deterministic, synthetic) + packing for the kernels
# ----------------------------------------------------------------------------
def init_linear_params(key, din, dout, scale=0.2):
    kw, kb = jax.random.split(key)
    w = jax.random.normal(kw, (din, dout), jnp.float32) * scale
    b = jax.random.normal(kb, (1, dout), jnp.float32) * scale
    return w, b


def init_mlp_params(key, din, dh, dout):
    k1, k2 = jax.random.split(key)
    w1, b1 = init_linear_params(k1, din, dh)
    w2, b2 = init_linear_params(k2, dh, dout)
    return dict(w1=w1, b1=b1, gamma=jnp.ones((1, dh), jnp.float32),
                beta=jnp.zeros((1, dh), jnp.float32), w2=w2, b2=b2)


def pack_att_layer(kf, vf, qf, ew_w, ew_b, hidden, node_out=None):
    # Combine the k/v first layers into one lane-dense [k|v] matmul and
    # partition the kv_input rows ([edge_feat|r_feat], h[dst], h[src]) so the
    # kernel never concatenates.
    w1 = jnp.concatenate([kf["w1"], vf["w1"]], axis=1)           # (kv_dim, 2*hidden)
    pk = dict(
        wkv1_er=w1[:ER_DIM],
        wkv1_hi=w1[ER_DIM:ER_DIM + hidden],
        wkv1_hj=w1[ER_DIM + hidden:],
        bkv1=jnp.concatenate([kf["b1"], vf["b1"]], axis=1),
        gkv=jnp.concatenate([kf["gamma"], vf["gamma"]], axis=1),
        bekv=jnp.concatenate([kf["beta"], vf["beta"]], axis=1),
        wk2=kf["w2"], bk2=kf["b2"], wv2=vf["w2"], bv2=vf["b2"],
        wq1=qf["w1"], bq1=qf["b1"], gq=qf["gamma"], beq=qf["beta"],
        wq2=qf["w2"], bq2=qf["b2"],
        # pad ew weight so it consumes [edge_feat | r_feat] directly
        eww=jnp.concatenate([jnp.zeros((EDGE_FEAT_DIM, 1), jnp.float32), ew_w], axis=0),
        ewb=ew_b,
    )
    if node_out is not None:
        pk.update(
            wo1a=node_out["w1"][:hidden], wo1h=node_out["w1"][hidden:],
            bo1=node_out["b1"], go=node_out["gamma"], beo=node_out["beta"],
            wo2=node_out["w2"], bo2=node_out["b2"],
        )
    return pk


def init_params(key, hidden, n_heads, num_g):
    r_feat_dim = num_g * 4
    kv_dim = hidden * 2 + EDGE_FEAT_DIM + r_feat_dim
    ks = jax.random.split(key, 20)

    # BaseX2HAttLayer (main graph)
    hk = init_mlp_params(ks[0], kv_dim, hidden, hidden)
    hv = init_mlp_params(ks[1], kv_dim, hidden, hidden)
    hq = init_mlp_params(ks[2], hidden, hidden, hidden)
    no = init_mlp_params(ks[3], 2 * hidden, hidden, hidden)
    ew_w, ew_b = init_linear_params(ks[4], r_feat_dim, 1)
    x2h = pack_att_layer(hk, hv, hq, ew_w, ew_b, hidden, node_out=no)

    # BaseX2HAttLayer (sub graph)
    hk_s = init_mlp_params(ks[5], kv_dim, hidden, hidden)
    hv_s = init_mlp_params(ks[6], kv_dim, hidden, hidden)
    hq_s = init_mlp_params(ks[7], hidden, hidden, hidden)
    no_s = init_mlp_params(ks[8], 2 * hidden, hidden, hidden)
    ew_w_s, ew_b_s = init_linear_params(ks[9], r_feat_dim, 1)
    x2h_sub = pack_att_layer(hk_s, hv_s, hq_s, ew_w_s, ew_b_s, hidden, node_out=no_s)

    # BaseH2XAttLayer
    xk = init_mlp_params(ks[10], kv_dim, hidden, hidden)
    xv = init_mlp_params(ks[11], kv_dim, hidden, n_heads)
    xq = init_mlp_params(ks[12], hidden, hidden, hidden)
    ew_w3, ew_b3 = init_linear_params(ks[13], r_feat_dim, 1)
    h2x = pack_att_layer(xk, xv, xq, ew_w3, ew_b3, hidden, node_out=None)

    # fusions
    gf_w, gf_b = init_linear_params(ks[14], 2 * hidden, hidden)
    sif_w1, sif_b1 = init_linear_params(ks[15], 2 * hidden, hidden)
    sif_w2, sif_b2 = init_linear_params(ks[16], hidden, hidden)

    offset = jnp.linspace(0.0, 10.0, num_g).astype(jnp.float32)
    return dict(
        x2h=x2h, x2h_sub=x2h_sub, h2x=h2x,
        gf_wa=gf_w[:hidden], gf_wb=gf_w[hidden:], gf_b=gf_b,
        sif_w1a=sif_w1[:hidden], sif_w1b=sif_w1[hidden:], sif_b1=sif_b1,
        sif_w2=sif_w2, sif_b2=sif_b2,
        gs_offset=offset,
        gs_coeff=jnp.float32(-0.5 / float(offset[1] - offset[0]) ** 2),
    )


# ----------------------------------------------------------------------------
# Forward pass (JAX glue + fused Pallas kernels)
# ----------------------------------------------------------------------------
def dist_feat_fn(dist, edge_attr, offset, coeff):
    # GaussianSmearing + outer_product: tiny elementwise prep, kept in glue.
    g = jnp.exp(coeff * (dist - offset[None, :]) ** 2)          # (E, num_g)
    df = edge_attr[:, :, None] * g[:, None, :]                  # (E, 4, num_g)
    return df.reshape(edge_attr.shape[0], -1)                   # (E, 4*num_g)


def forward(p, h, h_sub, x, x_sub, edge_attr, edge_attr_sub, edge_index, edge_index_sub,
            mask_ligand, perm_sub, intnode, batch_sub,
            n_heads=N_HEADS, num_x2h=1, num_h2x=1, fix_x=False):
    src, dst = edge_index[0], edge_index[1]
    src_sub, dst_sub = edge_index_sub[0], edge_index_sub[1]

    head_dim = h.shape[1] // n_heads
    sel = jnp.repeat(jnp.eye(n_heads, dtype=jnp.float32), head_dim, axis=0)   # (hidden, H)
    sel_t = jnp.transpose(sel)                                                # (H, hidden)

    def idx3(s_, d_):
        return (d_.reshape(1, -1).astype(jnp.int32),
                d_.reshape(-1, 1).astype(jnp.int32),
                s_.reshape(-1, 1).astype(jnp.int32))

    dst_row, dst_col, src_col = idx3(src, dst)
    dst_row_s, dst_col_s, src_col_s = idx3(src_sub, dst_sub)

    rel_x = x[dst] - x[src]
    dist = jnp.sqrt(jnp.sum(rel_x ** 2, axis=-1, keepdims=True))
    rel_x_sub = x_sub[dst_sub] - x_sub[src_sub]
    dist_sub = jnp.sqrt(jnp.sum(rel_x_sub ** 2, axis=-1, keepdims=True))

    h_in = h
    intnode_pad = intnode[batch_sub]                                          # (N_sub, H)
    h_in_sub = sub_int_fusion(h_sub, intnode_pad, p["sif_w1a"], p["sif_w1b"],
                              p["sif_b1"], p["sif_w2"], p["sif_b2"])

    # r_feat depends only on (dist, edge_attr): hoisted out of the x2h loops.
    er_feat = jnp.concatenate(
        [edge_attr, dist_feat_fn(dist, edge_attr, p["gs_offset"], p["gs_coeff"])], axis=-1)
    er_feat_sub = jnp.concatenate(
        [edge_attr_sub, dist_feat_fn(dist_sub, edge_attr_sub, p["gs_offset"], p["gs_coeff"])],
        axis=-1)

    for _ in range(num_x2h):
        h_in = x2h_fused(p["x2h"], h_in, er_feat, dst_row, dst_col, src_col,
                         sel, sel_t, n_heads)
    for _ in range(num_x2h):
        h_in_sub = x2h_fused(p["x2h_sub"], h_in_sub, er_feat_sub, dst_row_s, dst_col_s,
                             src_col_s, sel, sel_t, n_heads)

    h_in_sub_pad = jnp.zeros_like(h_in).at[perm_sub].set(h_in_sub)
    h_in = graph_fusion(h_in, h_in_sub_pad, p["gf_wa"], p["gf_wb"], p["gf_b"])
    x2h_out = h_in
    new_h = x2h_out                  # sync_twoup = False

    for i in range(num_h2x):
        if i > 0:   # dist changed after the previous x update
            er_feat = jnp.concatenate(
                [edge_attr, dist_feat_fn(dist, edge_attr, p["gs_offset"], p["gs_coeff"])],
                axis=-1)
        delta_x = h2x_fused(p["h2x"], new_h, rel_x, er_feat, dst_row, dst_col, src_col,
                            sel, n_heads)
        if not fix_x:
            x = x + delta_x * mask_ligand[:, None]
        rel_x = x[dst] - x[src]
        dist = jnp.sqrt(jnp.sum(rel_x ** 2, axis=-1, keepdims=True))

    return x2h_out, x


# ----------------------------------------------------------------------------
if __name__ == "__main__":
    key = jax.random.PRNGKey(0)
    ks = jax.random.split(key, 16)

    N, N_SUB, E, E_SUB, B = 16, 8, 48, 16, 2

    h = jax.random.normal(ks[0], (N, HIDDEN), jnp.float32)
    h_sub = jax.random.normal(ks[1], (N_SUB, HIDDEN), jnp.float32)
    x = jax.random.normal(ks[2], (N, 3), jnp.float32) * 2.0
    x_sub = jax.random.normal(ks[3], (N_SUB, 3), jnp.float32) * 2.0

    edge_attr = jax.nn.one_hot(jax.random.randint(ks[4], (E,), 0, 4), 4, dtype=jnp.float32)
    edge_attr_sub = jax.nn.one_hot(jax.random.randint(ks[5], (E_SUB,), 0, 4), 4,
                                   dtype=jnp.float32)

    dst = jnp.repeat(jnp.arange(N, dtype=jnp.int32), E // N)          # every node is a dst
    src = jax.random.randint(ks[6], (E,), 0, N, dtype=jnp.int32)
    edge_index = jnp.stack([src, dst])
    dst_sub = jnp.repeat(jnp.arange(N_SUB, dtype=jnp.int32), E_SUB // N_SUB)
    src_sub = jax.random.randint(ks[7], (E_SUB,), 0, N_SUB, dtype=jnp.int32)
    edge_index_sub = jnp.stack([src_sub, dst_sub])

    mask_ligand = (jax.random.uniform(ks[8], (N,)) > 0.5).astype(jnp.float32)
    perm_sub = jax.random.permutation(ks[9], N)[:N_SUB]
    intnode = jax.random.normal(ks[10], (B, HIDDEN), jnp.float32)
    batch_sub = jnp.concatenate([jnp.zeros(N_SUB // 2, jnp.int32),
                                 jnp.ones(N_SUB // 2, jnp.int32)])

    params = init_params(ks[11], HIDDEN, N_HEADS, NUM_R_GAUSSIAN)

    fwd = jax.jit(forward)
    x2h_out, x_out = fwd(params, h, h_sub, x, x_sub, edge_attr, edge_attr_sub,
                         edge_index, edge_index_sub, mask_ligand, perm_sub,
                         intnode, batch_sub)
    jax.block_until_ready((x2h_out, x_out))

    assert x2h_out.shape == (N, HIDDEN) and x_out.shape == (N, 3)
    assert bool(jnp.all(jnp.isfinite(x2h_out))) and bool(jnp.all(jnp.isfinite(x_out)))
    print("KERNEL_OK")
</pallas_src>

<mosaic_0001>
module attributes {stable_mosaic.version = 11 : i64} {
  func.func @_x2h_fused_kernel(%arg0: memref<16x32xf32, #tpu.memory_space<vmem>>, %arg1: memref<48x20xf32, #tpu.memory_space<vmem>>, %arg2: memref<1x48xi32, #tpu.memory_space<vmem>>, %arg3: memref<48x1xi32, #tpu.memory_space<vmem>>, %arg4: memref<48x1xi32, #tpu.memory_space<vmem>>, %arg5: memref<32x4xf32, #tpu.memory_space<vmem>>, %arg6: memref<4x32xf32, #tpu.memory_space<vmem>>, %arg7: memref<20x64xf32, #tpu.memory_space<vmem>>, %arg8: memref<32x64xf32, #tpu.memory_space<vmem>>, %arg9: memref<32x64xf32, #tpu.memory_space<vmem>>, %arg10: memref<1x64xf32, #tpu.memory_space<vmem>>, %arg11: memref<1x64xf32, #tpu.memory_space<vmem>>, %arg12: memref<1x64xf32, #tpu.memory_space<vmem>>, %arg13: memref<32x32xf32, #tpu.memory_space<vmem>>, %arg14: memref<1x32xf32, #tpu.memory_space<vmem>>, %arg15: memref<32x32xf32, #tpu.memory_space<vmem>>, %arg16: memref<1x32xf32, #tpu.memory_space<vmem>>, %arg17: memref<32x32xf32, #tpu.memory_space<vmem>>, %arg18: memref<1x32xf32, #tpu.memory_space<vmem>>, %arg19: memref<1x32xf32, #tpu.memory_space<vmem>>, %arg20: memref<1x32xf32, #tpu.memory_space<vmem>>, %arg21: memref<32x32xf32, #tpu.memory_space<vmem>>, %arg22: memref<1x32xf32, #tpu.memory_space<vmem>>, %arg23: memref<20x1xf32, #tpu.memory_space<vmem>>, %arg24: memref<1x1xf32, #tpu.memory_space<vmem>>, %arg25: memref<32x32xf32, #tpu.memory_space<vmem>>, %arg26: memref<32x32xf32, #tpu.memory_space<vmem>>, %arg27: memref<1x32xf32, #tpu.memory_space<vmem>>, %arg28: memref<1x32xf32, #tpu.memory_space<vmem>>, %arg29: memref<1x32xf32, #tpu.memory_space<vmem>>, %arg30: memref<32x32xf32, #tpu.memory_space<vmem>>, %arg31: memref<1x32xf32, #tpu.memory_space<vmem>>, %arg32: memref<16x32xf32, #tpu.memory_space<vmem>>) attributes {dimension_semantics = [], scalar_prefetch = 0 : i64, scratch_operands = 0 : i64, tpu.core_type = #tpu.core_type<tc>} {
    %c0 = arith.constant 0 : index
    %c0_0 = arith.constant 0 : index
    %0 = vector.load %arg0[%c0, %c0_0] : memref<16x32xf32, #tpu.memory_space<vmem>>, vector<16x32xf32>
    %c0_1 = arith.constant 0 : index
    %c0_2 = arith.constant 0 : index
    %1 = vector.load %arg1[%c0_1, %c0_2] : memref<48x20xf32, #tpu.memory_space<vmem>>, vector<48x20xf32>
    %c0_3 = arith.constant 0 : index
    %c0_4 = arith.constant 0 : index
    %2 = vector.load %arg2[%c0_3, %c0_4] : memref<1x48xi32, #tpu.memory_space<vmem>>, vector<1x48xi32>
    %c0_5 = arith.constant 0 : index
    %c0_6 = arith.constant 0 : index
    %3 = vector.load %arg3[%c0_5, %c0_6] : memref<48x1xi32, #tpu.memory_space<vmem>>, vector<48x1xi32>
    %c0_7 = arith.constant 0 : index
    %c0_8 = arith.constant 0 : index
    %4 = vector.load %arg4[%c0_7, %c0_8] : memref<48x1xi32, #tpu.memory_space<vmem>>, vector<48x1xi32>
    %5 = tpu.iota {dimensions = array<i32: 0>} : vector<16x48xi32>
    %6 = tpu.iota {dimensions = array<i32: 1>} : vector<48x16xi32>
    %7 = vector.broadcast %2 : vector<1x48xi32> to vector<16x48xi32>
    %8 = arith.cmpi eq, %5, %7 : vector<16x48xi32>
    %9 = arith.extui %8 : vector<16x48xi1> to vector<16x48xi32>
    %10 = arith.sitofp %9 : vector<16x48xi32> to vector<16x48xf32>
    %11 = vector.broadcast %3 : vector<48x1xi32> to vector<48x16xi32>
    %12 = arith.cmpi eq, %6, %11 : vector<48x16xi32>
    %13 = arith.extui %12 : vector<48x16xi1> to vector<48x16xi32>
    %14 = arith.sitofp %13 : vector<48x16xi32> to vector<48x16xf32>
    %15 = vector.broadcast %4 : vector<48x1xi32> to vector<48x16xi32>
    %16 = arith.cmpi eq, %6, %15 : vector<48x16xi32>
    %17 = arith.extui %16 : vector<48x16xi1> to vector<48x16xi32>
    %18 = arith.sitofp %17 : vector<48x16xi32> to vector<48x16xf32>
    %c0_9 = arith.constant 0 : index
    %c0_10 = arith.constant 0 : index
    %19 = vector.load %arg7[%c0_9, %c0_10] : memref<20x64xf32, #tpu.memory_space<vmem>>, vector<20x64xf32>
    %c0_11 = arith.constant 0 : index
    %c0_12 = arith.constant 0 : index
    %20 = vector.load %arg8[%c0_11, %c0_12] : memref<32x64xf32, #tpu.memory_space<vmem>>, vector<32x64xf32>
    %c0_13 = arith.constant 0 : index
    %c0_14 = arith.constant 0 : index
    %21 = vector.load %arg9[%c0_13, %c0_14] : memref<32x64xf32, #tpu.memory_space<vmem>>, vector<32x64xf32>
    %c0_15 = arith.constant 0 : index
    %c0_16 = arith.constant 0 : index
    %22 = vector.load %arg10[%c0_15, %c0_16] : memref<1x64xf32, #tpu.memory_space<vmem>>, vector<1x64xf32>
    %c0_17 = arith.constant 0 : index
    %c0_18 = arith.constant 0 : index
    %23 = vector.load %arg11[%c0_17, %c0_18] : memref<1x64xf32, #tpu.memory_space<vmem>>, vector<1x64xf32>
    %c0_19 = arith.constant 0 : index
    %c0_20 = arith.constant 0 : index
    %24 = vector.load %arg12[%c0_19, %c0_20] : memref<1x64xf32, #tpu.memory_space<vmem>>, vector<1x64xf32>
    %c0_21 = arith.constant 0 : index
    %c0_22 = arith.constant 0 : index
    %25 = vector.load %arg13[%c0_21, %c0_22] : memref<32x32xf32, #tpu.memory_space<vmem>>, vector<32x32xf32>
    %c0_23 = arith.constant 0 : index
    %c0_24 = arith.constant 0 : index
    %26 = vector.load %arg14[%c0_23, %c0_24] : memref<1x32xf32, #tpu.memory_space<vmem>>, vector<1x32xf32>
    %c0_25 = arith.constant 0 : index
    %c0_26 = arith.constant 0 : index
    %27 = vector.load %arg15[%c0_25, %c0_26] : memref<32x32xf32, #tpu.memory_space<vmem>>, vector<32x32xf32>
    %c0_27 = arith.constant 0 : index
    %c0_28 = arith.constant 0 : index
    %28 = vector.load %arg16[%c0_27, %c0_28] : memref<1x32xf32, #tpu.memory_space<vmem>>, vector<1x32xf32>
    %c0_29 = arith.constant 0 : index
    %c0_30 = arith.constant 0 : index
    %29 = vector.load %arg17[%c0_29, %c0_30] : memref<32x32xf32, #tpu.memory_space<vmem>>, vector<32x32xf32>
    %c0_31 = arith.constant 0 : index
    %c0_32 = arith.constant 0 : index
    %30 = vector.load %arg18[%c0_31, %c0_32] : memref<1x32xf32, #tpu.memory_space<vmem>>, vector<1x32xf32>
    %c0_33 = arith.constant 0 : index
    %c0_34 = arith.constant 0 : index
    %31 = vector.load %arg19[%c0_33, %c0_34] : memref<1x32xf32, #tpu.memory_space<vmem>>, vector<1x32xf32>
    %c0_35 = arith.constant 0 : index
    %c0_36 = arith.constant 0 : index
    %32 = vector.load %arg20[%c0_35, %c0_36] : memref<1x32xf32, #tpu.memory_space<vmem>>, vector<1x32xf32>
    %c0_37 = arith.constant 0 : index
    %c0_38 = arith.constant 0 : index
    %33 = vector.load %arg21[%c0_37, %c0_38] : memref<32x32xf32, #tpu.memory_space<vmem>>, vector<32x32xf32>
    %c0_39 = arith.constant 0 : index
    %c0_40 = arith.constant 0 : index
    %34 = vector.load %arg22[%c0_39, %c0_40] : memref<1x32xf32, #tpu.memory_space<vmem>>, vector<1x32xf32>
    %c0_41 = arith.constant 0 : index
    %c0_42 = arith.constant 0 : index
    %35 = vector.load %arg23[%c0_41, %c0_42] : memref<20x1xf32, #tpu.memory_space<vmem>>, vector<20x1xf32>
    %c0_43 = arith.constant 0 : index
    %c0_44 = arith.constant 0 : index
    %36 = vector.load %arg24[%c0_43, %c0_44] : memref<1x1xf32, #tpu.memory_space<vmem>>, vector<1x1xf32>
    %c0_45 = arith.constant 0 : index
    %c0_46 = arith.constant 0 : index
    %37 = vector.load %arg5[%c0_45, %c0_46] : memref<32x4xf32, #tpu.memory_space<vmem>>, vector<32x4xf32>
    %cst = arith.constant dense<0.000000e+00> : vector<48x32xf32>
    %38 = tpu.matmul %14, %0, %cst {dimension_numbers = #tpu.dot_dimension_numbers<[1], [0], [0], [1], [0, 0, 1, 1], [], []>} : vector<48x16xf32>, vector<16x32xf32>, vector<48x32xf32> -> vector<48x32xf32>
    %cst_47 = arith.constant dense<0.000000e+00> : vector<48x32xf32>
    %39 = tpu.matmul %18, %0, %cst_47 {dimension_numbers = #tpu.dot_dimension_numbers<[1], [0], [0], [1], [0, 0, 1, 1], [], []>} : vector<48x16xf32>, vector<16x32xf32>, vector<48x32xf32> -> vector<48x32xf32>
    %cst_48 = arith.constant dense<0.000000e+00> : vector<48x64xf32>
    %40 = tpu.matmul %1, %19, %cst_48 {dimension_numbers = #tpu.dot_dimension_numbers<[1], [0], [0], [1], [0, 0, 1, 1], [], []>} : vector<48x20xf32>, vector<20x64xf32>, vector<48x64xf32> -> vector<48x64xf32>
    %cst_49 = arith.constant dense<0.000000e+00> : vector<48x64xf32>
    %41 = tpu.matmul %38, %20, %cst_49 {dimension_numbers = #tpu.dot_dimension_numbers<[1], [0], [0], [1], [0, 0, 1, 1], [], []>} : vector<48x32xf32>, vector<32x64xf32>, vector<48x64xf32> -> vector<48x64xf32>
    %42 = arith.addf %40, %41 : vector<48x64xf32>
    %cst_50 = arith.constant dense<0.000000e+00> : vector<48x64xf32>
    %43 = tpu.matmul %39, %21, %cst_50 {dimension_numbers = #tpu.dot_dimension_numbers<[1], [0], [0], [1], [0, 0, 1, 1], [], []>} : vector<48x32xf32>, vector<32x64xf32>, vector<48x64xf32> -> vector<48x64xf32>
    %44 = arith.addf %42, %43 : vector<48x64xf32>
    %45 = vector.broadcast %22 : vector<1x64xf32> to vector<48x64xf32>
    %46 = arith.addf %44, %45 : vector<48x64xf32>
    %47 = vector.extract_strided_slice %46 {offsets = [0, 0], sizes = [48, 32], strides = [1, 1]} : vector<48x64xf32> to vector<48x32xf32>
    %48 = vector.extract_strided_slice %23 {offsets = [0, 0], sizes = [1, 32], strides = [1, 1]} : vector<1x64xf32> to vector<1x32xf32>
    %49 = vector.extract_strided_slice %24 {offsets = [0, 0], sizes = [1, 32], strides = [1, 1]} : vector<1x64xf32> to vector<1x32xf32>
    %cst_51 = arith.constant dense<0.000000e+00> : vector<48xf32>
    %50 = vector.multi_reduction <add>, %47, %cst_51 [1] : vector<48x32xf32> to vector<48xf32>
    %51 = vector.shape_cast %50 : vector<48xf32> to vector<48x1xf32>
    %cst_52 = arith.constant 3.200000e+01 : f32
    %52 = vector.broadcast %cst_52 : f32 to vector<48x1xf32>
    %53 = arith.divf %51, %52 : vector<48x1xf32>
    %54 = vector.broadcast %53 : vector<48x1xf32> to vector<48x32xf32>
    %55 = arith.subf %47, %54 : vector<48x32xf32>
    %56 = arith.mulf %55, %55 : vector<48x32xf32>
    %cst_53 = arith.constant dense<0.000000e+00> : vector<48xf32>
    %57 = vector.multi_reduction <add>, %56, %cst_53 [1] : vector<48x32xf32> to vector<48xf32>
    %58 = vector.shape_cast %57 : vector<48xf32> to vector<48x1xf32>
    %cst_54 = arith.constant 3.200000e+01 : f32
    %59 = vector.broadcast %cst_54 : f32 to vector<48x1xf32>
    %60 = arith.divf %58, %59 : vector<48x1xf32>
    %61 = vector.broadcast %53 : vector<48x1xf32> to vector<48x32xf32>
    %62 = arith.subf %47, %61 : vector<48x32xf32>
    %cst_55 = arith.constant 9.99999974E-6 : f32
    %63 = vector.broadcast %cst_55 : f32 to vector<48x1xf32>
    %64 = arith.addf %60, %63 : vector<48x1xf32>
    %65 = math.rsqrt %64 : vector<48x1xf32>
    %66 = vector.broadcast %65 : vector<48x1xf32> to vector<48x32xf32>
    %67 = arith.mulf %62, %66 : vector<48x32xf32>
    %68 = vector.broadcast %48 : vector<1x32xf32> to vector<48x32xf32>
    %69 = arith.mulf %67, %68 : vector<48x32xf32>
    %70 = vector.broadcast %49 : vector<1x32xf32> to vector<48x32xf32>
    %71 = arith.addf %69, %70 : vector<48x32xf32>
    %cst_56 = arith.constant 0.000000e+00 : f32
    %72 = vector.broadcast %cst_56 : f32 to vector<48x32xf32>
    %73 = arith.maximumf %71, %72 : vector<48x32xf32>
    %74 = vector.extract_strided_slice %46 {offsets = [0, 32], sizes = [48, 32], strides = [1, 1]} : vector<48x64xf32> to vector<48x32xf32>
    %75 = vector.extract_strided_slice %23 {offsets = [0, 32], sizes = [1, 32], strides = [1, 1]} : vector<1x64xf32> to vector<1x32xf32>
    %76 = vector.extract_strided_slice %24 {offsets = [0, 32], sizes = [1, 32], strides = [1, 1]} : vector<1x64xf32> to vector<1x32xf32>
    %cst_57 = arith.constant dense<0.000000e+00> : vector<48xf32>
    %77 = vector.multi_reduction <add>, %74, %cst_57 [1] : vector<48x32xf32> to vector<48xf32>
    %78 = vector.shape_cast %77 : vector<48xf32> to vector<48x1xf32>
    %cst_58 = arith.constant 3.200000e+01 : f32
    %79 = vector.broadcast %cst_58 : f32 to vector<48x1xf32>
    %80 = arith.divf %78, %79 : vector<48x1xf32>
    %81 = vector.broadcast %80 : vector<48x1xf32> to vector<48x32xf32>
    %82 = arith.subf %74, %81 : vector<48x32xf32>
    %83 = arith.mulf %82, %82 : vector<48x32xf32>
    %cst_59 = arith.constant dense<0.000000e+00> : vector<48xf32>
    %84 = vector.multi_reduction <add>, %83, %cst_59 [1] : vector<48x32xf32> to vector<48xf32>
    %85 = vector.shape_cast %84 : vector<48xf32> to vector<48x1xf32>
    %cst_60 = arith.constant 3.200000e+01 : f32
    %86 = vector.broadcast %cst_60 : f32 to vector<48x1xf32>
    %87 = arith.divf %85, %86 : vector<48x1xf32>
    %88 = vector.broadcast %80 : vector<48x1xf32> to vector<48x32xf32>
    %89 = arith.subf %74, %88 : vector<48x32xf32>
    %cst_61 = arith.constant 9.99999974E-6 : f32
    %90 = vector.broadcast %cst_61 : f32 to vector<48x1xf32>
    %91 = arith.addf %87, %90 : vector<48x1xf32>
    %92 = math.rsqrt %91 : vector<48x1xf32>
    %93 = vector.broadcast %92 : vector<48x1xf32> to vector<48x32xf32>
    %94 = arith.mulf %89, %93 : vector<48x32xf32>
    %95 = vector.broadcast %75 : vector<1x32xf32> to vector<48x32xf32>
    %96 = arith.mulf %94, %95 : vector<48x32xf32>
    %97 = vector.broadcast %76 : vector<1x32xf32> to vector<48x32xf32>
    %98 = arith.addf %96, %97 : vector<48x32xf32>
    %cst_62 = arith.constant 0.000000e+00 : f32
    %99 = vector.broadcast %cst_62 : f32 to vector<48x32xf32>
    %100 = arith.maximumf %98, %99 : vector<48x32xf32>
    %cst_63 = arith.constant dense<0.000000e+00> : vector<48x32xf32>
    %101 = tpu.matmul %73, %25, %cst_63 {dimension_numbers = #tpu.dot_dimension_numbers<[1], [0], [0], [1], [0, 0, 1, 1], [], []>} : vector<48x32xf32>, vector<32x32xf32>, vector<48x32xf32> -> vector<48x32xf32>
    %102 = vector.broadcast %26 : vector<1x32xf32> to vector<48x32xf32>
    %103 = arith.addf %101, %102 : vector<48x32xf32>
    %cst_64 = arith.constant dense<0.000000e+00> : vector<48x32xf32>
    %104 = tpu.matmul %100, %27, %cst_64 {dimension_numbers = #tpu.dot_dimension_numbers<[1], [0], [0], [1], [0, 0, 1, 1], [], []>} : vector<48x32xf32>, vector<32x32xf32>, vector<48x32xf32> -> vector<48x32xf32>
    %105 = vector.broadcast %28 : vector<1x32xf32> to vector<48x32xf32>
    %106 = arith.addf %104, %105 : vector<48x32xf32>
    %cst_65 = arith.constant dense<0.000000e+00> : vector<48x1xf32>
    %107 = tpu.matmul %1, %35, %cst_65 {dimension_numbers = #tpu.dot_dimension_numbers<[1], [0], [0], [1], [0, 0, 1, 1], [], []>} : vector<48x20xf32>, vector<20x1xf32>, vector<48x1xf32> -> vector<48x1xf32>
    %108 = vector.broadcast %36 : vector<1x1xf32> to vector<48x1xf32>
    %109 = arith.addf %107, %108 : vector<48x1xf32>
    %110 = arith.negf %109 : vector<48x1xf32>
    %111 = math.exp %110 : vector<48x1xf32>
    %cst_66 = arith.constant 1.000000e+00 : f32
    %112 = vector.broadcast %cst_66 : f32 to vector<48x1xf32>
    %113 = arith.addf %112, %111 : vector<48x1xf32>
    %114 = arith.divf %112, %113 : vector<48x1xf32>
    %115 = vector.broadcast %114 : vector<48x1xf32> to vector<48x32xf32>
    %116 = arith.mulf %106, %115 : vector<48x32xf32>
    %cst_67 = arith.constant dense<0.000000e+00> : vector<16x32xf32>
    %117 = tpu.matmul %0, %29, %cst_67 {dimension_numbers = #tpu.dot_dimension_numbers<[1], [0], [0], [1], [0, 0, 1, 1], [], []>} : vector<16x32xf32>, vector<32x32xf32>, vector<16x32xf32> -> vector<16x32xf32>
    %118 = vector.broadcast %30 : vector<1x32xf32> to vector<16x32xf32>
    %119 = arith.addf %117, %118 : vector<16x32xf32>
    %cst_68 = arith.constant dense<0.000000e+00> : vector<16xf32>
    %120 = vector.multi_reduction <add>, %119, %cst_68 [1] : vector<16x32xf32> to vector<16xf32>
    %121 = vector.shape_cast %120 : vector<16xf32> to vector<16x1xf32>
    %cst_69 = arith.constant 3.200000e+01 : f32
    %122 = vector.broadcast %cst_69 : f32 to vector<16x1xf32>
    %123 = arith.divf %121, %122 : vector<16x1xf32>
    %124 = vector.broadcast %123 : vector<16x1xf32> to vector<16x32xf32>
    %125 = arith.subf %119, %124 : vector<16x32xf32>
    %126 = arith.mulf %125, %125 : vector<16x32xf32>
    %cst_70 = arith.constant dense<0.000000e+00> : vector<16xf32>
    %127 = vector.multi_reduction <add>, %126, %cst_70 [1] : vector<16x32xf32> to vector<16xf32>
    %128 = vector.shape_cast %127 : vector<16xf32> to vector<16x1xf32>
    %cst_71 = arith.constant 3.200000e+01 : f32
    %129 = vector.broadcast %cst_71 : f32 to vector<16x1xf32>
    %130 = arith.divf %128, %129 : vector<16x1xf32>
    %131 = vector.broadcast %123 : vector<16x1xf32> to vector<16x32xf32>
    %132 = arith.subf %119, %131 : vector<16x32xf32>
    %cst_72 = arith.constant 9.99999974E-6 : f32
    %133 = vector.broadcast %cst_72 : f32 to vector<16x1xf32>
    %134 = arith.addf %130, %133 : vector<16x1xf32>
    %135 = math.rsqrt %134 : vector<16x1xf32>
    %136 = vector.broadcast %135 : vector<16x1xf32> to vector<16x32xf32>
    %137 = arith.mulf %132, %136 : vector<16x32xf32>
    %138 = vector.broadcast %31 : vector<1x32xf32> to vector<16x32xf32>
    %139 = arith.mulf %137, %138 : vector<16x32xf32>
    %140 = vector.broadcast %32 : vector<1x32xf32> to vector<16x32xf32>
    %141 = arith.addf %139, %140 : vector<16x32xf32>
    %cst_73 = arith.constant 0.000000e+00 : f32
    %142 = vector.broadcast %cst_73 : f32 to vector<16x32xf32>
    %143 = arith.maximumf %141, %142 : vector<16x32xf32>
    %cst_74 = arith.constant dense<0.000000e+00> : vector<16x32xf32>
    %144 = tpu.matmul %143, %33, %cst_74 {dimension_numbers = #tpu.dot_dimension_numbers<[1], [0], [0], [1], [0, 0, 1, 1], [], []>} : vector<16x32xf32>, vector<32x32xf32>, vector<16x32xf32> -> vector<16x32xf32>
    %145 = vector.broadcast %34 : vector<1x32xf32> to vector<16x32xf32>
    %146 = arith.addf %144, %145 : vector<16x32xf32>
    %cst_75 = arith.constant dense<0.000000e+00> : vector<48x32xf32>
    %147 = tpu.matmul %14, %146, %cst_75 {dimension_numbers = #tpu.dot_dimension_numbers<[1], [0], [0], [1], [0, 0, 1, 1], [], []>} : vector<48x16xf32>, vector<16x32xf32>, vector<48x32xf32> -> vector<48x32xf32>
    %148 = arith.mulf %147, %103 : vector<48x32xf32>
    %cst_76 = arith.constant dense<0.000000e+00> : vector<48x4xf32>
    %149 = tpu.matmul %148, %37, %cst_76 {dimension_numbers = #tpu.dot_dimension_numbers<[1], [0], [0], [1], [0, 0, 1, 1], [], []>} : vector<48x32xf32>, vector<32x4xf32>, vector<48x4xf32> -> vector<48x4xf32>
    %cst_77 = arith.constant 0.353553385 : f32
    %150 = vector.broadcast %cst_77 : f32 to vector<48x4xf32>
    %151 = arith.mulf %149, %150 : vector<48x4xf32>
    %152 = tpu.transpose %151, [1, 0] : vector<48x4xf32> -> vector<4x48xf32>
    %cst_78 = arith.constant 5.000000e-01 : f32
    %153 = vector.broadcast %cst_78 : f32 to vector<16x48xf32>
    %154 = arith.cmpf ogt, %10, %153 : vector<16x48xf32>
    %155 = vector.extract_strided_slice %152 {offsets = [0, 0], sizes = [1, 48], strides = [1, 1]} : vector<4x48xf32> to vector<1x48xf32>
    %cst_79 = arith.constant -1.000000e+30 : f32
    %156 = vector.shape_cast %155 : vector<1x48xf32> to vector<1x48xf32>
    %157 = vector.broadcast %156 : vector<1x48xf32> to vector<16x48xf32>
    %158 = vector.broadcast %cst_79 : f32 to vector<16x48xf32>
    %159 = arith.select %154, %157, %158 : vector<16x48xi1>, vector<16x48xf32>
    %cst_80 = arith.constant dense<0xFF800000> : vector<16xf32>
    %160 = vector.multi_reduction <maximumf>, %159, %cst_80 [1] : vector<16x48xf32> to vector<16xf32>
    %161 = vector.shape_cast %160 : vector<16xf32> to vector<16x1xf32>
    %cst_81 = arith.constant 5.000000e-01 : f32
    %162 = vector.broadcast %cst_81 : f32 to vector<16x48xf32>
    %163 = arith.cmpf ogt, %10, %162 : vector<16x48xf32>
    %164 = vector.extract_strided_slice %152 {offsets = [1, 0], sizes = [1, 48], strides = [1, 1]} : vector<4x48xf32> to vector<1x48xf32>
    %cst_82 = arith.constant -1.000000e+30 : f32
    %165 = vector.shape_cast %164 : vector<1x48xf32> to vector<1x48xf32>
    %166 = vector.broadcast %165 : vector<1x48xf32> to vector<16x48xf32>
    %167 = vector.broadcast %cst_82 : f32 to vector<16x48xf32>
    %168 = arith.select %163, %166, %167 : vector<16x48xi1>, vector<16x48xf32>
    %cst_83 = arith.constant dense<0xFF800000> : vector<16xf32>
    %169 = vector.multi_reduction <maximumf>, %168, %cst_83 [1] : vector<16x48xf32> to vector<16xf32>
    %170 = vector.shape_cast %169 : vector<16xf32> to vector<16x1xf32>
    %cst_84 = arith.constant 5.000000e-01 : f32
    %171 = vector.broadcast %cst_84 : f32 to vector<16x48xf32>
    %172 = arith.cmpf ogt, %10, %171 : vector<16x48xf32>
    %173 = vector.extract_strided_slice %152 {offsets = [2, 0], sizes = [1, 48], strides = [1, 1]} : vector<4x48xf32> to vector<1x48xf32>
    %cst_85 = arith.constant -1.000000e+30 : f32
    %174 = vector.shape_cast %173 : vector<1x48xf32> to vector<1x48xf32>
    %175 = vector.broadcast %174 : vector<1x48xf32> to vector<16x48xf32>
    %176 = vector.broadcast %cst_85 : f32 to vector<16x48xf32>
    %177 = arith.select %172, %175, %176 : vector<16x48xi1>, vector<16x48xf32>
    %cst_86 = arith.constant dense<0xFF800000> : vector<16xf32>
    %178 = vector.multi_reduction <maximumf>, %177, %cst_86 [1] : vector<16x48xf32> to vector<16xf32>
    %179 = vector.shape_cast %178 : vector<16xf32> to vector<16x1xf32>
    %cst_87 = arith.constant 5.000000e-01 : f32
    %180 = vector.broadcast %cst_87 : f32 to vector<16x48xf32>
    %181 = arith.cmpf ogt, %10, %180 : vector<16x48xf32>
    %182 = vector.extract_strided_slice %152 {offsets = [3, 0], sizes = [1, 48], strides = [1, 1]} : vector<4x48xf32> to vector<1x48xf32>
    %cst_88 = arith.constant -1.000000e+30 : f32
    %183 = vector.shape_cast %182 : vector<1x48xf32> to vector<1x48xf32>
    %184 = vector.broadcast %183 : vector<1x48xf32> to vector<16x48xf32>
    %185 = vector.broadcast %cst_88 : f32 to vector<16x48xf32>
    %186 = arith.select %181, %184, %185 : vector<16x48xi1>, vector<16x48xf32>
    %cst_89 = arith.constant dense<0xFF800000> : vector<16xf32>
    %187 = vector.multi_reduction <maximumf>, %186, %cst_89 [1] : vector<16x48xf32> to vector<16xf32>
    %188 = vector.shape_cast %187 : vector<16xf32> to vector<16x1xf32>
    %189 = tpu.concatenate %161, %170, %179, %188 in 1 : vector<16x1xf32>, vector<16x1xf32>, vector<16x1xf32>, vector<16x1xf32> -> vector<16x4xf32>
    %cst_90 = arith.constant dense<0.000000e+00> : vector<48x4xf32>
    %190 = tpu.matmul %14, %189, %cst_90 {dimension_numbers = #tpu.dot_dimension_numbers<[1], [0], [0], [1], [0, 0, 1, 1], [], []>} : vector<48x16xf32>, vector<16x4xf32>, vector<48x4xf32> -> vector<48x4xf32>
    %191 = arith.subf %151, %190 : vector<48x4xf32>
    %192 = math.exp %191 : vector<48x4xf32>
    %cst_91 = arith.constant dense<0.000000e+00> : vector<16x4xf32>
    %193 = tpu.matmul %10, %192, %cst_91 {dimension_numbers = #tpu.dot_dimension_numbers<[1], [0], [0], [1], [0, 0, 1, 1], [], []>} : vector<16x48xf32>, vector<48x4xf32>, vector<16x4xf32> -> vector<16x4xf32>
    %cst_92 = arith.constant dense<0.000000e+00> : vector<48x4xf32>
    %194 = tpu.matmul %14, %193, %cst_92 {dimension_numbers = #tpu.dot_dimension_numbers<[1], [0], [0], [1], [0, 0, 1, 1], [], []>} : vector<48x16xf32>, vector<16x4xf32>, vector<48x4xf32> -> vector<48x4xf32>
    %195 = arith.divf %192, %194 : vector<48x4xf32>
    %c0_93 = arith.constant 0 : index
    %c0_94 = arith.constant 0 : index
    %196 = vector.load %arg6[%c0_93, %c0_94] : memref<4x32xf32, #tpu.memory_space<vmem>>, vector<4x32xf32>
    %cst_95 = arith.constant dense<0.000000e+00> : vector<48x32xf32>
    %197 = tpu.matmul %195, %196, %cst_95 {dimension_numbers = #tpu.dot_dimension_numbers<[1], [0], [0], [1], [0, 0, 1, 1], [], []>} : vector<48x4xf32>, vector<4x32xf32>, vector<48x32xf32> -> vector<48x32xf32>
    %198 = arith.mulf %197, %116 : vector<48x32xf32>
    %cst_96 = arith.constant dense<0.000000e+00> : vector<16x32xf32>
    %199 = tpu.matmul %10, %198, %cst_96 {dimension_numbers = #tpu.dot_dimension_numbers<[1], [0], [0], [1], [0, 0, 1, 1], [], []>} : vector<16x48xf32>, vector<48x32xf32>, vector<16x32xf32> -> vector<16x32xf32>
    %c0_97 = arith.constant 0 : index
    %c0_98 = arith.constant 0 : index
    %200 = vector.load %arg25[%c0_97, %c0_98] : memref<32x32xf32, #tpu.memory_space<vmem>>, vector<32x32xf32>
    %cst_99 = arith.constant dense<0.000000e+00> : vector<16x32xf32>
    %201 = tpu.matmul %199, %200, %cst_99 {dimension_numbers = #tpu.dot_dimension_numbers<[1], [0], [0], [1], [0, 0, 1, 1], [], []>} : vector<16x32xf32>, vector<32x32xf32>, vector<16x32xf32> -> vector<16x32xf32>
    %c0_100 = arith.constant 0 : index
    %c0_101 = arith.constant 0 : index
    %202 = vector.load %arg26[%c0_100, %c0_101] : memref<32x32xf32, #tpu.memory_space<vmem>>, vector<32x32xf32>
    %cst_102 = arith.constant dense<0.000000e+00> : vector<16x32xf32>
    %203 = tpu.matmul %0, %202, %cst_102 {dimension_numbers = #tpu.dot_dimension_numbers<[1], [0], [0], [1], [0, 0, 1, 1], [], []>} : vector<16x32xf32>, vector<32x32xf32>, vector<16x32xf32> -> vector<16x32xf32>
    %204 = arith.addf %201, %203 : vector<16x32xf32>
    %c0_103 = arith.constant 0 : index
    %c0_104 = arith.constant 0 : index
    %205 = vector.load %arg27[%c0_103, %c0_104] : memref<1x32xf32, #tpu.memory_space<vmem>>, vector<1x32xf32>
    %206 = vector.broadcast %205 : vector<1x32xf32> to vector<16x32xf32>
    %207 = arith.addf %204, %206 : vector<16x32xf32>
    %c0_105 = arith.constant 0 : index
    %c0_106 = arith.constant 0 : index
    %208 = vector.load %arg28[%c0_105, %c0_106] : memref<1x32xf32, #tpu.memory_space<vmem>>, vector<1x32xf32>
    %c0_107 = arith.constant 0 : index
    %c0_108 = arith.constant 0 : index
    %209 = vector.load %arg29[%c0_107, %c0_108] : memref<1x32xf32, #tpu.memory_space<vmem>>, vector<1x32xf32>
    %cst_109 = arith.constant dense<0.000000e+00> : vector<16xf32>
    %210 = vector.multi_reduction <add>, %207, %cst_109 [1] : vector<16x32xf32> to vector<16xf32>
    %211 = vector.shape_cast %210 : vector<16xf32> to vector<16x1xf32>
    %cst_110 = arith.constant 3.200000e+01 : f32
    %212 = vector.broadcast %cst_110 : f32 to vector<16x1xf32>
    %213 = arith.divf %211, %212 : vector<16x1xf32>
    %214 = vector.broadcast %213 : vector<16x1xf32> to vector<16x32xf32>
    %215 = arith.subf %207, %214 : vector<16x32xf32>
    %216 = arith.mulf %215, %215 : vector<16x32xf32>
    %cst_111 = arith.constant dense<0.000000e+00> : vector<16xf32>
    %217 = vector.multi_reduction <add>, %216, %cst_111 [1] : vector<16x32xf32> to vector<16xf32>
    %218 = vector.shape_cast %217 : vector<16xf32> to vector<16x1xf32>
    %cst_112 = arith.constant 3.200000e+01 : f32
    %219 = vector.broadcast %cst_112 : f32 to vector<16x1xf32>
    %220 = arith.divf %218, %219 : vector<16x1xf32>
    %221 = vector.broadcast %213 : vector<16x1xf32> to vector<16x32xf32>
    %222 = arith.subf %207, %221 : vector<16x32xf32>
    %cst_113 = arith.constant 9.99999974E-6 : f32
    %223 = vector.broadcast %cst_113 : f32 to vector<16x1xf32>
    %224 = arith.addf %220, %223 : vector<16x1xf32>
    %225 = math.rsqrt %224 : vector<16x1xf32>
    %226 = vector.broadcast %225 : vector<16x1xf32> to vector<16x32xf32>
    %227 = arith.mulf %222, %226 : vector<16x32xf32>
    %228 = vector.broadcast %208 : vector<1x32xf32> to vector<16x32xf32>
    %229 = arith.mulf %227, %228 : vector<16x32xf32>
    %230 = vector.broadcast %209 : vector<1x32xf32> to vector<16x32xf32>
    %231 = arith.addf %229, %230 : vector<16x32xf32>
    %cst_114 = arith.constant 0.000000e+00 : f32
    %232 = vector.broadcast %cst_114 : f32 to vector<16x32xf32>
    %233 = arith.maximumf %231, %232 : vector<16x32xf32>
    %c0_115 = arith.constant 0 : index
    %c0_116 = arith.constant 0 : index
    %234 = vector.load %arg30[%c0_115, %c0_116] : memref<32x32xf32, #tpu.memory_space<vmem>>, vector<32x32xf32>
    %cst_117 = arith.constant dense<0.000000e+00> : vector<16x32xf32>
    %235 = tpu.matmul %233, %234, %cst_117 {dimension_numbers = #tpu.dot_dimension_numbers<[1], [0], [0], [1], [0, 0, 1, 1], [], []>} : vector<16x32xf32>, vector<32x32xf32>, vector<16x32xf32> -> vector<16x32xf32>
    %c0_118 = arith.constant 0 : index
    %c0_119 = arith.constant 0 : index
    %236 = vector.load %arg31[%c0_118, %c0_119] : memref<1x32xf32, #tpu.memory_space<vmem>>, vector<1x32xf32>
    %237 = vector.broadcast %236 : vector<1x32xf32> to vector<16x32xf32>
    %238 = arith.addf %235, %237 : vector<16x32xf32>
    %239 = arith.addf %238, %0 : vector<16x32xf32>
    %c0_120 = arith.constant 0 : index
    %c0_121 = arith.constant 0 : index
    %240 = vector.load %arg32[%c0_120, %c0_121] : memref<16x32xf32, #tpu.memory_space<vmem>>, vector<16x32xf32>
    tpu.vector_store %arg32[%c0_120, %c0_121], %239 {strides = array<i32>} : memref<16x32xf32, #tpu.memory_space<vmem>>, vector<16x32xf32>,
    return
  }
}

module attributes {stable_mosaic.version = 11 : i64} {
  func.func @_sub_int_fusion_kernel(%arg0: memref<8x32xf32, #tpu.memory_space<vmem>>, %arg1: memref<8x32xf32, #tpu.memory_space<vmem>>, %arg2: memref<32x32xf32, #tpu.memory_space<vmem>>, %arg3: memref<32x32xf32, #tpu.memory_space<vmem>>, %arg4: memref<1x32xf32, #tpu.memory_space<vmem>>, %arg5: memref<32x32xf32, #tpu.memory_space<vmem>>, %arg6: memref<1x32xf32, #tpu.memory_space<vmem>>, %arg7: memref<8x32xf32, #tpu.memory_space<vmem>>) attributes {dimension_semantics = [], scalar_prefetch = 0 : i64, scratch_operands = 0 : i64, tpu.core_type = #tpu.core_type<tc>} {
    %c0 = arith.constant 0 : index
    %c0_0 = arith.constant 0 : index
    %0 = vector.load %arg0[%c0, %c0_0] : memref<8x32xf32, #tpu.memory_space<vmem>>, vector<8x32xf32>
    %c0_1 = arith.constant 0 : index
    %c0_2 = arith.constant 0 : index
    %1 = vector.load %arg2[%c0_1, %c0_2] : memref<32x32xf32, #tpu.memory_space<vmem>>, vector<32x32xf32>
    %cst = arith.constant dense<0.000000e+00> : vector<8x32xf32>
    %2 = tpu.matmul %0, %1, %cst {dimension_numbers = #tpu.dot_dimension_numbers<[1], [0], [0], [1], [0, 0, 1, 1], [], []>} : vector<8x32xf32>, vector<32x32xf32>, vector<8x32xf32> -> vector<8x32xf32>
    %c0_3 = arith.constant 0 : index
    %c0_4 = arith.constant 0 : index
    %3 = vector.load %arg1[%c0_3, %c0_4] : memref<8x32xf32, #tpu.memory_space<vmem>>, vector<8x32xf32>
    %c0_5 = arith.constant 0 : index
    %c0_6 = arith.constant 0 : index
    %4 = vector.load %arg3[%c0_5, %c0_6] : memref<32x32xf32, #tpu.memory_space<vmem>>, vector<32x32xf32>
    %cst_7 = arith.constant dense<0.000000e+00> : vector<8x32xf32>
    %5 = tpu.matmul %3, %4, %cst_7 {dimension_numbers = #tpu.dot_dimension_numbers<[1], [0], [0], [1], [0, 0, 1, 1], [], []>} : vector<8x32xf32>, vector<32x32xf32>, vector<8x32xf32> -> vector<8x32xf32>
    %6 = arith.addf %2, %5 : vector<8x32xf32>
    %c0_8 = arith.constant 0 : index
    %c0_9 = arith.constant 0 : index
    %7 = vector.load %arg4[%c0_8, %c0_9] : memref<1x32xf32, #tpu.memory_space<vmem>>, vector<1x32xf32>
    %8 = vector.broadcast %7 : vector<1x32xf32> to vector<8x32xf32>
    %9 = arith.addf %6, %8 : vector<8x32xf32>
    %10 = arith.negf %9 : vector<8x32xf32>
    %11 = math.exp %10 : vector<8x32xf32>
    %cst_10 = arith.constant 1.000000e+00 : f32
    %12 = vector.broadcast %cst_10 : f32 to vector<8x32xf32>
    %13 = arith.addf %12, %11 : vector<8x32xf32>
    %14 = arith.divf %12, %13 : vector<8x32xf32>
    %15 = arith.mulf %9, %14 : vector<8x32xf32>
    %c0_11 = arith.constant 0 : index
    %c0_12 = arith.constant 0 : index
    %16 = vector.load %arg5[%c0_11, %c0_12] : memref<32x32xf32, #tpu.memory_space<vmem>>, vector<32x32xf32>
    %cst_13 = arith.constant dense<0.000000e+00> : vector<8x32xf32>
    %17 = tpu.matmul %15, %16, %cst_13 {dimension_numbers = #tpu.dot_dimension_numbers<[1], [0], [0], [1], [0, 0, 1, 1], [], []>} : vector<8x32xf32>, vector<32x32xf32>, vector<8x32xf32> -> vector<8x32xf32>
    %c0_14 = arith.constant 0 : index
    %c0_15 = arith.constant 0 : index
    %18 = vector.load %arg6[%c0_14, %c0_15] : memref<1x32xf32, #tpu.memory_space<vmem>>, vector<1x32xf32>
    %19 = vector.broadcast %18 : vector<1x32xf32> to vector<8x32xf32>
    %20 = arith.addf %17, %19 : vector<8x32xf32>
    %21 = arith.addf %20, %0 : vector<8x32xf32>
    %c0_16 = arith.constant 0 : index
    %c0_17 = arith.constant 0 : index
    %22 = vector.load %arg7[%c0_16, %c0_17] : memref<8x32xf32, #tpu.memory_space<vmem>>, vector<8x32xf32>
    tpu.vector_store %arg7[%c0_16, %c0_17], %21 {strides = array<i32>} : memref<8x32xf32, #tpu.memory_space<vmem>>, vector<8x32xf32>,
    return
  }
}

module attributes {stable_mosaic.version = 11 : i64} {
  func.func @_x2h_fused_kernel(%arg0: memref<8x32xf32, #tpu.memory_space<vmem>>, %arg1: memref<16x20xf32, #tpu.memory_space<vmem>>, %arg2: memref<1x16xi32, #tpu.memory_space<vmem>>, %arg3: memref<16x1xi32, #tpu.memory_space<vmem>>, %arg4: memref<16x1xi32, #tpu.memory_space<vmem>>, %arg5: memref<32x4xf32, #tpu.memory_space<vmem>>, %arg6: memref<4x32xf32, #tpu.memory_space<vmem>>, %arg7: memref<20x64xf32, #tpu.memory_space<vmem>>, %arg8: memref<32x64xf32, #tpu.memory_space<vmem>>, %arg9: memref<32x64xf32, #tpu.memory_space<vmem>>, %arg10: memref<1x64xf32, #tpu.memory_space<vmem>>, %arg11: memref<1x64xf32, #tpu.memory_space<vmem>>, %arg12: memref<1x64xf32, #tpu.memory_space<vmem>>, %arg13: memref<32x32xf32, #tpu.memory_space<vmem>>, %arg14: memref<1x32xf32, #tpu.memory_space<vmem>>, %arg15: memref<32x32xf32, #tpu.memory_space<vmem>>, %arg16: memref<1x32xf32, #tpu.memory_space<vmem>>, %arg17: memref<32x32xf32, #tpu.memory_space<vmem>>, %arg18: memref<1x32xf32, #tpu.memory_space<vmem>>, %arg19: memref<1x32xf32, #tpu.memory_space<vmem>>, %arg20: memref<1x32xf32, #tpu.memory_space<vmem>>, %arg21: memref<32x32xf32, #tpu.memory_space<vmem>>, %arg22: memref<1x32xf32, #tpu.memory_space<vmem>>, %arg23: memref<20x1xf32, #tpu.memory_space<vmem>>, %arg24: memref<1x1xf32, #tpu.memory_space<vmem>>, %arg25: memref<32x32xf32, #tpu.memory_space<vmem>>, %arg26: memref<32x32xf32, #tpu.memory_space<vmem>>, %arg27: memref<1x32xf32, #tpu.memory_space<vmem>>, %arg28: memref<1x32xf32, #tpu.memory_space<vmem>>, %arg29: memref<1x32xf32, #tpu.memory_space<vmem>>, %arg30: memref<32x32xf32, #tpu.memory_space<vmem>>, %arg31: memref<1x32xf32, #tpu.memory_space<vmem>>, %arg32: memref<8x32xf32, #tpu.memory_space<vmem>>) attributes {dimension_semantics = [], scalar_prefetch = 0 : i64, scratch_operands = 0 : i64, tpu.core_type = #tpu.core_type<tc>} {
    %c0 = arith.constant 0 : index
    %c0_0 = arith.constant 0 : index
    %0 = vector.load %arg0[%c0, %c0_0] : memref<8x32xf32, #tpu.memory_space<vmem>>, vector<8x32xf32>
    %c0_1 = arith.constant 0 : index
    %c0_2 = arith.constant 0 : index
    %1 = vector.load %arg1[%c0_1, %c0_2] : memref<16x20xf32, #tpu.memory_space<vmem>>, vector<16x20xf32>
    %c0_3 = arith.constant 0 : index
    %c0_4 = arith.constant 0 : index
    %2 = vector.load %arg2[%c0_3, %c0_4] : memref<1x16xi32, #tpu.memory_space<vmem>>, vector<1x16xi32>
    %c0_5 = arith.constant 0 : index
    %c0_6 = arith.constant 0 : index
    %3 = vector.load %arg3[%c0_5, %c0_6] : memref<16x1xi32, #tpu.memory_space<vmem>>, vector<16x1xi32>
    %c0_7 = arith.constant 0 : index
    %c0_8 = arith.constant 0 : index
    %4 = vector.load %arg4[%c0_7, %c0_8] : memref<16x1xi32, #tpu.memory_space<vmem>>, vector<16x1xi32>
    %5 = tpu.iota {dimensions = array<i32: 0>} : vector<8x16xi32>
    %6 = tpu.iota {dimensions = array<i32: 1>} : vector<16x8xi32>
    %7 = vector.broadcast %2 : vector<1x16xi32> to vector<8x16xi32>
    %8 = arith.cmpi eq, %5, %7 : vector<8x16xi32>
    %9 = arith.extui %8 : vector<8x16xi1> to vector<8x16xi32>
    %10 = arith.sitofp %9 : vector<8x16xi32> to vector<8x16xf32>
    %11 = vector.broadcast %3 : vector<16x1xi32> to vector<16x8xi32>
    %12 = arith.cmpi eq, %6, %11 : vector<16x8xi32>
    %13 = arith.extui %12 : vector<16x8xi1> to vector<16x8xi32>
    %14 = arith.sitofp %13 : vector<16x8xi32> to vector<16x8xf32>
    %15 = vector.broadcast %4 : vector<16x1xi32> to vector<16x8xi32>
    %16 = arith.cmpi eq, %6, %15 : vector<16x8xi32>
    %17 = arith.extui %16 : vector<16x8xi1> to vector<16x8xi32>
    %18 = arith.sitofp %17 : vector<16x8xi32> to vector<16x8xf32>
    %c0_9 = arith.constant 0 : index
    %c0_10 = arith.constant 0 : index
    %19 = vector.load %arg7[%c0_9, %c0_10] : memref<20x64xf32, #tpu.memory_space<vmem>>, vector<20x64xf32>
    %c0_11 = arith.constant 0 : index
    %c0_12 = arith.constant 0 : index
    %20 = vector.load %arg8[%c0_11, %c0_12] : memref<32x64xf32, #tpu.memory_space<vmem>>, vector<32x64xf32>
    %c0_13 = arith.constant 0 : index
    %c0_14 = arith.constant 0 : index
    %21 = vector.load %arg9[%c0_13, %c0_14] : memref<32x64xf32, #tpu.memory_space<vmem>>, vector<32x64xf32>
    %c0_15 = arith.constant 0 : index
    %c0_16 = arith.constant 0 : index
    %22 = vector.load %arg10[%c0_15, %c0_16] : memref<1x64xf32, #tpu.memory_space<vmem>>, vector<1x64xf32>
    %c0_17 = arith.constant 0 : index
    %c0_18 = arith.constant 0 : index
    %23 = vector.load %arg11[%c0_17, %c0_18] : memref<1x64xf32, #tpu.memory_space<vmem>>, vector<1x64xf32>
    %c0_19 = arith.constant 0 : index
    %c0_20 = arith.constant 0 : index
    %24 = vector.load %arg12[%c0_19, %c0_20] : memref<1x64xf32, #tpu.memory_space<vmem>>, vector<1x64xf32>
    %c0_21 = arith.constant 0 : index
    %c0_22 = arith.constant 0 : index
    %25 = vector.load %arg13[%c0_21, %c0_22] : memref<32x32xf32, #tpu.memory_space<vmem>>, vector<32x32xf32>
    %c0_23 = arith.constant 0 : index
    %c0_24 = arith.constant 0 : index
    %26 = vector.load %arg14[%c0_23, %c0_24] : memref<1x32xf32, #tpu.memory_space<vmem>>, vector<1x32xf32>
    %c0_25 = arith.constant 0 : index
    %c0_26 = arith.constant 0 : index
    %27 = vector.load %arg15[%c0_25, %c0_26] : memref<32x32xf32, #tpu.memory_space<vmem>>, vector<32x32xf32>
    %c0_27 = arith.constant 0 : index
    %c0_28 = arith.constant 0 : index
    %28 = vector.load %arg16[%c0_27, %c0_28] : memref<1x32xf32, #tpu.memory_space<vmem>>, vector<1x32xf32>
    %c0_29 = arith.constant 0 : index
    %c0_30 = arith.constant 0 : index
    %29 = vector.load %arg17[%c0_29, %c0_30] : memref<32x32xf32, #tpu.memory_space<vmem>>, vector<32x32xf32>
    %c0_31 = arith.constant 0 : index
    %c0_32 = arith.constant 0 : index
    %30 = vector.load %arg18[%c0_31, %c0_32] : memref<1x32xf32, #tpu.memory_space<vmem>>, vector<1x32xf32>
    %c0_33 = arith.constant 0 : index
    %c0_34 = arith.constant 0 : index
    %31 = vector.load %arg19[%c0_33, %c0_34] : memref<1x32xf32, #tpu.memory_space<vmem>>, vector<1x32xf32>
    %c0_35 = arith.constant 0 : index
    %c0_36 = arith.constant 0 : index
    %32 = vector.load %arg20[%c0_35, %c0_36] : memref<1x32xf32, #tpu.memory_space<vmem>>, vector<1x32xf32>
    %c0_37 = arith.constant 0 : index
    %c0_38 = arith.constant 0 : index
    %33 = vector.load %arg21[%c0_37, %c0_38] : memref<32x32xf32, #tpu.memory_space<vmem>>, vector<32x32xf32>
    %c0_39 = arith.constant 0 : index
    %c0_40 = arith.constant 0 : index
    %34 = vector.load %arg22[%c0_39, %c0_40] : memref<1x32xf32, #tpu.memory_space<vmem>>, vector<1x32xf32>
    %c0_41 = arith.constant 0 : index
    %c0_42 = arith.constant 0 : index
    %35 = vector.load %arg23[%c0_41, %c0_42] : memref<20x1xf32, #tpu.memory_space<vmem>>, vector<20x1xf32>
    %c0_43 = arith.constant 0 : index
    %c0_44 = arith.constant 0 : index
    %36 = vector.load %arg24[%c0_43, %c0_44] : memref<1x1xf32, #tpu.memory_space<vmem>>, vector<1x1xf32>
    %c0_45 = arith.constant 0 : index
    %c0_46 = arith.constant 0 : index
    %37 = vector.load %arg5[%c0_45, %c0_46] : memref<32x4xf32, #tpu.memory_space<vmem>>, vector<32x4xf32>
    %cst = arith.constant dense<0.000000e+00> : vector<16x32xf32>
    %38 = tpu.matmul %14, %0, %cst {dimension_numbers = #tpu.dot_dimension_numbers<[1], [0], [0], [1], [0, 0, 1, 1], [], []>} : vector<16x8xf32>, vector<8x32xf32>, vector<16x32xf32> -> vector<16x32xf32>
    %cst_47 = arith.constant dense<0.000000e+00> : vector<16x32xf32>
    %39 = tpu.matmul %18, %0, %cst_47 {dimension_numbers = #tpu.dot_dimension_numbers<[1], [0], [0], [1], [0, 0, 1, 1], [], []>} : vector<16x8xf32>, vector<8x32xf32>, vector<16x32xf32> -> vector<16x32xf32>
    %cst_48 = arith.constant dense<0.000000e+00> : vector<16x64xf32>
    %40 = tpu.matmul %1, %19, %cst_48 {dimension_numbers = #tpu.dot_dimension_numbers<[1], [0], [0], [1], [0, 0, 1, 1], [], []>} : vector<16x20xf32>, vector<20x64xf32>, vector<16x64xf32> -> vector<16x64xf32>
    %cst_49 = arith.constant dense<0.000000e+00> : vector<16x64xf32>
    %41 = tpu.matmul %38, %20, %cst_49 {dimension_numbers = #tpu.dot_dimension_numbers<[1], [0], [0], [1], [0, 0, 1, 1], [], []>} : vector<16x32xf32>, vector<32x64xf32>, vector<16x64xf32> -> vector<16x64xf32>
    %42 = arith.addf %40, %41 : vector<16x64xf32>
    %cst_50 = arith.constant dense<0.000000e+00> : vector<16x64xf32>
    %43 = tpu.matmul %39, %21, %cst_50 {dimension_numbers = #tpu.dot_dimension_numbers<[1], [0], [0], [1], [0, 0, 1, 1], [], []>} : vector<16x32xf32>, vector<32x64xf32>, vector<16x64xf32> -> vector<16x64xf32>
    %44 = arith.addf %42, %43 : vector<16x64xf32>
    %45 = vector.broadcast %22 : vector<1x64xf32> to vector<16x64xf32>
    %46 = arith.addf %44, %45 : vector<16x64xf32>
    %47 = vector.extract_strided_slice %46 {offsets = [0, 0], sizes = [16, 32], strides = [1, 1]} : vector<16x64xf32> to vector<16x32xf32>
    %48 = vector.extract_strided_slice %23 {offsets = [0, 0], sizes = [1, 32], strides = [1, 1]} : vector<1x64xf32> to vector<1x32xf32>
    %49 = vector.extract_strided_slice %24 {offsets = [0, 0], sizes = [1, 32], strides = [1, 1]} : vector<1x64xf32> to vector<1x32xf32>
    %cst_51 = arith.constant dense<0.000000e+00> : vector<16xf32>
    %50 = vector.multi_reduction <add>, %47, %cst_51 [1] : vector<16x32xf32> to vector<16xf32>
    %51 = vector.shape_cast %50 : vector<16xf32> to vector<16x1xf32>
    %cst_52 = arith.constant 3.200000e+01 : f32
    %52 = vector.broadcast %cst_52 : f32 to vector<16x1xf32>
    %53 = arith.divf %51, %52 : vector<16x1xf32>
    %54 = vector.broadcast %53 : vector<16x1xf32> to vector<16x32xf32>
    %55 = arith.subf %47, %54 : vector<16x32xf32>
    %56 = arith.mulf %55, %55 : vector<16x32xf32>
    %cst_53 = arith.constant dense<0.000000e+00> : vector<16xf32>
    %57 = vector.multi_reduction <add>, %56, %cst_53 [1] : vector<16x32xf32> to vector<16xf32>
    %58 = vector.shape_cast %57 : vector<16xf32> to vector<16x1xf32>
    %cst_54 = arith.constant 3.200000e+01 : f32
    %59 = vector.broadcast %cst_54 : f32 to vector<16x1xf32>
    %60 = arith.divf %58, %59 : vector<16x1xf32>
    %61 = vector.broadcast %53 : vector<16x1xf32> to vector<16x32xf32>
    %62 = arith.subf %47, %61 : vector<16x32xf32>
    %cst_55 = arith.constant 9.99999974E-6 : f32
    %63 = vector.broadcast %cst_55 : f32 to vector<16x1xf32>
    %64 = arith.addf %60, %63 : vector<16x1xf32>
    %65 = math.rsqrt %64 : vector<16x1xf32>
    %66 = vector.broadcast %65 : vector<16x1xf32> to vector<16x32xf32>
    %67 = arith.mulf %62, %66 : vector<16x32xf32>
    %68 = vector.broadcast %48 : vector<1x32xf32> to vector<16x32xf32>
    %69 = arith.mulf %67, %68 : vector<16x32xf32>
    %70 = vector.broadcast %49 : vector<1x32xf32> to vector<16x32xf32>
    %71 = arith.addf %69, %70 : vector<16x32xf32>
    %cst_56 = arith.constant 0.000000e+00 : f32
    %72 = vector.broadcast %cst_56 : f32 to vector<16x32xf32>
    %73 = arith.maximumf %71, %72 : vector<16x32xf32>
    %74 = vector.extract_strided_slice %46 {offsets = [0, 32], sizes = [16, 32], strides = [1, 1]} : vector<16x64xf32> to vector<16x32xf32>
    %75 = vector.extract_strided_slice %23 {offsets = [0, 32], sizes = [1, 32], strides = [1, 1]} : vector<1x64xf32> to vector<1x32xf32>
    %76 = vector.extract_strided_slice %24 {offsets = [0, 32], sizes = [1, 32], strides = [1, 1]} : vector<1x64xf32> to vector<1x32xf32>
    %cst_57 = arith.constant dense<0.000000e+00> : vector<16xf32>
    %77 = vector.multi_reduction <add>, %74, %cst_57 [1] : vector<16x32xf32> to vector<16xf32>
    %78 = vector.shape_cast %77 : vector<16xf32> to vector<16x1xf32>
    %cst_58 = arith.constant 3.200000e+01 : f32
    %79 = vector.broadcast %cst_58 : f32 to vector<16x1xf32>
    %80 = arith.divf %78, %79 : vector<16x1xf32>
    %81 = vector.broadcast %80 : vector<16x1xf32> to vector<16x32xf32>
    %82 = arith.subf %74, %81 : vector<16x32xf32>
    %83 = arith.mulf %82, %82 : vector<16x32xf32>
    %cst_59 = arith.constant dense<0.000000e+00> : vector<16xf32>
    %84 = vector.multi_reduction <add>, %83, %cst_59 [1] : vector<16x32xf32> to vector<16xf32>
    %85 = vector.shape_cast %84 : vector<16xf32> to vector<16x1xf32>
    %cst_60 = arith.constant 3.200000e+01 : f32
    %86 = vector.broadcast %cst_60 : f32 to vector<16x1xf32>
    %87 = arith.divf %85, %86 : vector<16x1xf32>
    %88 = vector.broadcast %80 : vector<16x1xf32> to vector<16x32xf32>
    %89 = arith.subf %74, %88 : vector<16x32xf32>
    %cst_61 = arith.constant 9.99999974E-6 : f32
    %90 = vector.broadcast %cst_61 : f32 to vector<16x1xf32>
    %91 = arith.addf %87, %90 : vector<16x1xf32>
    %92 = math.rsqrt %91 : vector<16x1xf32>
    %93 = vector.broadcast %92 : vector<16x1xf32> to vector<16x32xf32>
    %94 = arith.mulf %89, %93 : vector<16x32xf32>
    %95 = vector.broadcast %75 : vector<1x32xf32> to vector<16x32xf32>
    %96 = arith.mulf %94, %95 : vector<16x32xf32>
    %97 = vector.broadcast %76 : vector<1x32xf32> to vector<16x32xf32>
    %98 = arith.addf %96, %97 : vector<16x32xf32>
    %cst_62 = arith.constant 0.000000e+00 : f32
    %99 = vector.broadcast %cst_62 : f32 to vector<16x32xf32>
    %100 = arith.maximumf %98, %99 : vector<16x32xf32>
    %cst_63 = arith.constant dense<0.000000e+00> : vector<16x32xf32>
    %101 = tpu.matmul %73, %25, %cst_63 {dimension_numbers = #tpu.dot_dimension_numbers<[1], [0], [0], [1], [0, 0, 1, 1], [], []>} : vector<16x32xf32>, vector<32x32xf32>, vector<16x32xf32> -> vector<16x32xf32>
    %102 = vector.broadcast %26 : vector<1x32xf32> to vector<16x32xf32>
    %103 = arith.addf %101, %102 : vector<16x32xf32>
    %cst_64 = arith.constant dense<0.000000e+00> : vector<16x32xf32>
    %104 = tpu.matmul %100, %27, %cst_64 {dimension_numbers = #tpu.dot_dimension_numbers<[1], [0], [0], [1], [0, 0, 1, 1], [], []>} : vector<16x32xf32>, vector<32x32xf32>, vector<16x32xf32> -> vector<16x32xf32>
    %105 = vector.broadcast %28 : vector<1x32xf32> to vector<16x32xf32>
    %106 = arith.addf %104, %105 : vector<16x32xf32>
    %cst_65 = arith.constant dense<0.000000e+00> : vector<16x1xf32>
    %107 = tpu.matmul %1, %35, %cst_65 {dimension_numbers = #tpu.dot_dimension_numbers<[1], [0], [0], [1], [0, 0, 1, 1], [], []>} : vector<16x20xf32>, vector<20x1xf32>, vector<16x1xf32> -> vector<16x1xf32>
    %108 = vector.broadcast %36 : vector<1x1xf32> to vector<16x1xf32>
    %109 = arith.addf %107, %108 : vector<16x1xf32>
    %110 = arith.negf %109 : vector<16x1xf32>
    %111 = math.exp %110 : vector<16x1xf32>
    %cst_66 = arith.constant 1.000000e+00 : f32
    %112 = vector.broadcast %cst_66 : f32 to vector<16x1xf32>
    %113 = arith.addf %112, %111 : vector<16x1xf32>
    %114 = arith.divf %112, %113 : vector<16x1xf32>
    %115 = vector.broadcast %114 : vector<16x1xf32> to vector<16x32xf32>
    %116 = arith.mulf %106, %115 : vector<16x32xf32>
    %cst_67 = arith.constant dense<0.000000e+00> : vector<8x32xf32>
    %117 = tpu.matmul %0, %29, %cst_67 {dimension_numbers = #tpu.dot_dimension_numbers<[1], [0], [0], [1], [0, 0, 1, 1], [], []>} : vector<8x32xf32>, vector<32x32xf32>, vector<8x32xf32> -> vector<8x32xf32>
    %118 = vector.broadcast %30 : vector<1x32xf32> to vector<8x32xf32>
    %119 = arith.addf %117, %118 : vector<8x32xf32>
    %cst_68 = arith.constant dense<0.000000e+00> : vector<8xf32>
    %120 = vector.multi_reduction <add>, %119, %cst_68 [1] : vector<8x32xf32> to vector<8xf32>
    %121 = vector.shape_cast %120 : vector<8xf32> to vector<8x1xf32>
    %cst_69 = arith.constant 3.200000e+01 : f32
    %122 = vector.broadcast %cst_69 : f32 to vector<8x1xf32>
    %123 = arith.divf %121, %122 : vector<8x1xf32>
    %124 = vector.broadcast %123 : vector<8x1xf32> to vector<8x32xf32>
    %125 = arith.subf %119, %124 : vector<8x32xf32>
    %126 = arith.mulf %125, %125 : vector<8x32xf32>
    %cst_70 = arith.constant dense<0.000000e+00> : vector<8xf32>
    %127 = vector.multi_reduction <add>, %126, %cst_70 [1] : vector<8x32xf32> to vector<8xf32>
    %128 = vector.shape_cast %127 : vector<8xf32> to vector<8x1xf32>
    %cst_71 = arith.constant 3.200000e+01 : f32
    %129 = vector.broadcast %cst_71 : f32 to vector<8x1xf32>
    %130 = arith.divf %128, %129 : vector<8x1xf32>
    %131 = vector.broadcast %123 : vector<8x1xf32> to vector<8x32xf32>
    %132 = arith.subf %119, %131 : vector<8x32xf32>
    %cst_72 = arith.constant 9.99999974E-6 : f32
    %133 = vector.broadcast %cst_72 : f32 to vector<8x1xf32>
    %134 = arith.addf %130, %133 : vector<8x1xf32>
    %135 = math.rsqrt %134 : vector<8x1xf32>
    %136 = vector.broadcast %135 : vector<8x1xf32> to vector<8x32xf32>
    %137 = arith.mulf %132, %136 : vector<8x32xf32>
    %138 = vector.broadcast %31 : vector<1x32xf32> to vector<8x32xf32>
    %139 = arith.mulf %137, %138 : vector<8x32xf32>
    %140 = vector.broadcast %32 : vector<1x32xf32> to vector<8x32xf32>
    %141 = arith.addf %139, %140 : vector<8x32xf32>
    %cst_73 = arith.constant 0.000000e+00 : f32
    %142 = vector.broadcast %cst_73 : f32 to vector<8x32xf32>
    %143 = arith.maximumf %141, %142 : vector<8x32xf32>
    %cst_74 = arith.constant dense<0.000000e+00> : vector<8x32xf32>
    %144 = tpu.matmul %143, %33, %cst_74 {dimension_numbers = #tpu.dot_dimension_numbers<[1], [0], [0], [1], [0, 0, 1, 1], [], []>} : vector<8x32xf32>, vector<32x32xf32>, vector<8x32xf32> -> vector<8x32xf32>
    %145 = vector.broadcast %34 : vector<1x32xf32> to vector<8x32xf32>
    %146 = arith.addf %144, %145 : vector<8x32xf32>
    %cst_75 = arith.constant dense<0.000000e+00> : vector<16x32xf32>
    %147 = tpu.matmul %14, %146, %cst_75 {dimension_numbers = #tpu.dot_dimension_numbers<[1], [0], [0], [1], [0, 0, 1, 1], [], []>} : vector<16x8xf32>, vector<8x32xf32>, vector<16x32xf32> -> vector<16x32xf32>
    %148 = arith.mulf %147, %103 : vector<16x32xf32>
    %cst_76 = arith.constant dense<0.000000e+00> : vector<16x4xf32>
    %149 = tpu.matmul %148, %37, %cst_76 {dimension_numbers = #tpu.dot_dimension_numbers<[1], [0], [0], [1], [0, 0, 1, 1], [], []>} : vector<16x32xf32>, vector<32x4xf32>, vector<16x4xf32> -> vector<16x4xf32>
    %cst_77 = arith.constant 0.353553385 : f32
    %150 = vector.broadcast %cst_77 : f32 to vector<16x4xf32>
    %151 = arith.mulf %149, %150 : vector<16x4xf32>
    %152 = tpu.transpose %151, [1, 0] : vector<16x4xf32> -> vector<4x16xf32>
    %cst_78 = arith.constant 5.000000e-01 : f32
    %153 = vector.broadcast %cst_78 : f32 to vector<8x16xf32>
    %154 = arith.cmpf ogt, %10, %153 : vector<8x16xf32>
    %155 = vector.extract_strided_slice %152 {offsets = [0, 0], sizes = [1, 16], strides = [1, 1]} : vector<4x16xf32> to vector<1x16xf32>
    %cst_79 = arith.constant -1.000000e+30 : f32
    %156 = vector.shape_cast %155 : vector<1x16xf32> to vector<1x16xf32>
    %157 = vector.broadcast %156 : vector<1x16xf32> to vector<8x16xf32>
    %158 = vector.broadcast %cst_79 : f32 to vector<8x16xf32>
    %159 = arith.select %154, %157, %158 : vector<8x16xi1>, vector<8x16xf32>
    %cst_80 = arith.constant dense<0xFF800000> : vector<8xf32>
    %160 = vector.multi_reduction <maximumf>, %159, %cst_80 [1] : vector<8x16xf32> to vector<8xf32>
    %161 = vector.shape_cast %160 : vector<8xf32> to vector<8x1xf32>
    %cst_81 = arith.constant 5.000000e-01 : f32
    %162 = vector.broadcast %cst_81 : f32 to vector<8x16xf32>
    %163 = arith.cmpf ogt, %10, %162 : vector<8x16xf32>
    %164 = vector.extract_strided_slice %152 {offsets = [1, 0], sizes = [1, 16], strides = [1, 1]} : vector<4x16xf32> to vector<1x16xf32>
    %cst_82 = arith.constant -1.000000e+30 : f32
    %165 = vector.shape_cast %164 : vector<1x16xf32> to vector<1x16xf32>
    %166 = vector.broadcast %165 : vector<1x16xf32> to vector<8x16xf32>
    %167 = vector.broadcast %cst_82 : f32 to vector<8x16xf32>
    %168 = arith.select %163, %166, %167 : vector<8x16xi1>, vector<8x16xf32>
    %cst_83 = arith.constant dense<0xFF800000> : vector<8xf32>
    %169 = vector.multi_reduction <maximumf>, %168, %cst_83 [1] : vector<8x16xf32> to vector<8xf32>
    %170 = vector.shape_cast %169 : vector<8xf32> to vector<8x1xf32>
    %cst_84 = arith.constant 5.000000e-01 : f32
    %171 = vector.broadcast %cst_84 : f32 to vector<8x16xf32>
    %172 = arith.cmpf ogt, %10, %171 : vector<8x16xf32>
    %173 = vector.extract_strided_slice %152 {offsets = [2, 0], sizes = [1, 16], strides = [1, 1]} : vector<4x16xf32> to vector<1x16xf32>
    %cst_85 = arith.constant -1.000000e+30 : f32
    %174 = vector.shape_cast %173 : vector<1x16xf32> to vector<1x16xf32>
    %175 = vector.broadcast %174 : vector<1x16xf32> to vector<8x16xf32>
    %176 = vector.broadcast %cst_85 : f32 to vector<8x16xf32>
    %177 = arith.select %172, %175, %176 : vector<8x16xi1>, vector<8x16xf32>
    %cst_86 = arith.constant dense<0xFF800000> : vector<8xf32>
    %178 = vector.multi_reduction <maximumf>, %177, %cst_86 [1] : vector<8x16xf32> to vector<8xf32>
    %179 = vector.shape_cast %178 : vector<8xf32> to vector<8x1xf32>
    %cst_87 = arith.constant 5.000000e-01 : f32
    %180 = vector.broadcast %cst_87 : f32 to vector<8x16xf32>
    %181 = arith.cmpf ogt, %10, %180 : vector<8x16xf32>
    %182 = vector.extract_strided_slice %152 {offsets = [3, 0], sizes = [1, 16], strides = [1, 1]} : vector<4x16xf32> to vector<1x16xf32>
    %cst_88 = arith.constant -1.000000e+30 : f32
    %183 = vector.shape_cast %182 : vector<1x16xf32> to vector<1x16xf32>
    %184 = vector.broadcast %183 : vector<1x16xf32> to vector<8x16xf32>
    %185 = vector.broadcast %cst_88 : f32 to vector<8x16xf32>
    %186 = arith.select %181, %184, %185 : vector<8x16xi1>, vector<8x16xf32>
    %cst_89 = arith.constant dense<0xFF800000> : vector<8xf32>
    %187 = vector.multi_reduction <maximumf>, %186, %cst_89 [1] : vector<8x16xf32> to vector<8xf32>
    %188 = vector.shape_cast %187 : vector<8xf32> to vector<8x1xf32>
    %189 = tpu.concatenate %161, %170, %179, %188 in 1 : vector<8x1xf32>, vector<8x1xf32>, vector<8x1xf32>, vector<8x1xf32> -> vector<8x4xf32>
    %cst_90 = arith.constant dense<0.000000e+00> : vector<16x4xf32>
    %190 = tpu.matmul %14, %189, %cst_90 {dimension_numbers = #tpu.dot_dimension_numbers<[1], [0], [0], [1], [0, 0, 1, 1], [], []>} : vector<16x8xf32>, vector<8x4xf32>, vector<16x4xf32> -> vector<16x4xf32>
    %191 = arith.subf %151, %190 : vector<16x4xf32>
    %192 = math.exp %191 : vector<16x4xf32>
    %cst_91 = arith.constant dense<0.000000e+00> : vector<8x4xf32>
    %193 = tpu.matmul %10, %192, %cst_91 {dimension_numbers = #tpu.dot_dimension_numbers<[1], [0], [0], [1], [0, 0, 1, 1], [], []>} : vector<8x16xf32>, vector<16x4xf32>, vector<8x4xf32> -> vector<8x4xf32>
    %cst_92 = arith.constant dense<0.000000e+00> : vector<16x4xf32>
    %194 = tpu.matmul %14, %193, %cst_92 {dimension_numbers = #tpu.dot_dimension_numbers<[1], [0], [0], [1], [0, 0, 1, 1], [], []>} : vector<16x8xf32>, vector<8x4xf32>, vector<16x4xf32> -> vector<16x4xf32>
    %195 = arith.divf %192, %194 : vector<16x4xf32>
    %c0_93 = arith.constant 0 : index
    %c0_94 = arith.constant 0 : index
    %196 = vector.load %arg6[%c0_93, %c0_94] : memref<4x32xf32, #tpu.memory_space<vmem>>, vector<4x32xf32>
    %cst_95 = arith.constant dense<0.000000e+00> : vector<16x32xf32>
    %197 = tpu.matmul %195, %196, %cst_95 {dimension_numbers = #tpu.dot_dimension_numbers<[1], [0], [0], [1], [0, 0, 1, 1], [], []>} : vector<16x4xf32>, vector<4x32xf32>, vector<16x32xf32> -> vector<16x32xf32>
    %198 = arith.mulf %197, %116 : vector<16x32xf32>
    %cst_96 = arith.constant dense<0.000000e+00> : vector<8x32xf32>
    %199 = tpu.matmul %10, %198, %cst_96 {dimension_numbers = #tpu.dot_dimension_numbers<[1], [0], [0], [1], [0, 0, 1, 1], [], []>} : vector<8x16xf32>, vector<16x32xf32>, vector<8x32xf32> -> vector<8x32xf32>
    %c0_97 = arith.constant 0 : index
    %c0_98 = arith.constant 0 : index
    %200 = vector.load %arg25[%c0_97, %c0_98] : memref<32x32xf32, #tpu.memory_space<vmem>>, vector<32x32xf32>
    %cst_99 = arith.constant dense<0.000000e+00> : vector<8x32xf32>
    %201 = tpu.matmul %199, %200, %cst_99 {dimension_numbers = #tpu.dot_dimension_numbers<[1], [0], [0], [1], [0, 0, 1, 1], [], []>} : vector<8x32xf32>, vector<32x32xf32>, vector<8x32xf32> -> vector<8x32xf32>
    %c0_100 = arith.constant 0 : index
    %c0_101 = arith.constant 0 : index
    %202 = vector.load %arg26[%c0_100, %c0_101] : memref<32x32xf32, #tpu.memory_space<vmem>>, vector<32x32xf32>
    %cst_102 = arith.constant dense<0.000000e+00> : vector<8x32xf32>
    %203 = tpu.matmul %0, %202, %cst_102 {dimension_numbers = #tpu.dot_dimension_numbers<[1], [0], [0], [1], [0, 0, 1, 1], [], []>} : vector<8x32xf32>, vector<32x32xf32>, vector<8x32xf32> -> vector<8x32xf32>
    %204 = arith.addf %201, %203 : vector<8x32xf32>
    %c0_103 = arith.constant 0 : index
    %c0_104 = arith.constant 0 : index
    %205 = vector.load %arg27[%c0_103, %c0_104] : memref<1x32xf32, #tpu.memory_space<vmem>>, vector<1x32xf32>
    %206 = vector.broadcast %205 : vector<1x32xf32> to vector<8x32xf32>
    %207 = arith.addf %204, %206 : vector<8x32xf32>
    %c0_105 = arith.constant 0 : index
    %c0_106 = arith.constant 0 : index
    %208 = vector.load %arg28[%c0_105, %c0_106] : memref<1x32xf32, #tpu.memory_space<vmem>>, vector<1x32xf32>
    %c0_107 = arith.constant 0 : index
    %c0_108 = arith.constant 0 : index
    %209 = vector.load %arg29[%c0_107, %c0_108] : memref<1x32xf32, #tpu.memory_space<vmem>>, vector<1x32xf32>
    %cst_109 = arith.constant dense<0.000000e+00> : vector<8xf32>
    %210 = vector.multi_reduction <add>, %207, %cst_109 [1] : vector<8x32xf32> to vector<8xf32>
    %211 = vector.shape_cast %210 : vector<8xf32> to vector<8x1xf32>
    %cst_110 = arith.constant 3.200000e+01 : f32
    %212 = vector.broadcast %cst_110 : f32 to vector<8x1xf32>
    %213 = arith.divf %211, %212 : vector<8x1xf32>
    %214 = vector.broadcast %213 : vector<8x1xf32> to vector<8x32xf32>
    %215 = arith.subf %207, %214 : vector<8x32xf32>
    %216 = arith.mulf %215, %215 : vector<8x32xf32>
    %cst_111 = arith.constant dense<0.000000e+00> : vector<8xf32>
    %217 = vector.multi_reduction <add>, %216, %cst_111 [1] : vector<8x32xf32> to vector<8xf32>
    %218 = vector.shape_cast %217 : vector<8xf32> to vector<8x1xf32>
    %cst_112 = arith.constant 3.200000e+01 : f32
    %219 = vector.broadcast %cst_112 : f32 to vector<8x1xf32>
    %220 = arith.divf %218, %219 : vector<8x1xf32>
    %221 = vector.broadcast %213 : vector<8x1xf32> to vector<8x32xf32>
    %222 = arith.subf %207, %221 : vector<8x32xf32>
    %cst_113 = arith.constant 9.99999974E-6 : f32
    %223 = vector.broadcast %cst_113 : f32 to vector<8x1xf32>
    %224 = arith.addf %220, %223 : vector<8x1xf32>
    %225 = math.rsqrt %224 : vector<8x1xf32>
    %226 = vector.broadcast %225 : vector<8x1xf32> to vector<8x32xf32>
    %227 = arith.mulf %222, %226 : vector<8x32xf32>
    %228 = vector.broadcast %208 : vector<1x32xf32> to vector<8x32xf32>
    %229 = arith.mulf %227, %228 : vector<8x32xf32>
    %230 = vector.broadcast %209 : vector<1x32xf32> to vector<8x32xf32>
    %231 = arith.addf %229, %230 : vector<8x32xf32>
    %cst_114 = arith.constant 0.000000e+00 : f32
    %232 = vector.broadcast %cst_114 : f32 to vector<8x32xf32>
    %233 = arith.maximumf %231, %232 : vector<8x32xf32>
    %c0_115 = arith.constant 0 : index
    %c0_116 = arith.constant 0 : index
    %234 = vector.load %arg30[%c0_115, %c0_116] : memref<32x32xf32, #tpu.memory_space<vmem>>, vector<32x32xf32>
    %cst_117 = arith.constant dense<0.000000e+00> : vector<8x32xf32>
    %235 = tpu.matmul %233, %234, %cst_117 {dimension_numbers = #tpu.dot_dimension_numbers<[1], [0], [0], [1], [0, 0, 1, 1], [], []>} : vector<8x32xf32>, vector<32x32xf32>, vector<8x32xf32> -> vector<8x32xf32>
    %c0_118 = arith.constant 0 : index
    %c0_119 = arith.constant 0 : index
    %236 = vector.load %arg31[%c0_118, %c0_119] : memref<1x32xf32, #tpu.memory_space<vmem>>, vector<1x32xf32>
    %237 = vector.broadcast %236 : vector<1x32xf32> to vector<8x32xf32>
    %238 = arith.addf %235, %237 : vector<8x32xf32>
    %239 = arith.addf %238, %0 : vector<8x32xf32>
    %c0_120 = arith.constant 0 : index
    %c0_121 = arith.constant 0 : index
    %240 = vector.load %arg32[%c0_120, %c0_121] : memref<8x32xf32, #tpu.memory_space<vmem>>, vector<8x32xf32>
    tpu.vector_store %arg32[%c0_120, %c0_121], %239 {strides = array<i32>} : memref<8x32xf32, #tpu.memory_space<vmem>>, vector<8x32xf32>,
    return
  }
}

module attributes {stable_mosaic.version = 11 : i64} {
  func.func @_graph_fusion_kernel(%arg0: memref<16x32xf32, #tpu.memory_space<vmem>>, %arg1: memref<16x32xf32, #tpu.memory_space<vmem>>, %arg2: memref<32x32xf32, #tpu.memory_space<vmem>>, %arg3: memref<32x32xf32, #tpu.memory_space<vmem>>, %arg4: memref<1x32xf32, #tpu.memory_space<vmem>>, %arg5: memref<16x32xf32, #tpu.memory_space<vmem>>) attributes {dimension_semantics = [], scalar_prefetch = 0 : i64, scratch_operands = 0 : i64, tpu.core_type = #tpu.core_type<tc>} {
    %c0 = arith.constant 0 : index
    %c0_0 = arith.constant 0 : index
    %0 = vector.load %arg0[%c0, %c0_0] : memref<16x32xf32, #tpu.memory_space<vmem>>, vector<16x32xf32>
    %c0_1 = arith.constant 0 : index
    %c0_2 = arith.constant 0 : index
    %1 = vector.load %arg2[%c0_1, %c0_2] : memref<32x32xf32, #tpu.memory_space<vmem>>, vector<32x32xf32>
    %cst = arith.constant dense<0.000000e+00> : vector<16x32xf32>
    %2 = tpu.matmul %0, %1, %cst {dimension_numbers = #tpu.dot_dimension_numbers<[1], [0], [0], [1], [0, 0, 1, 1], [], []>} : vector<16x32xf32>, vector<32x32xf32>, vector<16x32xf32> -> vector<16x32xf32>
    %c0_3 = arith.constant 0 : index
    %c0_4 = arith.constant 0 : index
    %3 = vector.load %arg1[%c0_3, %c0_4] : memref<16x32xf32, #tpu.memory_space<vmem>>, vector<16x32xf32>
    %c0_5 = arith.constant 0 : index
    %c0_6 = arith.constant 0 : index
    %4 = vector.load %arg3[%c0_5, %c0_6] : memref<32x32xf32, #tpu.memory_space<vmem>>, vector<32x32xf32>
    %cst_7 = arith.constant dense<0.000000e+00> : vector<16x32xf32>
    %5 = tpu.matmul %3, %4, %cst_7 {dimension_numbers = #tpu.dot_dimension_numbers<[1], [0], [0], [1], [0, 0, 1, 1], [], []>} : vector<16x32xf32>, vector<32x32xf32>, vector<16x32xf32> -> vector<16x32xf32>
    %6 = arith.addf %2, %5 : vector<16x32xf32>
    %c0_8 = arith.constant 0 : index
    %c0_9 = arith.constant 0 : index
    %7 = vector.load %arg4[%c0_8, %c0_9] : memref<1x32xf32, #tpu.memory_space<vmem>>, vector<1x32xf32>
    %8 = vector.broadcast %7 : vector<1x32xf32> to vector<16x32xf32>
    %9 = arith.addf %6, %8 : vector<16x32xf32>
    %c0_10 = arith.constant 0 : index
    %c0_11 = arith.constant 0 : index
    %10 = vector.load %arg5[%c0_10, %c0_11] : memref<16x32xf32, #tpu.memory_space<vmem>>, vector<16x32xf32>
    tpu.vector_store %arg5[%c0_10, %c0_11], %9 {strides = array<i32>} : memref<16x32xf32, #tpu.memory_space<vmem>>, vector<16x32xf32>,
    return
  }
}

module attributes {stable_mosaic.version = 11 : i64} {
  func.func @_h2x_fused_kernel(%arg0: memref<16x32xf32, #tpu.memory_space<vmem>>, %arg1: memref<48x20xf32, #tpu.memory_space<vmem>>, %arg2: memref<48x3xf32, #tpu.memory_space<vmem>>, %arg3: memref<1x48xi32, #tpu.memory_space<vmem>>, %arg4: memref<48x1xi32, #tpu.memory_space<vmem>>, %arg5: memref<48x1xi32, #tpu.memory_space<vmem>>, %arg6: memref<32x4xf32, #tpu.memory_space<vmem>>, %arg7: memref<20x64xf32, #tpu.memory_space<vmem>>, %arg8: memref<32x64xf32, #tpu.memory_space<vmem>>, %arg9: memref<32x64xf32, #tpu.memory_space<vmem>>, %arg10: memref<1x64xf32, #tpu.memory_space<vmem>>, %arg11: memref<1x64xf32, #tpu.memory_space<vmem>>, %arg12: memref<1x64xf32, #tpu.memory_space<vmem>>, %arg13: memref<32x32xf32, #tpu.memory_space<vmem>>, %arg14: memref<1x32xf32, #tpu.memory_space<vmem>>, %arg15: memref<32x4xf32, #tpu.memory_space<vmem>>, %arg16: memref<1x4xf32, #tpu.memory_space<vmem>>, %arg17: memref<32x32xf32, #tpu.memory_space<vmem>>, %arg18: memref<1x32xf32, #tpu.memory_space<vmem>>, %arg19: memref<1x32xf32, #tpu.memory_space<vmem>>, %arg20: memref<1x32xf32, #tpu.memory_space<vmem>>, %arg21: memref<32x32xf32, #tpu.memory_space<vmem>>, %arg22: memref<1x32xf32, #tpu.memory_space<vmem>>, %arg23: memref<20x1xf32, #tpu.memory_space<vmem>>, %arg24: memref<1x1xf32, #tpu.memory_space<vmem>>, %arg25: memref<16x3xf32, #tpu.memory_space<vmem>>) attributes {dimension_semantics = [], scalar_prefetch = 0 : i64, scratch_operands = 0 : i64, tpu.core_type = #tpu.core_type<tc>} {
    %c0 = arith.constant 0 : index
    %c0_0 = arith.constant 0 : index
    %0 = vector.load %arg0[%c0, %c0_0] : memref<16x32xf32, #tpu.memory_space<vmem>>, vector<16x32xf32>
    %c0_1 = arith.constant 0 : index
    %c0_2 = arith.constant 0 : index
    %1 = vector.load %arg1[%c0_1, %c0_2] : memref<48x20xf32, #tpu.memory_space<vmem>>, vector<48x20xf32>
    %c0_3 = arith.constant 0 : index
    %c0_4 = arith.constant 0 : index
    %2 = vector.load %arg3[%c0_3, %c0_4] : memref<1x48xi32, #tpu.memory_space<vmem>>, vector<1x48xi32>
    %c0_5 = arith.constant 0 : index
    %c0_6 = arith.constant 0 : index
    %3 = vector.load %arg4[%c0_5, %c0_6] : memref<48x1xi32, #tpu.memory_space<vmem>>, vector<48x1xi32>
    %c0_7 = arith.constant 0 : index
    %c0_8 = arith.constant 0 : index
    %4 = vector.load %arg5[%c0_7, %c0_8] : memref<48x1xi32, #tpu.memory_space<vmem>>, vector<48x1xi32>
    %5 = tpu.iota {dimensions = array<i32: 0>} : vector<16x48xi32>
    %6 = tpu.iota {dimensions = array<i32: 1>} : vector<48x16xi32>
    %7 = vector.broadcast %2 : vector<1x48xi32> to vector<16x48xi32>
    %8 = arith.cmpi eq, %5, %7 : vector<16x48xi32>
    %9 = arith.extui %8 : vector<16x48xi1> to vector<16x48xi32>
    %10 = arith.sitofp %9 : vector<16x48xi32> to vector<16x48xf32>
    %11 = vector.broadcast %3 : vector<48x1xi32> to vector<48x16xi32>
    %12 = arith.cmpi eq, %6, %11 : vector<48x16xi32>
    %13 = arith.extui %12 : vector<48x16xi1> to vector<48x16xi32>
    %14 = arith.sitofp %13 : vector<48x16xi32> to vector<48x16xf32>
    %15 = vector.broadcast %4 : vector<48x1xi32> to vector<48x16xi32>
    %16 = arith.cmpi eq, %6, %15 : vector<48x16xi32>
    %17 = arith.extui %16 : vector<48x16xi1> to vector<48x16xi32>
    %18 = arith.sitofp %17 : vector<48x16xi32> to vector<48x16xf32>
    %c0_9 = arith.constant 0 : index
    %c0_10 = arith.constant 0 : index
    %19 = vector.load %arg7[%c0_9, %c0_10] : memref<20x64xf32, #tpu.memory_space<vmem>>, vector<20x64xf32>
    %c0_11 = arith.constant 0 : index
    %c0_12 = arith.constant 0 : index
    %20 = vector.load %arg8[%c0_11, %c0_12] : memref<32x64xf32, #tpu.memory_space<vmem>>, vector<32x64xf32>
    %c0_13 = arith.constant 0 : index
    %c0_14 = arith.constant 0 : index
    %21 = vector.load %arg9[%c0_13, %c0_14] : memref<32x64xf32, #tpu.memory_space<vmem>>, vector<32x64xf32>
    %c0_15 = arith.constant 0 : index
    %c0_16 = arith.constant 0 : index
    %22 = vector.load %arg10[%c0_15, %c0_16] : memref<1x64xf32, #tpu.memory_space<vmem>>, vector<1x64xf32>
    %c0_17 = arith.constant 0 : index
    %c0_18 = arith.constant 0 : index
    %23 = vector.load %arg11[%c0_17, %c0_18] : memref<1x64xf32, #tpu.memory_space<vmem>>, vector<1x64xf32>
    %c0_19 = arith.constant 0 : index
    %c0_20 = arith.constant 0 : index
    %24 = vector.load %arg12[%c0_19, %c0_20] : memref<1x64xf32, #tpu.memory_space<vmem>>, vector<1x64xf32>
    %c0_21 = arith.constant 0 : index
    %c0_22 = arith.constant 0 : index
    %25 = vector.load %arg13[%c0_21, %c0_22] : memref<32x32xf32, #tpu.memory_space<vmem>>, vector<32x32xf32>
    %c0_23 = arith.constant 0 : index
    %c0_24 = arith.constant 0 : index
    %26 = vector.load %arg14[%c0_23, %c0_24] : memref<1x32xf32, #tpu.memory_space<vmem>>, vector<1x32xf32>
    %c0_25 = arith.constant 0 : index
    %c0_26 = arith.constant 0 : index
    %27 = vector.load %arg15[%c0_25, %c0_26] : memref<32x4xf32, #tpu.memory_space<vmem>>, vector<32x4xf32>
    %c0_27 = arith.constant 0 : index
    %c0_28 = arith.constant 0 : index
    %28 = vector.load %arg16[%c0_27, %c0_28] : memref<1x4xf32, #tpu.memory_space<vmem>>, vector<1x4xf32>
    %c0_29 = arith.constant 0 : index
    %c0_30 = arith.constant 0 : index
    %29 = vector.load %arg17[%c0_29, %c0_30] : memref<32x32xf32, #tpu.memory_space<vmem>>, vector<32x32xf32>
    %c0_31 = arith.constant 0 : index
    %c0_32 = arith.constant 0 : index
    %30 = vector.load %arg18[%c0_31, %c0_32] : memref<1x32xf32, #tpu.memory_space<vmem>>, vector<1x32xf32>
    %c0_33 = arith.constant 0 : index
    %c0_34 = arith.constant 0 : index
    %31 = vector.load %arg19[%c0_33, %c0_34] : memref<1x32xf32, #tpu.memory_space<vmem>>, vector<1x32xf32>
    %c0_35 = arith.constant 0 : index
    %c0_36 = arith.constant 0 : index
    %32 = vector.load %arg20[%c0_35, %c0_36] : memref<1x32xf32, #tpu.memory_space<vmem>>, vector<1x32xf32>
    %c0_37 = arith.constant 0 : index
    %c0_38 = arith.constant 0 : index
    %33 = vector.load %arg21[%c0_37, %c0_38] : memref<32x32xf32, #tpu.memory_space<vmem>>, vector<32x32xf32>
    %c0_39 = arith.constant 0 : index
    %c0_40 = arith.constant 0 : index
    %34 = vector.load %arg22[%c0_39, %c0_40] : memref<1x32xf32, #tpu.memory_space<vmem>>, vector<1x32xf32>
    %c0_41 = arith.constant 0 : index
    %c0_42 = arith.constant 0 : index
    %35 = vector.load %arg23[%c0_41, %c0_42] : memref<20x1xf32, #tpu.memory_space<vmem>>, vector<20x1xf32>
    %c0_43 = arith.constant 0 : index
    %c0_44 = arith.constant 0 : index
    %36 = vector.load %arg24[%c0_43, %c0_44] : memref<1x1xf32, #tpu.memory_space<vmem>>, vector<1x1xf32>
    %c0_45 = arith.constant 0 : index
    %c0_46 = arith.constant 0 : index
    %37 = vector.load %arg6[%c0_45, %c0_46] : memref<32x4xf32, #tpu.memory_space<vmem>>, vector<32x4xf32>
    %cst = arith.constant dense<0.000000e+00> : vector<48x32xf32>
    %38 = tpu.matmul %14, %0, %cst {dimension_numbers = #tpu.dot_dimension_numbers<[1], [0], [0], [1], [0, 0, 1, 1], [], []>} : vector<48x16xf32>, vector<16x32xf32>, vector<48x32xf32> -> vector<48x32xf32>
    %cst_47 = arith.constant dense<0.000000e+00> : vector<48x32xf32>
    %39 = tpu.matmul %18, %0, %cst_47 {dimension_numbers = #tpu.dot_dimension_numbers<[1], [0], [0], [1], [0, 0, 1, 1], [], []>} : vector<48x16xf32>, vector<16x32xf32>, vector<48x32xf32> -> vector<48x32xf32>
    %cst_48 = arith.constant dense<0.000000e+00> : vector<48x64xf32>
    %40 = tpu.matmul %1, %19, %cst_48 {dimension_numbers = #tpu.dot_dimension_numbers<[1], [0], [0], [1], [0, 0, 1, 1], [], []>} : vector<48x20xf32>, vector<20x64xf32>, vector<48x64xf32> -> vector<48x64xf32>
    %cst_49 = arith.constant dense<0.000000e+00> : vector<48x64xf32>
    %41 = tpu.matmul %38, %20, %cst_49 {dimension_numbers = #tpu.dot_dimension_numbers<[1], [0], [0], [1], [0, 0, 1, 1], [], []>} : vector<48x32xf32>, vector<32x64xf32>, vector<48x64xf32> -> vector<48x64xf32>
    %42 = arith.addf %40, %41 : vector<48x64xf32>
    %cst_50 = arith.constant dense<0.000000e+00> : vector<48x64xf32>
    %43 = tpu.matmul %39, %21, %cst_50 {dimension_numbers = #tpu.dot_dimension_numbers<[1], [0], [0], [1], [0, 0, 1, 1], [], []>} : vector<48x32xf32>, vector<32x64xf32>, vector<48x64xf32> -> vector<48x64xf32>
    %44 = arith.addf %42, %43 : vector<48x64xf32>
    %45 = vector.broadcast %22 : vector<1x64xf32> to vector<48x64xf32>
    %46 = arith.addf %44, %45 : vector<48x64xf32>
    %47 = vector.extract_strided_slice %46 {offsets = [0, 0], sizes = [48, 32], strides = [1, 1]} : vector<48x64xf32> to vector<48x32xf32>
    %48 = vector.extract_strided_slice %23 {offsets = [0, 0], sizes = [1, 32], strides = [1, 1]} : vector<1x64xf32> to vector<1x32xf32>
    %49 = vector.extract_strided_slice %24 {offsets = [0, 0], sizes = [1, 32], strides = [1, 1]} : vector<1x64xf32> to vector<1x32xf32>
    %cst_51 = arith.constant dense<0.000000e+00> : vector<48xf32>
    %50 = vector.multi_reduction <add>, %47, %cst_51 [1] : vector<48x32xf32> to vector<48xf32>
    %51 = vector.shape_cast %50 : vector<48xf32> to vector<48x1xf32>
    %cst_52 = arith.constant 3.200000e+01 : f32
    %52 = vector.broadcast %cst_52 : f32 to vector<48x1xf32>
    %53 = arith.divf %51, %52 : vector<48x1xf32>
    %54 = vector.broadcast %53 : vector<48x1xf32> to vector<48x32xf32>
    %55 = arith.subf %47, %54 : vector<48x32xf32>
    %56 = arith.mulf %55, %55 : vector<48x32xf32>
    %cst_53 = arith.constant dense<0.000000e+00> : vector<48xf32>
    %57 = vector.multi_reduction <add>, %56, %cst_53 [1] : vector<48x32xf32> to vector<48xf32>
    %58 = vector.shape_cast %57 : vector<48xf32> to vector<48x1xf32>
    %cst_54 = arith.constant 3.200000e+01 : f32
    %59 = vector.broadcast %cst_54 : f32 to vector<48x1xf32>
    %60 = arith.divf %58, %59 : vector<48x1xf32>
    %61 = vector.broadcast %53 : vector<48x1xf32> to vector<48x32xf32>
    %62 = arith.subf %47, %61 : vector<48x32xf32>
    %cst_55 = arith.constant 9.99999974E-6 : f32
    %63 = vector.broadcast %cst_55 : f32 to vector<48x1xf32>
    %64 = arith.addf %60, %63 : vector<48x1xf32>
    %65 = math.rsqrt %64 : vector<48x1xf32>
    %66 = vector.broadcast %65 : vector<48x1xf32> to vector<48x32xf32>
    %67 = arith.mulf %62, %66 : vector<48x32xf32>
    %68 = vector.broadcast %48 : vector<1x32xf32> to vector<48x32xf32>
    %69 = arith.mulf %67, %68 : vector<48x32xf32>
    %70 = vector.broadcast %49 : vector<1x32xf32> to vector<48x32xf32>
    %71 = arith.addf %69, %70 : vector<48x32xf32>
    %cst_56 = arith.constant 0.000000e+00 : f32
    %72 = vector.broadcast %cst_56 : f32 to vector<48x32xf32>
    %73 = arith.maximumf %71, %72 : vector<48x32xf32>
    %74 = vector.extract_strided_slice %46 {offsets = [0, 32], sizes = [48, 32], strides = [1, 1]} : vector<48x64xf32> to vector<48x32xf32>
    %75 = vector.extract_strided_slice %23 {offsets = [0, 32], sizes = [1, 32], strides = [1, 1]} : vector<1x64xf32> to vector<1x32xf32>
    %76 = vector.extract_strided_slice %24 {offsets = [0, 32], sizes = [1, 32], strides = [1, 1]} : vector<1x64xf32> to vector<1x32xf32>
    %cst_57 = arith.constant dense<0.000000e+00> : vector<48xf32>
    %77 = vector.multi_reduction <add>, %74, %cst_57 [1] : vector<48x32xf32> to vector<48xf32>
    %78 = vector.shape_cast %77 : vector<48xf32> to vector<48x1xf32>
    %cst_58 = arith.constant 3.200000e+01 : f32
    %79 = vector.broadcast %cst_58 : f32 to vector<48x1xf32>
    %80 = arith.divf %78, %79 : vector<48x1xf32>
    %81 = vector.broadcast %80 : vector<48x1xf32> to vector<48x32xf32>
    %82 = arith.subf %74, %81 : vector<48x32xf32>
    %83 = arith.mulf %82, %82 : vector<48x32xf32>
    %cst_59 = arith.constant dense<0.000000e+00> : vector<48xf32>
    %84 = vector.multi_reduction <add>, %83, %cst_59 [1] : vector<48x32xf32> to vector<48xf32>
    %85 = vector.shape_cast %84 : vector<48xf32> to vector<48x1xf32>
    %cst_60 = arith.constant 3.200000e+01 : f32
    %86 = vector.broadcast %cst_60 : f32 to vector<48x1xf32>
    %87 = arith.divf %85, %86 : vector<48x1xf32>
    %88 = vector.broadcast %80 : vector<48x1xf32> to vector<48x32xf32>
    %89 = arith.subf %74, %88 : vector<48x32xf32>
    %cst_61 = arith.constant 9.99999974E-6 : f32
    %90 = vector.broadcast %cst_61 : f32 to vector<48x1xf32>
    %91 = arith.addf %87, %90 : vector<48x1xf32>
    %92 = math.rsqrt %91 : vector<48x1xf32>
    %93 = vector.broadcast %92 : vector<48x1xf32> to vector<48x32xf32>
    %94 = arith.mulf %89, %93 : vector<48x32xf32>
    %95 = vector.broadcast %75 : vector<1x32xf32> to vector<48x32xf32>
    %96 = arith.mulf %94, %95 : vector<48x32xf32>
    %97 = vector.broadcast %76 : vector<1x32xf32> to vector<48x32xf32>
    %98 = arith.addf %96, %97 : vector<48x32xf32>
    %cst_62 = arith.constant 0.000000e+00 : f32
    %99 = vector.broadcast %cst_62 : f32 to vector<48x32xf32>
    %100 = arith.maximumf %98, %99 : vector<48x32xf32>
    %cst_63 = arith.constant dense<0.000000e+00> : vector<48x32xf32>
    %101 = tpu.matmul %73, %25, %cst_63 {dimension_numbers = #tpu.dot_dimension_numbers<[1], [0], [0], [1], [0, 0, 1, 1], [], []>} : vector<48x32xf32>, vector<32x32xf32>, vector<48x32xf32> -> vector<48x32xf32>
    %102 = vector.broadcast %26 : vector<1x32xf32> to vector<48x32xf32>
    %103 = arith.addf %101, %102 : vector<48x32xf32>
    %cst_64 = arith.constant dense<0.000000e+00> : vector<48x4xf32>
    %104 = tpu.matmul %100, %27, %cst_64 {dimension_numbers = #tpu.dot_dimension_numbers<[1], [0], [0], [1], [0, 0, 1, 1], [], []>} : vector<48x32xf32>, vector<32x4xf32>, vector<48x4xf32> -> vector<48x4xf32>
    %105 = vector.broadcast %28 : vector<1x4xf32> to vector<48x4xf32>
    %106 = arith.addf %104, %105 : vector<48x4xf32>
    %cst_65 = arith.constant dense<0.000000e+00> : vector<48x1xf32>
    %107 = tpu.matmul %1, %35, %cst_65 {dimension_numbers = #tpu.dot_dimension_numbers<[1], [0], [0], [1], [0, 0, 1, 1], [], []>} : vector<48x20xf32>, vector<20x1xf32>, vector<48x1xf32> -> vector<48x1xf32>
    %108 = vector.broadcast %36 : vector<1x1xf32> to vector<48x1xf32>
    %109 = arith.addf %107, %108 : vector<48x1xf32>
    %110 = arith.negf %109 : vector<48x1xf32>
    %111 = math.exp %110 : vector<48x1xf32>
    %cst_66 = arith.constant 1.000000e+00 : f32
    %112 = vector.broadcast %cst_66 : f32 to vector<48x1xf32>
    %113 = arith.addf %112, %111 : vector<48x1xf32>
    %114 = arith.divf %112, %113 : vector<48x1xf32>
    %115 = vector.broadcast %114 : vector<48x1xf32> to vector<48x4xf32>
    %116 = arith.mulf %106, %115 : vector<48x4xf32>
    %cst_67 = arith.constant dense<0.000000e+00> : vector<16x32xf32>
    %117 = tpu.matmul %0, %29, %cst_67 {dimension_numbers = #tpu.dot_dimension_numbers<[1], [0], [0], [1], [0, 0, 1, 1], [], []>} : vector<16x32xf32>, vector<32x32xf32>, vector<16x32xf32> -> vector<16x32xf32>
    %118 = vector.broadcast %30 : vector<1x32xf32> to vector<16x32xf32>
    %119 = arith.addf %117, %118 : vector<16x32xf32>
    %cst_68 = arith.constant dense<0.000000e+00> : vector<16xf32>
    %120 = vector.multi_reduction <add>, %119, %cst_68 [1] : vector<16x32xf32> to vector<16xf32>
    %121 = vector.shape_cast %120 : vector<16xf32> to vector<16x1xf32>
    %cst_69 = arith.constant 3.200000e+01 : f32
    %122 = vector.broadcast %cst_69 : f32 to vector<16x1xf32>
    %123 = arith.divf %121, %122 : vector<16x1xf32>
    %124 = vector.broadcast %123 : vector<16x1xf32> to vector<16x32xf32>
    %125 = arith.subf %119, %124 : vector<16x32xf32>
    %126 = arith.mulf %125, %125 : vector<16x32xf32>
    %cst_70 = arith.constant dense<0.000000e+00> : vector<16xf32>
    %127 = vector.multi_reduction <add>, %126, %cst_70 [1] : vector<16x32xf32> to vector<16xf32>
    %128 = vector.shape_cast %127 : vector<16xf32> to vector<16x1xf32>
    %cst_71 = arith.constant 3.200000e+01 : f32
    %129 = vector.broadcast %cst_71 : f32 to vector<16x1xf32>
    %130 = arith.divf %128, %129 : vector<16x1xf32>
    %131 = vector.broadcast %123 : vector<16x1xf32> to vector<16x32xf32>
    %132 = arith.subf %119, %131 : vector<16x32xf32>
    %cst_72 = arith.constant 9.99999974E-6 : f32
    %133 = vector.broadcast %cst_72 : f32 to vector<16x1xf32>
    %134 = arith.addf %130, %133 : vector<16x1xf32>
    %135 = math.rsqrt %134 : vector<16x1xf32>
    %136 = vector.broadcast %135 : vector<16x1xf32> to vector<16x32xf32>
    %137 = arith.mulf %132, %136 : vector<16x32xf32>
    %138 = vector.broadcast %31 : vector<1x32xf32> to vector<16x32xf32>
    %139 = arith.mulf %137, %138 : vector<16x32xf32>
    %140 = vector.broadcast %32 : vector<1x32xf32> to vector<16x32xf32>
    %141 = arith.addf %139, %140 : vector<16x32xf32>
    %cst_73 = arith.constant 0.000000e+00 : f32
    %142 = vector.broadcast %cst_73 : f32 to vector<16x32xf32>
    %143 = arith.maximumf %141, %142 : vector<16x32xf32>
    %cst_74 = arith.constant dense<0.000000e+00> : vector<16x32xf32>
    %144 = tpu.matmul %143, %33, %cst_74 {dimension_numbers = #tpu.dot_dimension_numbers<[1], [0], [0], [1], [0, 0, 1, 1], [], []>} : vector<16x32xf32>, vector<32x32xf32>, vector<16x32xf32> -> vector<16x32xf32>
    %145 = vector.broadcast %34 : vector<1x32xf32> to vector<16x32xf32>
    %146 = arith.addf %144, %145 : vector<16x32xf32>
    %cst_75 = arith.constant dense<0.000000e+00> : vector<48x32xf32>
    %147 = tpu.matmul %14, %146, %cst_75 {dimension_numbers = #tpu.dot_dimension_numbers<[1], [0], [0], [1], [0, 0, 1, 1], [], []>} : vector<48x16xf32>, vector<16x32xf32>, vector<48x32xf32> -> vector<48x32xf32>
    %148 = arith.mulf %147, %103 : vector<48x32xf32>
    %cst_76 = arith.constant dense<0.000000e+00> : vector<48x4xf32>
    %149 = tpu.matmul %148, %37, %cst_76 {dimension_numbers = #tpu.dot_dimension_numbers<[1], [0], [0], [1], [0, 0, 1, 1], [], []>} : vector<48x32xf32>, vector<32x4xf32>, vector<48x4xf32> -> vector<48x4xf32>
    %cst_77 = arith.constant 0.353553385 : f32
    %150 = vector.broadcast %cst_77 : f32 to vector<48x4xf32>
    %151 = arith.mulf %149, %150 : vector<48x4xf32>
    %152 = tpu.transpose %151, [1, 0] : vector<48x4xf32> -> vector<4x48xf32>
    %cst_78 = arith.constant 5.000000e-01 : f32
    %153 = vector.broadcast %cst_78 : f32 to vector<16x48xf32>
    %154 = arith.cmpf ogt, %10, %153 : vector<16x48xf32>
    %155 = vector.extract_strided_slice %152 {offsets = [0, 0], sizes = [1, 48], strides = [1, 1]} : vector<4x48xf32> to vector<1x48xf32>
    %cst_79 = arith.constant -1.000000e+30 : f32
    %156 = vector.shape_cast %155 : vector<1x48xf32> to vector<1x48xf32>
    %157 = vector.broadcast %156 : vector<1x48xf32> to vector<16x48xf32>
    %158 = vector.broadcast %cst_79 : f32 to vector<16x48xf32>
    %159 = arith.select %154, %157, %158 : vector<16x48xi1>, vector<16x48xf32>
    %cst_80 = arith.constant dense<0xFF800000> : vector<16xf32>
    %160 = vector.multi_reduction <maximumf>, %159, %cst_80 [1] : vector<16x48xf32> to vector<16xf32>
    %161 = vector.shape_cast %160 : vector<16xf32> to vector<16x1xf32>
    %cst_81 = arith.constant 5.000000e-01 : f32
    %162 = vector.broadcast %cst_81 : f32 to vector<16x48xf32>
    %163 = arith.cmpf ogt, %10, %162 : vector<16x48xf32>
    %164 = vector.extract_strided_slice %152 {offsets = [1, 0], sizes = [1, 48], strides = [1, 1]} : vector<4x48xf32> to vector<1x48xf32>
    %cst_82 = arith.constant -1.000000e+30 : f32
    %165 = vector.shape_cast %164 : vector<1x48xf32> to vector<1x48xf32>
    %166 = vector.broadcast %165 : vector<1x48xf32> to vector<16x48xf32>
    %167 = vector.broadcast %cst_82 : f32 to vector<16x48xf32>
    %168 = arith.select %163, %166, %167 : vector<16x48xi1>, vector<16x48xf32>
    %cst_83 = arith.constant dense<0xFF800000> : vector<16xf32>
    %169 = vector.multi_reduction <maximumf>, %168, %cst_83 [1] : vector<16x48xf32> to vector<16xf32>
    %170 = vector.shape_cast %169 : vector<16xf32> to vector<16x1xf32>
    %cst_84 = arith.constant 5.000000e-01 : f32
    %171 = vector.broadcast %cst_84 : f32 to vector<16x48xf32>
    %172 = arith.cmpf ogt, %10, %171 : vector<16x48xf32>
    %173 = vector.extract_strided_slice %152 {offsets = [2, 0], sizes = [1, 48], strides = [1, 1]} : vector<4x48xf32> to vector<1x48xf32>
    %cst_85 = arith.constant -1.000000e+30 : f32
    %174 = vector.shape_cast %173 : vector<1x48xf32> to vector<1x48xf32>
    %175 = vector.broadcast %174 : vector<1x48xf32> to vector<16x48xf32>
    %176 = vector.broadcast %cst_85 : f32 to vector<16x48xf32>
    %177 = arith.select %172, %175, %176 : vector<16x48xi1>, vector<16x48xf32>
    %cst_86 = arith.constant dense<0xFF800000> : vector<16xf32>
    %178 = vector.multi_reduction <maximumf>, %177, %cst_86 [1] : vector<16x48xf32> to vector<16xf32>
    %179 = vector.shape_cast %178 : vector<16xf32> to vector<16x1xf32>
    %cst_87 = arith.constant 5.000000e-01 : f32
    %180 = vector.broadcast %cst_87 : f32 to vector<16x48xf32>
    %181 = arith.cmpf ogt, %10, %180 : vector<16x48xf32>
    %182 = vector.extract_strided_slice %152 {offsets = [3, 0], sizes = [1, 48], strides = [1, 1]} : vector<4x48xf32> to vector<1x48xf32>
    %cst_88 = arith.constant -1.000000e+30 : f32
    %183 = vector.shape_cast %182 : vector<1x48xf32> to vector<1x48xf32>
    %184 = vector.broadcast %183 : vector<1x48xf32> to vector<16x48xf32>
    %185 = vector.broadcast %cst_88 : f32 to vector<16x48xf32>
    %186 = arith.select %181, %184, %185 : vector<16x48xi1>, vector<16x48xf32>
    %cst_89 = arith.constant dense<0xFF800000> : vector<16xf32>
    %187 = vector.multi_reduction <maximumf>, %186, %cst_89 [1] : vector<16x48xf32> to vector<16xf32>
    %188 = vector.shape_cast %187 : vector<16xf32> to vector<16x1xf32>
    %189 = tpu.concatenate %161, %170, %179, %188 in 1 : vector<16x1xf32>, vector<16x1xf32>, vector<16x1xf32>, vector<16x1xf32> -> vector<16x4xf32>
    %cst_90 = arith.constant dense<0.000000e+00> : vector<48x4xf32>
    %190 = tpu.matmul %14, %189, %cst_90 {dimension_numbers = #tpu.dot_dimension_numbers<[1], [0], [0], [1], [0, 0, 1, 1], [], []>} : vector<48x16xf32>, vector<16x4xf32>, vector<48x4xf32> -> vector<48x4xf32>
    %191 = arith.subf %151, %190 : vector<48x4xf32>
    %192 = math.exp %191 : vector<48x4xf32>
    %cst_91 = arith.constant dense<0.000000e+00> : vector<16x4xf32>
    %193 = tpu.matmul %10, %192, %cst_91 {dimension_numbers = #tpu.dot_dimension_numbers<[1], [0], [0], [1], [0, 0, 1, 1], [], []>} : vector<16x48xf32>, vector<48x4xf32>, vector<16x4xf32> -> vector<16x4xf32>
    %cst_92 = arith.constant dense<0.000000e+00> : vector<48x4xf32>
    %194 = tpu.matmul %14, %193, %cst_92 {dimension_numbers = #tpu.dot_dimension_numbers<[1], [0], [0], [1], [0, 0, 1, 1], [], []>} : vector<48x16xf32>, vector<16x4xf32>, vector<48x4xf32> -> vector<48x4xf32>
    %195 = arith.divf %192, %194 : vector<48x4xf32>
    %196 = arith.mulf %195, %116 : vector<48x4xf32>
    %cst_93 = arith.constant dense<0.000000e+00> : vector<48xf32>
    %197 = vector.multi_reduction <add>, %196, %cst_93 [1] : vector<48x4xf32> to vector<48xf32>
    %198 = vector.shape_cast %197 : vector<48xf32> to vector<48x1xf32>
    %c0_94 = arith.constant 0 : index
    %c0_95 = arith.constant 0 : index
    %199 = vector.load %arg2[%c0_94, %c0_95] : memref<48x3xf32, #tpu.memory_space<vmem>>, vector<48x3xf32>
    %200 = vector.broadcast %198 : vector<48x1xf32> to vector<48x3xf32>
    %201 = arith.mulf %200, %199 : vector<48x3xf32>
    %cst_96 = arith.constant dense<0.000000e+00> : vector<16x3xf32>
    %202 = tpu.matmul %10, %201, %cst_96 {dimension_numbers = #tpu.dot_dimension_numbers<[1], [0], [0], [1], [0, 0, 1, 1], [], []>} : vector<16x48xf32>, vector<48x3xf32>, vector<16x3xf32> -> vector<16x3xf32>
    %cst_97 = arith.constant 2.500000e-01 : f32
    %203 = vector.broadcast %cst_97 : f32 to vector<16x3xf32>
    %204 = arith.mulf %202, %203 : vector<16x3xf32>
    %c0_98 = arith.constant 0 : index
    %c0_99 = arith.constant 0 : index
    %205 = vector.load %arg25[%c0_98, %c0_99] : memref<16x3xf32, #tpu.memory_space<vmem>>, vector<16x3xf32>
    tpu.vector_store %arg25[%c0_98, %c0_99], %204 {strides = array<i32>} : memref<16x3xf32, #tpu.memory_space<vmem>>, vector<16x3xf32>,
    return
  }
}

</mosaic_0001>

<bundles_post_ra>
// kernel: forward.5
= control target key start
LH: loop header
LB: loop body
LE: loop exit
PB: predicated region body
PF: predicated region fallthrough
CT: control target
= control target key end

     0   :  { %v348_v0 = vmov 0.0   ;;  %vm36_vm0 = vcmask 261120   ;;  %vm349_vm1 = vmmov 0   ;;  %s445_s3 = inlined_call_operand.vmem [shape: f32[32,32], index: 3, kind: input, shape index: {}]   ;;  %s446_s2 = inlined_call_operand.vmem [shape: f32[32,32], index: 2, kind: input, shape index: {}]   ;;  %s447_s1 = inlined_call_operand.vmem [shape: f32[8,32], index: 1, kind: input, shape index: {}]   ;;  %s448_s0 = inlined_call_operand.vmem [shape: f32[8,32], index: 0, kind: input, shape index: {}]   ;;  %s449_s5 = inlined_call_operand.vmem [shape: f32[32,32], index: 5, kind: input, shape index: {}]   ;;  %s450_s4 = inlined_call_operand.vmem [shape: f32[1,32], index: 4, kind: input, shape index: {}]   ;;  %s451_s6 = inlined_call_operand.vmem [shape: f32[1,32], index: 6, kind: input, shape index: {}]   ;;  %s452_s7 = inlined_call_operand.vmem [shape: f32[8,32], index: 7, kind: output, shape index: {}]  }
   0x1   :  { %309 = vmatprep.subr.mxu0 %v348_v0  ;;  %320 = vmatprep.subr.mxu1 %v348_v0  ;;  %v35_v1 = vld [vmem:[%s445_s3 + $0x18] sm:$0xff]  ;;  %v34_v3 = vld [vmem:[%s445_s3 + $0x10] sm:$0xff]  ;;  %v33_v5 = vld [vmem:[%s445_s3 + $0x8] sm:$0xff] }
   0x2   :  { %v30_v2 = vld [vmem:[%s446_s2 + $0x18] sm:$0xff]  ;;  %310 = vmatpush3.msra.mxu0 %v35_v1  ;;  %v29_v4 = vld [vmem:[%s446_s2 + $0x10] sm:$0xff]  ;;  %v28_v6 = vld [vmem:[%s446_s2 + $0x8] sm:$0xff]  ;;  %317 = vmatprep.mubr.msk.f32.mxu0 %vm349_vm1, %v348_v0 }
   0x3   :  { %321 = vmatpush3.msra.mxu1 %v30_v2  ;;  %311 = vmatprep.subr.mxu0 %v348_v0  ;;  %v32_v7 = vld [vmem:[%s445_s3] sm:$0xff]  ;;  %v201_v11 = vld [vmem:[%s449_s5 + $0x18] sm:$0xff]  ;;  %v200_v12 = vld [vmem:[%s449_s5 + $0x10] sm:$0xff] }
   0x4   :  { %322 = vmatprep.subr.mxu1 %v348_v0  ;;  %312 = vmatpush3.msra.mxu0 %v34_v3  ;;  %v27_v8 = vld [vmem:[%s446_s2] sm:$0xff]  ;;  %v199_v13 = vld [vmem:[%s449_s5 + $0x8] sm:$0xff] }
   0x5   :  { %323 = vmatpush3.msra.mxu1 %v29_v4  ;;  %313 = vmatprep.subr.mxu0 %v348_v0  ;;  %v31_v9 = vld [vmem:[%s447_s1] sm:$0xff] }
   0x6   :  { %324 = vmatprep.subr.mxu1 %v348_v0  ;;  %314 = vmatpush3.msra.mxu0 %v33_v5  ;;  %v26_v10 = vld [vmem:[%s448_s0] sm:$0xff] }
   0x7   :  { %325 = vmatpush3.msra.mxu1 %v28_v6  ;;  %315 = vmatprep.subr.mxu0 %v348_v0  ;;  %v198_v14 = vld [vmem:[%s449_s5] sm:$0xff] }
   0x8   :  { %326 = vmatprep.subr.mxu1 %v348_v0  ;;  %316 = vmatpush3.msra.mxu0 %v32_v7  ;;  %v290_v17 = vld [vmem:[%s450_s4] ss:$0 sm:$0xff] }
   0x9   :  { %327 = vmatpush3.msra.mxu1 %v27_v8  ;;  %328 = vmatprep.mubr.msk.f32.mxu1 %vm349_vm1, %v348_v0  ;;  %v292_v27 = vld [vmem:[%s451_s6] ss:$0 sm:$0xff] }
   0xa   :  { %318 = vmatmul.mubr.msk.f32.vlgmr.msra.gmra.mxu0 %vm36_vm0, %v31_v9  ;;  %329 = vmatmul.mubr.msk.f32.vlgmr.msra.gmra.mxu1 %vm36_vm0, %v26_v10 }
   0xb   :  { %331 = vmatprep.subr.mxu0 %v348_v0  ;;  %339 = vmatprep.mubr.msk.f32.mxu0 %vm349_vm1, %v348_v0 }
   0xc   :  { %332 = vmatpush3.msra.mxu0 %v201_v11 }
   0xd   :  { %333 = vmatprep.subr.mxu0 %v348_v0 }
   0xe   :  { %334 = vmatpush3.msra.mxu0 %v200_v12 }
   0xf   :  { %335 = vmatprep.subr.mxu0 %v348_v0 }
  0x10   :  { %336 = vmatpush3.msra.mxu0 %v199_v13 }
  0x11   :  { %337 = vmatprep.subr.mxu0 %v348_v0 }
  0x12   :  { %338 = vmatpush3.msra.mxu0 %v198_v14 }
  0xca   :  { %v106_v15 = vpop.f32.mrf.mxu0  ;;  %v179_v16 = vpop.f32.mrf.mxu1 }
  0xcb   :  { %v180_v18 = vadd.f32 %v179_v16, %v106_v15 }
  0xcc   :  { %v319_v19 = vpop.f32.mrf.mxu0  ;;  %v330_v20 = vpop.f32.mrf.mxu1 }
  0xcd   :  { %v190_v21 = vadd.f32 %v290_v17, %v180_v18 }
  0xcf   :  { %v291_v22 = vmul.f32 -1.442695, %v190_v21 }
  0xd1   :  { %344 = vpow2.f32 %v291_v22 }
  0xde   :  { %v345_v23 = vpop.eup %344 }
  0xdf   :  { %v194_v24 = vadd.f32 1.0, %v345_v23 }
  0xe1   :  { %346 = vrcp.f32 %v194_v24 }
  0xee   :  { %v347_v25 = vpop.eup %346 }
  0xef   :  { %v197_v26 = vmul.f32 %v347_v25, %v190_v21 }
  0xf1   :  { %340 = vmatmul.mubr.msk.f32.vlgmr.msra.gmra.mxu0 %vm36_vm0, %v197_v26 }
 0x1b1   :  { %v278_v28 = vpop.f32.mrf.mxu0 }
 0x1b2   :  { %v279_v29 = vadd.f32 %v292_v27, %v278_v28 }
 0x1b3   :  { %v341_v30 = vpop.f32.mrf.mxu0 }
 0x1b4   :  { %v282_v31 = vadd.f32 %v279_v29, %v26_v10 }
 0x1b6   :  { %283 = vst.msk [vmem:[%s452_s7] sm:$0xff] %vm36_vm0, %v282_v31 }

// kernel: forward.8
= control target key start
LH: loop header
LB: loop body
LE: loop exit
PB: predicated region body
PF: predicated region fallthrough
CT: control target
= control target key end

     0   :  { %vm32_vm0 = vcmask 261120   ;;  %s330_s3 = inlined_call_operand.vmem [shape: f32[32,32], index: 3, kind: input, shape index: {}]   ;;  %s331_s2 = inlined_call_operand.vmem [shape: f32[32,32], index: 2, kind: input, shape index: {}]   ;;  %s332_s1 = inlined_call_operand.vmem [shape: f32[16,32], index: 1, kind: input, shape index: {}]   ;;  %s333_s0 = inlined_call_operand.vmem [shape: f32[16,32], index: 0, kind: input, shape index: {}]   ;;  %s334_s4 = inlined_call_operand.vmem [shape: f32[1,32], index: 4, kind: input, shape index: {}]   ;;  %s335_s5 = inlined_call_operand.vmem [shape: f32[16,32], index: 5, kind: output, shape index: {}]  }
   0x1   :  { %v31_v0 = vld [vmem:[%s330_s3 + $0x18] sm:$0xff]  ;;  %v30_v2 = vld [vmem:[%s330_s3 + $0x10] sm:$0xff]  ;;  %v29_v4 = vld [vmem:[%s330_s3 + $0x8] sm:$0xff] }
   0x2   :  { %v25_v1 = vld [vmem:[%s331_s2 + $0x18] sm:$0xff]  ;;  %227 = vmatprep.subr.mxu0 %v31_v0  ;;  %v24_v3 = vld [vmem:[%s331_s2 + $0x10] sm:$0xff]  ;;  %v23_v5 = vld [vmem:[%s331_s2 + $0x8] sm:$0xff] }
   0x3   :  { %238 = vmatprep.subr.mxu1 %v25_v1  ;;  %228 = vmatpush3.msra.mxu0 %v31_v0  ;;  %v28_v6 = vld [vmem:[%s330_s3] sm:$0xff]  ;;  %v27_v10 = vld [vmem:[%s332_s1 + $0x8] sm:$0xff] }
   0x4   :  { %239 = vmatpush3.msra.mxu1 %v25_v1  ;;  %229 = vmatprep.subr.mxu0 %v30_v2  ;;  %v22_v7 = vld [vmem:[%s331_s2] sm:$0xff]  ;;  %v21_v11 = vld [vmem:[%s333_s0 + $0x8] sm:$0xff] }
   0x5   :  { %240 = vmatprep.subr.mxu1 %v24_v3  ;;  %230 = vmatpush3.msra.mxu0 %v30_v2  ;;  %v26_v8 = vld [vmem:[%s332_s1] sm:$0xff] }
   0x6   :  { %241 = vmatpush3.msra.mxu1 %v24_v3  ;;  %231 = vmatprep.subr.mxu0 %v29_v4  ;;  %v20_v9 = vld [vmem:[%s333_s0] sm:$0xff] }
   0x7   :  { %242 = vmatprep.subr.mxu1 %v23_v5  ;;  %232 = vmatpush3.msra.mxu0 %v29_v4  ;;  %v214_v14 = vld [vmem:[%s334_s4] ss:$0 sm:$0xff] }
   0x8   :  { %243 = vmatpush3.msra.mxu1 %v23_v5  ;;  %233 = vmatprep.subr.mxu0 %v28_v6 }
   0x9   :  { %244 = vmatprep.subr.mxu1 %v22_v7  ;;  %234 = vmatpush3.msra.mxu0 %v28_v6 }
   0xa   :  { %235 = vmatprep.mubr.msk.f32.mxu0 %vm32_vm0, %v26_v8  ;;  %245 = vmatpush3.msra.mxu1 %v22_v7 }
   0xb   :  { %246 = vmatprep.mubr.msk.f32.mxu1 %vm32_vm0, %v20_v9  ;;  %236 = vmatmul.mubr.msk.f32.vlgmr.msra.gmra.mxu0 %vm32_vm0, %v27_v10 }
   0xc   :  { %247 = vmatmul.mubr.msk.f32.vlgmr.msra.gmra.mxu1 %vm32_vm0, %v21_v11 }
  0xcb   :  { %v237_v12 = vpop.f32.mrf.mxu0 }
  0xcc   :  { %v248_v13 = vpop.f32.mrf.mxu1 }
  0xcd   :  { %v192_v15 = vadd.f32 %v248_v13, %v237_v12  ;;  %v105_v16 = vpop.f32.mrf.mxu0 }
  0xce   :  { %v186_v17 = vpop.f32.mrf.mxu1 }
  0xcf   :  { %v203_v18 = vadd.f32 %v214_v14, %v192_v15  ;;  %v187_v19 = vadd.f32 %v186_v17, %v105_v16 }
  0xd1   :  { %205 = vst.msk [vmem:[%s335_s5 + $0x8] sm:$0xff] %vm32_vm0, %v203_v18  ;;  %v202_v20 = vadd.f32 %v214_v14, %v187_v19 }
  0xd3   :  { %204 = vst.msk [vmem:[%s335_s5] sm:$0xff] %vm32_vm0, %v202_v20 }

// kernel: forward.7
= control target key start
LH: loop header
LB: loop body
LE: loop exit
PB: predicated region body
PF: predicated region fallthrough
CT: control target
= control target key end

     0   :  { %v2530_v0 = vmov 0   ;;  %s2531_s3 = smov 4   ;;  %s2532_s7 = smov 3   ;;  %vm475_vm0 = vcmask 1043456   ;;  %v144_v8 = vlaneseq  ;;  %vm223_vm2 = vcmask 64512   ;;  %s2901_s0 = inlined_call_operand.smem [shape: u32[33], index: -1, kind: input, shape index: {}] }
   0x1   :  { %2500 = vset.pattern.permute.xlu1 %v2530_v0  ;;  %2499 = vset.pattern.permute.xlu0 %v2530_v0  ;;  %s2115_s6 = sld [smem:[%s2901_s0 + %s2531_s3]]   ;;  %s2533_s14 = smov 7   ;;  %v2536_v12 = vmov 0.0   ;;  %vm468_vm6 = vcmask 162816   ;;  %vm386_vm7 = vcmask 261120   ;;  %vm2545_vm8 = vmmov 0  }
   0x2   :  { %s2114_s10 = sld [smem:[%s2901_s0 + %s2532_s7]]   ;;  %s2534_s18 = smov 8   ;;  %v147_v9 = vand.u32 127, %v144_v8  ;;  %vm1408_vm11 = vcmask 130048   ;;  %vm1436_vm12 = vcmask 7168   ;;  %vm1438_vm13 = vcmask 15360  }
   0x3   :  { %s2580_s13 = sld [smem:[%s2901_s0]]   ;;  %s2535_s22 = smov 1   ;;  %vm1440_vm14 = vcmask 23552   ;;  %vm1676_vm15 = vcmask 31744  }
   0x4   :  { %s2592_s17 = sld [smem:[%s2901_s0 + %s2533_s14]]   ;;  %s2537_s26 = smov 9  }
   0x5   :  { %s2597_s21 = sld [smem:[%s2901_s0 + %s2534_s18]]   ;;  %s2538_s30 = smov 10  }
   0x6   :  { %s2606_s25 = sld [smem:[%s2901_s0 + %s2535_s22]]   ;;  %s2539_s4 = smov 96  }
   0x7   :  { %v142_v1 = vld [vmem:[%s2115_s6] sm:$0xff]  ;;  %v143_v3 = vld [vmem:[%s2115_s6 + $0x8] sm:$0xff]  ;;  %s2612_s29 = sld [smem:[%s2901_s0 + %s2537_s26]]   ;;  %s2540_s5 = smov 13  }
   0x8   :  { %168 = vperm.xlu1 %2500, %v142_v1   ;;  %v140_v2 = vld [vmem:[%s2114_s10] sm:$0xff]  ;;  %v141_v5 = vld [vmem:[%s2114_s10 + $0x8] sm:$0xff]  ;;  %s2121_s3 = sld [smem:[%s2901_s0 + %s2538_s30]]   ;;  %s2541_s9 = smov 23  }
   0x9   :  { %156 = vperm.xlu0 %2499, %v140_v2   ;;  %v2583_v4 = vld [vmem:[%s2580_s13] sm:$0xff]  ;;  %s2124_s8 = sld [smem:[%s2901_s0 + %s2540_s5]]   ;;  %s2542_s14 = smov 11  }
   0xa   :  { %2291 = vmatprep.subr.mxu0 %v2583_v4  ;;  %2296 = vmatprep.subr.mxu1 %v2583_v4  ;;  %v181_v6 = vld [vmem:[%s2592_s17 + $0x10] sm:$0xf]  ;;  %v180_v18 = vld [vmem:[%s2592_s17 + $0x8] sm:$0xff]  ;;  %v179_v21 = vld [vmem:[%s2592_s17] sm:$0xff]  ;;  %s2672_s12 = sld [smem:[%s2901_s0 + %s2541_s9]]   ;;  %s2543_s18 = smov 12  }
   0xb   :  { %2292 = vmatpush3.msra.mxu0 %v2583_v4  ;;  %2297 = vmatpush3.msra.mxu1 %v2583_v4  ;;  %v185_v7 = vld [vmem:[%s2597_s21 + $0x18] sm:$0xff]  ;;  %v184_v22 = vld [vmem:[%s2597_s21 + $0x10] sm:$0xff]  ;;  %v183_v26 = vld [vmem:[%s2597_s21 + $0x8] sm:$0xff]  ;;  %s2122_s17 = sld [smem:[%s2901_s0 + %s2542_s14]]   ;;  %s2544_s22 = smov 17  }
   0xc   :  { %171 = vperm.xlu1 %2500, %v143_v3   ;;  %2312 = vmatprep.subr.msk.mxu1 %vm475_vm0, %v181_v6  ;;  %v2623_v19 = vld [vmem:[%s2606_s25] sm:$0xff]  ;;  %v2638_v24 = vld [vmem:[%s2606_s25 + $0x8] sm:$0xff]  ;;  %s2128_s25 = sld [smem:[%s2901_s0 + %s2544_s22]]   ;;  %s2546_s26 = smov 24  }
   0xd   :  { %159 = vperm.xlu0 %2499, %v141_v5   ;;  %2301 = vmatprep.subr.mxu0 %v185_v7  ;;  %v189_v23 = vld [vmem:[%s2612_s29 + $0x18] sm:$0xff]  ;;  %v188_v25 = vld [vmem:[%s2612_s29 + $0x10] sm:$0xff]  ;;  %v187_v27 = vld [vmem:[%s2612_s29 + $0x8] sm:$0xff]  ;;  %s2547_s30 = smov 18   ;;  %s2548_s5 = smov 15  }
   0xe   :  { %v182_v28 = vld [vmem:[%s2597_s21] sm:$0xff]  ;;  %s2123_s21 = sld [smem:[%s2901_s0 + %s2543_s18]]   ;;  %s2549_s9 = smov 19  }
   0xf   :  { %v186_v29 = vld [vmem:[%s2612_s29] sm:$0xff]  ;;  %v196_v61 = vld [vmem:[%s2124_s8 + $0x18] sm:$0xff]  ;;  %v195_v62 = vld [vmem:[%s2124_s8 + $0x10] sm:$0xff]  ;;  %s2135_s29 = sld [smem:[%s2901_s0 + %s2546_s26]]   ;;  %s2550_s14 = smov 21  }
  0x10   :  { %v2161_v39 = vld [vmem:[%s2121_s3] ss:$0 sm:$0xff]  ;;  %v194_v63 = vld [vmem:[%s2124_s8 + $0x8] sm:$0xff]  ;;  %v217_v1 = vld [vmem:[%s2672_s12 + $0x10] sm:$0xf]  ;;  %s2129_s3 = sld [smem:[%s2901_s0 + %s2547_s30]]   ;;  %s2551_s18 = smov 20  }
  0x11   :  { %v193_v0 = vld [vmem:[%s2124_s8] sm:$0xff]  ;;  %s2126_s8 = sld [smem:[%s2901_s0 + %s2548_s5]]  }
  0x12   :  { %s2131_s20 = sld [smem:[%s2901_s0 + %s2551_s18]]  }
  0x83   :  { %v169_v10 = vpop.permute.xlu1 %168 }
  0x84   :  { %vm173_vm1 = vcmp.eq.s32.totalorder %v147_v9, %v169_v10  ;;  %v157_v11 = vpop.permute.xlu0 %156 }
  0x85   :  { %vm161_vm3 = vcmp.eq.s32.totalorder %v147_v9, %v157_v11  ;;  %v2148_v13 = vsel %vm173_vm1, 1.0, %v2536_v12 }
  0x86   :  { %v2615_v14 = vsel %vm161_vm3, 1.0, %v2536_v12  ;;  %2298 = vmatprep.mubr.msk.f32.mxu1 %vm223_vm2, %v2148_v13 }
  0x87   :  { %2293 = vmatprep.mubr.msk.f32.mxu0 %vm223_vm2, %v2615_v14  ;;  %v172_v15 = vpop.permute.xlu1 %171 }
  0x88   :  { %vm174_vm4 = vcmp.eq.s32.totalorder %v147_v9, %v172_v15  ;;  %v160_v16 = vpop.permute.xlu0 %159 }
  0x89   :  { %v2149_v17 = vsel %vm174_vm4, 1.0, %v2536_v12  ;;  %vm162_vm5 = vcmp.eq.s32.totalorder %v147_v9, %v160_v16 }
  0x8a   :  { %v2626_v20 = vsel %vm162_vm5, 1.0, %v2536_v12  ;;  %2299 = vmatmul.mubr.msk.f32.vlgmr.msra.gmra.mxu1 %vm223_vm2, %v2149_v17 }
  0x8b   :  { %2294 = vmatmul.mubr.msk.f32.vlgmr.msra.gmra.mxu0 %vm223_vm2, %v2626_v20  ;;  %2313 = vmatpush3.msk.msra.mxu1 %vm475_vm0, %v181_v6 }
  0x8c   :  { %2314 = vmatprep.subr.mxu1 %v180_v18  ;;  %2318 = vmatprep.mubr.msk.f32.mxu1 %vm468_vm6, %v2623_v19 }
  0x8d   :  { %2315 = vmatpush3.msra.mxu1 %v180_v18  ;;  %2302 = vmatpush3.msra.mxu0 %v185_v7 }
  0x8e   :  { %2316 = vmatprep.subr.mxu1 %v179_v21  ;;  %2303 = vmatprep.subr.mxu0 %v184_v22 }
  0x8f   :  { %2317 = vmatpush3.msra.mxu1 %v179_v21  ;;  %2304 = vmatpush3.msra.mxu0 %v184_v22  ;;  %v2688_v21 = vld [vmem:[%s2122_s17] ss:$0 sm:$0xff]  ;;  %s2132_s17 = sld [smem:[%s2901_s0 + %s2550_s14]]  }
  0x90   :  { %2321 = vmatprep.subr.mxu1 %v189_v23  ;;  %2319 = vmatmul.mubr.msk.f32.vlgmr.msra.gmra.mxu1 %vm468_vm6, %v2638_v24 }
  0x91   :  { %2322 = vmatpush3.msra.mxu1 %v189_v23  ;;  %2305 = vmatprep.subr.mxu0 %v183_v26  ;;  %v2690_v23 = vld [vmem:[%s2123_s21] ss:$0 sm:$0xff]  ;;  %s2552_s21 = smov 22  }
  0x92   :  { %2323 = vmatprep.subr.mxu1 %v188_v25  ;;  %2306 = vmatpush3.msra.mxu0 %v183_v26  ;;  %s2133_s24 = sld [smem:[%s2901_s0 + %s2552_s21]]  }
  0x93   :  { %2324 = vmatpush3.msra.mxu1 %v188_v25  ;;  %2307 = vmatprep.subr.mxu0 %v182_v28 }
  0x94   :  { %2325 = vmatprep.subr.mxu1 %v187_v27  ;;  %2308 = vmatpush3.msra.mxu0 %v182_v28 }
  0x95   :  { %2326 = vmatpush3.msra.mxu1 %v187_v27  ;;  %2332 = vmatprep.subr.mxu0 %v196_v61 }
  0x96   :  { %2327 = vmatprep.subr.mxu1 %v186_v29 }
  0x97   :  { %2328 = vmatpush3.msra.mxu1 %v186_v29 }
 0x14a   :  { %v2300_v30 = vpop.f32.mrf.mxu1 }
 0x14b   :  { %v2295_v31 = vpop.f32.mrf.mxu0 }
 0x14c   :  { %v377_v32 = vpop.f32.mrf.mxu1 }
 0x14d   :  { %v296_v33 = vpop.f32.mrf.mxu0  ;;  %2329 = vmatprep.mubr.msk.f32.mxu1 %vm386_vm7, %v377_v32 }
 0x14e   :  { %2309 = vmatprep.mubr.msk.f32.mxu0 %vm386_vm7, %v296_v33  ;;  %2330 = vmatmul.mubr.msk.f32.vlgmr.msra.gmra.mxu1 %vm386_vm7, %v2300_v30  ;;  %v216_v33 = vld [vmem:[%s2672_s12 + $0x8] sm:$0xff] }
 0x14f   :  { %2310 = vmatmul.mubr.msk.f32.vlgmr.msra.gmra.mxu0 %vm386_vm7, %v2295_v31 }
 0x150   :  { %v2320_v34 = vpop.f32.mrf.mxu1  ;;  %2333 = vmatpush3.msra.mxu0 %v196_v61 }
 0x151   :  { %2334 = vmatprep.subr.mxu0 %v195_v62 }
 0x152   :  { %v545_v35 = vpop.f32.mrf.mxu1  ;;  %2335 = vmatpush3.msra.mxu0 %v195_v62 }
 0x153   :  { %2336 = vmatprep.subr.mxu0 %v194_v63 }
 0x154   :  { %2337 = vmatpush3.msra.mxu0 %v194_v63 }
 0x155   :  { %2338 = vmatprep.subr.mxu0 %v193_v0 }
 0x156   :  { %2339 = vmatpush3.msra.mxu0 %v193_v0 }
 0x157   :  { %2354 = vmatprep.subr.msk.mxu0 %vm475_vm0, %v217_v1 }
 0x20e   :  { %v2331_v37 = vpop.f32.mrf.mxu1 }
 0x20f   :  { %v2311_v36 = vpop.f32.mrf.mxu0 }
 0x210   :  { %v551_v38 = vadd.f32 %v2320_v34, %v2311_v36  ;;  %v626_v43 = vpop.f32.mrf.mxu1  ;;  %v215_v34 = vld [vmem:[%s2672_s12] sm:$0xff]  ;;  %v205_v36 = vld [vmem:[%s2128_s25 + $0x10] sm:$0xff]  ;;  %s2130_s12 = sld [smem:[%s2901_s0 + %s2549_s9]]  }
 0x211   :  { %v459_v40 = vpop.f32.mrf.mxu0 }
 0x212   :  { %v636_v41 = vadd.f32 %v2331_v37, %v551_v38  ;;  %v546_v42 = vadd.f32 %v545_v35, %v459_v40  ;;  %v206_v35 = vld [vmem:[%s2128_s25 + $0x18] sm:$0xff]  ;;  %v204_v37 = vld [vmem:[%s2128_s25 + $0x8] sm:$0xff] }
 0x214   :  { %v2654_v44 = vadd.f32 %v2161_v39, %v636_v41  ;;  %v635_v45 = vadd.f32 %v626_v43, %v546_v42 }
 0x216   :  { %v643_v46 = vadd.f32 %v2161_v39, %v635_v45  ;;  %v648_v47 = vsel %vm386_vm7, %v2654_v44, 0.0 }
 0x217   :  { %649 = vadd.xlane.f32.xlu1 %v648_v47 }
 0x218   :  { %v645_v48 = vsel %vm386_vm7, %v643_v46, 0.0 }
 0x219   :  { %646 = vadd.xlane.f32.xlu0 %v645_v48 }
 0x228   :  { %692 = vrot.lane.b32.xlu1 %v643_v46, %s2539_s4 }
 0x2a0   :  { %v650_v49 = vpop.xlane.xlu1 %649 }
 0x2a1   :  { %v653_v50 = vmul.f32 0.03125, %v650_v49 }
 0x2a2   :  { %v647_v51 = vpop.xlane.xlu0 %646 }
 0x2a3   :  { %v652_v52 = vmul.f32 0.03125, %v647_v51  ;;  %v655_v54 = vsub.f32 %v2654_v44, %v653_v50 }
 0x2a4   :  { %v693_v53 = vpop.permute.xlu1 %692 }
 0x2a5   :  { %v654_v55 = vsub.f32 %v643_v46, %v652_v52  ;;  %v698_v56 = vsel %vm386_vm7, %v693_v53, 0.0  ;;  %v657_v59 = vmul.f32 %v655_v54, %v655_v54 }
 0x2a6   :  { %699 = vadd.xlane.f32.xlu1 %v698_v56 }
 0x2a7   :  { %v656_v57 = vmul.f32 %v654_v55, %v654_v55  ;;  %v661_v60 = vsel %vm386_vm7, %v657_v59, 0.0 }
 0x2a9   :  { %v658_v58 = vsel %vm386_vm7, %v656_v57, 0.0 }
 0x2aa   :  { %659 = vadd.xlane.f32.xlu0 %v658_v58 }
 0x2ae   :  { %662 = vadd.xlane.f32.xlu0 %v661_v60 }
 0x2c4   :  { %694 = vrot.lane.b32.xlu0 %v2654_v44, %s2539_s4 }
 0x32f   :  { %v700_v2 = vpop.xlane.xlu1 %699 }
 0x330   :  { %v704_v3 = vmul.f32 0.03125, %v700_v2 }
 0x332   :  { %v2676_v5 = vsub.f32 %v643_v46, %v704_v3 }
 0x333   :  { %v660_v6 = vpop.xlane.xlu0 %659 }
 0x334   :  { %v664_v7 = vmul.f32 0.03125, %v660_v6  ;;  %v708_v9 = vmul.f32 %v2676_v5, %v2676_v5 }
 0x336   :  { %v666_v10 = vadd.f32 1e-05, %v664_v7  ;;  %712 = vrot.lane.b32.xlu1 %v708_v9, %s2539_s4  ;;  %v201_v9 = vld [vmem:[%s2126_s8 + $0x18] sm:$0xff] }
 0x337   :  { %v663_v11 = vpop.xlane.xlu0 %662  ;;  %2343 = vmatprep.subr.mxu1 %v201_v9 }
 0x338   :  { %2501 = vrsqrt.f32 %v666_v10  ;;  %v665_v13 = vmul.f32 0.03125, %v663_v11  ;;  %2344 = vmatpush3.msra.mxu1 %v201_v9  ;;  %v200_v10 = vld [vmem:[%s2126_s8 + $0x10] sm:$0xff]  ;;  %v199_v11 = vld [vmem:[%s2126_s8 + $0x8] sm:$0xff] }
 0x339   :  { %2345 = vmatprep.subr.mxu1 %v200_v10 }
 0x33a   :  { %v667_v15 = vadd.f32 1e-05, %v665_v13  ;;  %2346 = vmatpush3.msra.mxu1 %v200_v10  ;;  %v198_v13 = vld [vmem:[%s2126_s8] sm:$0xff]  ;;  %s2556_s8 = smov 6  }
 0x33b   :  { %v695_v16 = vpop.permute.xlu0 %694  ;;  %2347 = vmatprep.subr.mxu1 %v199_v11  ;;  %s2117_s11 = sld [smem:[%s2901_s0 + %s2556_s8]]  }
 0x33c   :  { %2503 = vrsqrt.f32 %v667_v15  ;;  %v701_v17 = vsel %vm386_vm7, %v695_v16, 0.0  ;;  %2348 = vmatpush3.msra.mxu1 %v199_v11 }
 0x33d   :  { %702 = vadd.xlane.f32.xlu0 %v701_v17  ;;  %2349 = vmatprep.subr.mxu1 %v198_v13 }
 0x33e   :  { %2350 = vmatpush3.msra.mxu1 %v198_v13 }
 0x33f   :  { %2374 = vmatprep.subr.mxu1 %v2536_v12 }
 0x345   :  { %v2502_v18 = vpop.eup %2501 }
 0x346   :  { %v670_v22 = vmul.f32 %v2502_v18, %v654_v55 }
 0x348   :  { %v678_v25 = vmul.f32 %v2688_v21, %v670_v22 }
 0x349   :  { %v2504_v26 = vpop.eup %2503 }
 0x34a   :  { %v671_v27 = vmul.f32 %v2504_v26, %v655_v54  ;;  %v686_v28 = vadd.f32 %v2690_v23, %v678_v25 }
 0x34c   :  { %v688_v29 = vmax.f32 %v686_v28, 0.0  ;;  %v679_v30 = vmul.f32 %v2688_v21, %v671_v27 }
 0x34e   :  { %2340 = vmatprep.mubr.msk.f32.mxu0 %vm386_vm7, %v688_v29  ;;  %v687_v31 = vadd.f32 %v2690_v23, %v679_v30  ;;  %v2178_v29 = vld [vmem:[%s2130_s12] ss:$0 sm:$0xff]  ;;  %v213_v30 = vld [vmem:[%s2132_s17 + $0x18] sm:$0xff]  ;;  %s2557_s12 = smov 26  }
 0x34f   :  { %s2843_s16 = sld [smem:[%s2901_s0 + %s2557_s12]]  }
 0x350   :  { %v689_v32 = vmax.f32 %v687_v31, 0.0 }
 0x352   :  { %2341 = vmatmul.mubr.msk.f32.vlgmr.msra.gmra.mxu0 %vm386_vm7, %v689_v32 }
 0x353   :  { %2355 = vmatpush3.msk.msra.mxu0 %vm475_vm0, %v217_v1  ;;  %2360 = vmatprep.mubr.msk.f32.mxu0 %vm468_vm6, %v2623_v19  ;;  %v203_v19 = vld [vmem:[%s2128_s25] sm:$0xff]  ;;  %s2553_s25 = smov 5  }
 0x354   :  { %2356 = vmatprep.subr.mxu0 %v216_v33  ;;  %s2116_s28 = sld [smem:[%s2901_s0 + %s2553_s25]]  }
 0x355   :  { %2357 = vmatpush3.msra.mxu0 %v216_v33  ;;  %v2179_v33 = vld [vmem:[%s2131_s20] ss:$0 sm:$0xff]  ;;  %s2559_s20 = smov 25  }
 0x356   :  { %2358 = vmatprep.subr.mxu0 %v215_v34  ;;  %s2136_s23 = sld [smem:[%s2901_s0 + %s2559_s20]]  }
 0x357   :  { %2359 = vmatpush3.msra.mxu0 %v215_v34  ;;  %v212_v34 = vld [vmem:[%s2132_s17 + $0x10] sm:$0xff] }
 0x358   :  { %2363 = vmatprep.subr.mxu0 %v2536_v12  ;;  %2361 = vmatmul.mubr.msk.f32.vlgmr.msra.gmra.mxu0 %vm468_vm6, %v2638_v24  ;;  %v70_v24 = vstv %s2135_s29  ;;  %s2554_s29 = smov 14  }
 0x359   :  { %2364 = vmatpush3.msra.mxu0 %v206_v35  ;;  %2371 = vmatprep.mubr.msk.f32.mxu0 %vm2545_vm8, %v2536_v12  ;;  %71 = vst [vmem:[#allocation2] sm:$0x1] %v70_v24  ;;  %v211_v35 = vld [vmem:[%s2132_s17 + $0x8] sm:$0xff]  ;;  %s2125_s2 = sld [smem:[%s2901_s0 + %s2554_s29]]  }
 0x35a   :  { %2365 = vmatprep.subr.mxu0 %v2536_v12 }
 0x35b   :  { %2366 = vmatpush3.msra.mxu0 %v205_v36 }
 0x35c   :  { %2367 = vmatprep.subr.mxu0 %v2536_v12 }
 0x35d   :  { %2368 = vmatpush3.msra.mxu0 %v204_v37  ;;  %v210_v37 = vld [vmem:[%s2132_s17] sm:$0xff]  ;;  %s2558_s17 = smov 16  }
 0x35e   :  { %2369 = vmatprep.subr.mxu0 %v2536_v12 }
 0x35f   :  { %2370 = vmatpush3.msra.mxu0 %v203_v19 }
 0x360   :  { %2372 = vmatmul.mubr.msk.f32.vlgmr.msra.gmra.mxu0 %vm386_vm7, %v2583_v4 }
 0x361   :  { %2403 = vmatprep.mubr.msk.f32.mxu0 %vm223_vm2, %v2615_v14 }
 0x3a8   :  { %v713_v42 = vpop.permute.xlu1 %712 }
 0x3a9   :  { %v718_v43 = vsel %vm386_vm7, %v713_v42, 0.0 }
 0x3c6   :  { %v703_v38 = vpop.xlane.xlu0 %702 }
 0x3c7   :  { %v705_v39 = vmul.f32 0.03125, %v703_v38 }
 0x3c9   :  { %v707_v40 = vsub.f32 %v2654_v44, %v705_v39  ;;  %v2176_v44 = vld [vmem:[%s2129_s3] ss:$0 sm:$0xff]  ;;  %s2555_s3 = smov 2  }
 0x3ca   :  { %v2180_v39 = vld [vmem:[%s2133_s24] ss:$0 sm:$0xff]  ;;  %s2113_s7 = sld [smem:[%s2901_s0 + %s2555_s3]]   ;;  %s2560_s24 = smov 27  }
 0x3cb   :  { %v709_v41 = vmul.f32 %v707_v40, %v707_v40  ;;  %s2138_s27 = sld [smem:[%s2901_s0 + %s2560_s24]]  }
 0x3cd   :  { %714 = vrot.lane.b32.xlu0 %v709_v41, %s2539_s4 }
 0x3ec   :  { %719 = vadd.xlane.f32.xlu0 %v718_v43  ;;  %v222_v43 = vld [vmem:[%s2116_s28 + $0x18] sm:$0xff] }
 0x412   :  { %v2724_v45 = vpop.f32.mrf.mxu0 }
 0x414   :  { %v2726_v46 = vpop.f32.mrf.mxu0 }
 0x418   :  { %v2731_v47 = vpop.f32.mrf.mxu0 }
 0x41a   :  { %v2733_v48 = vpop.f32.mrf.mxu0 }
 0x420   :  { %v1099_v49 = vpop.f32.mrf.mxu0 }
 0x421   :  { %v1100_v50 = vadd.f32 %v2176_v44, %v1099_v49  ;;  %v221_v44 = vld [vmem:[%s2116_s28 + $0x10] sm:$0xff]  ;;  %v220_v49 = vld [vmem:[%s2116_s28 + $0x8] sm:$0xff] }
 0x422   :  { %v2373_v51 = vpop.f32.mrf.mxu0 }
 0x423   :  { %v1103_v52 = vsel %vm386_vm7, %v1100_v50, 0.0  ;;  %v2164_v51 = vld [vmem:[%s2125_s2] ss:$0 sm:$0xff]  ;;  %s2562_s2 = smov 28  }
 0x424   :  { %1104 = vadd.xlane.f32.xlu1 %v1103_v52  ;;  %s2139_s6 = sld [smem:[%s2901_s0 + %s2562_s2]]  }
 0x43f   :  { %v715_v53 = vpop.permute.xlu0 %714 }
 0x440   :  { %v721_v54 = vsel %vm386_vm7, %v715_v53, 0.0  ;;  %v817_v53 = vadd.f32 %v2164_v51, %v2726_v46  ;;  %v145_v46 = vshrl.u32 %v144_v8, 7 }
 0x441   :  { %722 = vadd.xlane.f32.xlu1 %v721_v54  ;;  %v822_v54 = vadd.f32 %v2724_v45, %v2164_v51  ;;  %v2170_v45 = vld [vmem:[#allocation2] ss:$0 sm:$0xff] }
 0x442   :  { %v1422_v9 = vsub.s32 2, %v145_v46  ;;  %v1675_v51 = vld [vmem:[%s2117_s11] sm:$0xf]  ;;  %s2564_s11 = smov 31  }
 0x443   :  { %s2142_s15 = sld [smem:[%s2901_s0 + %s2564_s11]]  }
 0x475   :  { %v720_v55 = vpop.xlane.xlu0 %719 }
 0x476   :  { %v724_v56 = vmul.f32 0.03125, %v720_v55 }
 0x478   :  { %v726_v57 = vadd.f32 1e-05, %v724_v56 }
 0x47a   :  { %2505 = vrsqrt.f32 %v726_v57 }
 0x487   :  { %v2506_v58 = vpop.eup %2505 }
 0x488   :  { %v730_v59 = vmul.f32 %v2506_v58, %v2676_v5 }
 0x48a   :  { %v732_v60 = vmul.f32 %v2688_v21, %v730_v59 }
 0x48c   :  { %v734_v61 = vadd.f32 %v2690_v23, %v732_v60 }
 0x48e   :  { %v736_v62 = vmax.f32 %v734_v61, 0.0 }
 0x490   :  { %833 = vrot.lane.b32.xlu1 %v736_v62, %s2539_s4  ;;  %v2144_v62 = vld [vmem:[%s2113_s7] ss:$0 sm:$0xff]  ;;  %s2563_s7 = smov 29  }
 0x491   :  { %vm152_vm9 = vcmp.eq.s32.totalorder %v145_v46, %v2144_v62  ;;  %s2140_s10 = sld [smem:[%s2901_s0 + %s2563_s7]]  }
 0x4ad   :  { %v1105_v63 = vpop.xlane.xlu1 %1104 }
 0x4ae   :  { %v1106_v0 = vmul.f32 0.03125, %v1105_v63 }
 0x4b0   :  { %v1107_v1 = vsub.f32 %v1100_v50, %v1106_v0  ;;  %v219_v50 = vld [vmem:[%s2116_s28] sm:$0xff]  ;;  %v992_v0 = vadd.f32 %v2170_v45, %v2733_v48  ;;  %s2561_s28 = smov 30  }
 0x4b1   :  { %s2141_s1 = sld [smem:[%s2901_s0 + %s2561_s28]]  }
 0x4b2   :  { %v1108_v2 = vmul.f32 %v1107_v1, %v1107_v1 }
 0x4b4   :  { %v1109_v3 = vsel %vm386_vm7, %v1108_v2, 0.0  ;;  %v1430_v2 = vsub.s32 3, %v145_v46 }
 0x4b5   :  { %1110 = vadd.xlane.f32.xlu0 %v1109_v3  ;;  %v1405_v3 = vsub.s32 0, %v145_v46 }
 0x4ca   :  { %v723_v5 = vpop.xlane.xlu1 %722 }
 0x4cb   :  { %v725_v6 = vmul.f32 0.03125, %v723_v5  ;;  %v1414_v5 = vsub.s32 1, %v145_v46 }
 0x4cd   :  { %v727_v7 = vadd.f32 1e-05, %v725_v6  ;;  %v2174_v6 = vmul.f32 -1.442695, %v992_v0 }
 0x4cf   :  { %2507 = vrsqrt.f32 %v727_v7 }
 0x4dc   :  { %v2508_v15 = vpop.eup %2507 }
 0x4dd   :  { %v731_v16 = vmul.f32 %v2508_v15, %v707_v40 }
 0x4df   :  { %v733_v17 = vmul.f32 %v2688_v21, %v731_v16 }
 0x4e1   :  { %v735_v18 = vadd.f32 %v2690_v23, %v733_v17 }
 0x4e3   :  { %v737_v22 = vmax.f32 %v735_v18, 0.0 }
 0x4e5   :  { %835 = vrot.lane.b32.xlu0 %v737_v22, %s2539_s4  ;;  %s2127_s4 = sld [smem:[%s2901_s0 + %s2558_s17]]  }
 0x502   :  { %v834_v25 = vpop.permute.xlu1 %833 }
 0x503   :  { %2351 = vmatprep.mubr.msk.f32.mxu1 %vm386_vm7, %v834_v25 }
 0x53e   :  { %v1111_v26 = vpop.xlane.xlu0 %1110 }
 0x53f   :  { %v1112_v27 = vmul.f32 0.03125, %v1111_v26 }
 0x541   :  { %v1113_v28 = vadd.f32 1e-05, %v1112_v27 }
 0x543   :  { %2509 = vrsqrt.f32 %v1113_v28 }
 0x550   :  { %v2510_v21 = vpop.eup %2509 }
 0x551   :  { %v1115_v23 = vmul.f32 %v2510_v21, %v1107_v1  ;;  %v2802_v1 = vsel %vm152_vm9, 1.0, %v2536_v12 }
 0x552   :  { %vm1402_vm10 = vcmp.gt.f32.partialorder %v2802_v1, 0.5 }
 0x553   :  { %v1122_v31 = vmul.f32 %v2178_v29, %v1115_v23 }
 0x555   :  { %v1129_v36 = vadd.f32 %v2179_v33, %v1122_v31 }
 0x557   :  { %v836_v32 = vpop.permute.xlu0 %835  ;;  %v1130_v19 = vmax.f32 %v1129_v36, 0.0 }
 0x558   :  { %2352 = vmatmul.mubr.msk.f32.vlgmr.msra.gmra.mxu1 %vm386_vm7, %v836_v32 }
 0x559   :  { %2375 = vmatpush3.msra.mxu1 %v213_v30  ;;  %2382 = vmatprep.mubr.msk.f32.mxu1 %vm2545_vm8, %v2536_v12 }
 0x55a   :  { %2376 = vmatprep.subr.mxu1 %v2536_v12 }
 0x55b   :  { %2377 = vmatpush3.msra.mxu1 %v212_v34 }
 0x55c   :  { %2378 = vmatprep.subr.mxu1 %v2536_v12 }
 0x55d   :  { %2379 = vmatpush3.msra.mxu1 %v211_v35 }
 0x55e   :  { %2380 = vmatprep.subr.mxu1 %v2536_v12 }
 0x55f   :  { %2381 = vmatpush3.msra.mxu1 %v210_v37 }
 0x560   :  { %2383 = vmatmul.mubr.msk.f32.vlgmr.msra.gmra.mxu1 %vm386_vm7, %v1130_v19 }
 0x561   :  { %2387 = vmatprep.mubr.msk.f32.mxu1 %vm223_vm2, %v2615_v14 }
 0x618   :  { %v2771_v24 = vpop.f32.mrf.mxu1 }
 0x61a   :  { %v2776_v38 = vpop.f32.mrf.mxu1 }
 0x620   :  { %v1206_v40 = vpop.f32.mrf.mxu1 }
 0x621   :  { %v1207_v41 = vadd.f32 %v2180_v39, %v1206_v40 }
 0x622   :  { %v2384_v42 = vpop.f32.mrf.mxu1 }
 0x623   :  { %2385 = vmatprep.subr.mxu1 %v1207_v41 }
 0x624   :  { %2386 = vmatpush3.msra.mxu1 %v1207_v41 }
 0x625   :  { %2388 = vmatmul.mubr.msk.f32.vlgmr.msra.gmra.mxu1 %vm223_vm2, %v2626_v20  ;;  %2390 = vmatprep.subr.mxu1 %v222_v43 }
 0x626   :  { %2391 = vmatpush3.msra.mxu1 %v222_v43 }
 0x627   :  { %2392 = vmatprep.subr.mxu1 %v221_v44 }
 0x628   :  { %2393 = vmatpush3.msra.mxu1 %v221_v44 }
 0x629   :  { %2394 = vmatprep.subr.mxu1 %v220_v49 }
 0x62a   :  { %2395 = vmatpush3.msra.mxu1 %v220_v49 }
 0x62b   :  { %2396 = vmatprep.subr.mxu1 %v219_v50 }
 0x62c   :  { %2397 = vmatpush3.msra.mxu1 %v219_v50 }
 0x6e5   :  { %v2389_v52 = vpop.f32.mrf.mxu1 }
 0x6e6   :  { %v1286_v57 = vmul.f32 %v2389_v52, %v822_v54 }
 0x6e7   :  { %v1276_v55 = vpop.f32.mrf.mxu1 }
 0x6e8   :  { %v1285_v56 = vmul.f32 %v1276_v55, %v817_v53 }
 0x6ea   :  { %2398 = vmatprep.mubr.msk.f32.mxu1 %vm386_vm7, %v1285_v56 }
 0x6eb   :  { %2399 = vmatmul.mubr.msk.f32.vlgmr.msra.gmra.mxu1 %vm386_vm7, %v1286_v57  ;;  %v1840_v57 = vld [vmem:[%s2843_s16 + $0x18] sm:$0xff] }
 0x6ec   :  { %2415 = vmatprep.mubr.msk.f32.mxu1 %vm223_vm2, %v2615_v14  ;;  %v997_v14 = vadd.f32 %v2731_v47, %v2170_v45 }
 0x6ee   :  { %v2175_v63 = vmul.f32 -1.442695, %v997_v14 }
 0x6f0   :  { %2511 = vpow2.f32 %v2175_v63 }
 0x6f1   :  { %2513 = vpow2.f32 %v2174_v6  ;;  %v1836_v6 = vld [vmem:[%s2136_s23 + $0x18] sm:$0xff] }
 0x6fd   :  { %v2512_v26 = vpop.eup %2511 }
 0x6fe   :  { %v1007_v27 = vadd.f32 1.0, %v2512_v26  ;;  %v2514_v28 = vpop.eup %2513 }
 0x6ff   :  { %v1006_v21 = vadd.f32 1.0, %v2514_v28  ;;  %v2024_v28 = vld [vmem:[%s2141_s1 + $0x10] sm:$0xff] }
 0x700   :  { %2515 = vrcp.f32 %v1007_v27  ;;  %v2025_v27 = vld [vmem:[%s2141_s1 + $0x18] sm:$0xff] }
 0x701   :  { %2517 = vrcp.f32 %v1006_v21  ;;  %v2023_v21 = vld [vmem:[%s2141_s1 + $0x8] sm:$0xff] }
 0x70d   :  { %v2516_v23 = vpop.eup %2515 }
 0x70e   :  { %v2518_v29 = vpop.eup %2517 }
 0x7ab   :  { %v2400_v58 = vpop.f32.mrf.mxu1 }
 0x7ac   :  { %v2792_v61 = vmul.f32 0.35355338, %v2400_v58  ;;  %v1839_v58 = vld [vmem:[%s2843_s16 + $0x10] sm:$0xff] }
 0x7ad   :  { %v1359_v59 = vpop.f32.mrf.mxu1 }
 0x7ae   :  { %v2789_v60 = vmul.f32 0.35355338, %v1359_v59  ;;  %v1838_v59 = vld [vmem:[%s2843_s16 + $0x8] sm:$0xff] }
 0x7b0   :  { %1370 = vxpose.xlu1.b32.start [1/2] (short) (narrow) %v2789_v60, 8 }
 0x7b4   :  { %1371 = vxpose.xlu1.b32.end [2/2] (short) (narrow) %v2792_v61, 8 }
 0x82c   :  { %v1386_v7 = vpop.trf.xlu1 }
 0x82d   :  { %v1431_v8 = vrot.slane %v1386_v7, %v1430_v2  ;;  %v1406_v10 = vrot.slane %v1386_v7, %v1405_v3  ;;  %v1415_v47 = vrot.slane %v1386_v7, %v1414_v5  ;;  %v1423_v17 = vrot.slane %v1386_v7, %v1422_v9  ;;  %v1837_v7 = vld [vmem:[%s2843_s16] sm:$0xff]  ;;  %s2565_s16 = smov 32  }
 0x82e   :  { %v1833_v9 = vld [vmem:[%s2136_s23] sm:$0xff]  ;;  %s2143_s19 = sld [smem:[%s2901_s0 + %s2565_s16]]  }
 0x82f   :  { %v1432_v11 = vsel %vm1402_vm10, %v1431_v8, -1e+30  ;;  %v1407_v48 = vsel %vm1402_vm10, %v1406_v10, -1e+30  ;;  %v1416_v16 = vsel %vm1402_vm10, %v1415_v47, -1e+30 }
 0x830   :  { %v1433_v13 = vsel %vm1408_vm11, %v1432_v11, -inf  ;;  %v1409_v15 = vsel %vm1408_vm11, %v1407_v48, -inf  ;;  %v1417_v18 = vsel %vm1408_vm11, %v1416_v16, -inf  ;;  %v1424_v22 = vsel %vm1402_vm10, %v1423_v17, -1e+30 }
 0x831   :  { %1434 = vmax.xlane.f32.xlu1 %v1433_v13  ;;  %1410 = vmax.xlane.f32.xlu0 %v1409_v15  ;;  %v1425_v25 = vsel %vm1408_vm11, %v1424_v22, -inf  ;;  %v2197_v48 = vld [vmem:[%s2138_s27] ss:$0 sm:$0xff] }
 0x835   :  { %1418 = vmax.xlane.f32.xlu0 %v1417_v18 }
 0x839   :  { %1426 = vmax.xlane.f32.xlu0 %v1425_v25 }
 0x84f   :  { %1019 = vperm.xlu0 %2499, %v2516_v23   ;;  %v2022_v23 = vld [vmem:[%s2141_s1] sm:$0xff] }
 0x853   :  { %1014 = vperm.xlu0 %2499, %v2518_v29  }
 0x8ba   :  { %v1411_v30 = vpop.xlane.xlu0 %1410  ;;  %v1435_v34 = vpop.xlane.xlu1 %1434 }
 0x8be   :  { %v1419_v31 = vpop.xlane.xlu0 %1418 }
 0x8bf   :  { %v1437_v32 = vsel %vm1436_vm12, %v1411_v30, %v1419_v31 }
 0x8c2   :  { %v1427_v33 = vpop.xlane.xlu0 %1426 }
 0x8c3   :  { %v1439_v35 = vsel %vm1438_vm13, %v1437_v32, %v1427_v33  ;;  %v2198_v33 = vld [vmem:[%s2139_s6] ss:$0 sm:$0xff] }
 0x8c4   :  { %v1441_v36 = vsel %vm1440_vm14, %v1439_v35, %v1435_v34 }
 0x8c5   :  { %2401 = vmatprep.subr.mxu0 %v1441_v36 }
 0x8c6   :  { %2402 = vmatpush3.msra.mxu0 %v1441_v36 }
 0x8c7   :  { %2404 = vmatmul.mubr.msk.f32.vlgmr.msra.gmra.mxu0 %vm223_vm2, %v2626_v20  ;;  %2406 = vmatprep.subr.mxu0 %v2536_v12 }
 0x8c8   :  { %2410 = vmatprep.mubr.msk.f32.mxu0 %vm2545_vm8, %v2536_v12 }
 0x987   :  { %v2405_v37 = vpop.f32.mrf.mxu0 }
 0x988   :  { %v1518_v19 = vsub.f32 %v2792_v61, %v2405_v37  ;;  %v2167_v61 = vld [vmem:[%s2127_s4] ss:$0 sm:$0xff] }
 0x989   :  { %v1508_v39 = vpop.f32.mrf.mxu0  ;;  %v913_v45 = vadd.f32 %v2771_v24, %v2167_v61  ;;  %v908_v62 = vadd.f32 %v2167_v61, %v2776_v38  ;;  %v1835_v24 = vld [vmem:[%s2136_s23 + $0x10] sm:$0xff]  ;;  %v1834_v38 = vld [vmem:[%s2136_s23 + $0x8] sm:$0xff] }
 0x98a   :  { %v1521_v40 = vmul.f32 1.442695, %v1518_v19  ;;  %v1517_v41 = vsub.f32 %v2789_v60, %v1508_v39  ;;  %v1020_v60 = vpop.permute.xlu0 %1019  ;;  %v2200_v19 = vld [vmem:[%s2142_s15] ss:$0 sm:$0xff] }
 0x98b   :  { %v1023_v14 = vmul.f32 %v1020_v60, %v913_v45 }
 0x98c   :  { %2519 = vpow2.f32 %v1521_v40  ;;  %v1519_v42 = vmul.f32 1.442695, %v1517_v41 }
 0x98e   :  { %2521 = vpow2.f32 %v1519_v42  ;;  %v1015_v46 = vpop.permute.xlu0 %1014  ;;  %v2529_v42 = vld [vmem:[%s2580_s13] sm:$0xff] }
 0x98f   :  { %v1022_v0 = vmul.f32 %v1015_v46, %v908_v62 }
 0x999   :  { %v2520_v43 = vpop.eup %2519 }
 0x99a   :  { %2407 = vmatpush3.msra.mxu0 %v2520_v43 }
 0x99b   :  { %v2522_v44 = vpop.eup %2521  ;;  %2408 = vmatprep.subr.mxu0 %v2536_v12 }
 0x99c   :  { %2409 = vmatpush3.msra.mxu0 %v2522_v44 }
 0x99d   :  { %2411 = vmatmul.mubr.msk.f32.vlgmr.msra.gmra.mxu0 %vm1408_vm11, %v2802_v1  ;;  %2418 = vmatprep.subr.msk.mxu0 %vm475_vm0, %v1675_v51 }
 0x99e   :  { %2419 = vmatpush3.msk.msra.mxu0 %vm475_vm0, %v1675_v51 }
 0x99f   :  { %2430 = vmatprep.subr.mxu0 %v2536_v12 }
 0xa5d   :  { %v1592_v49 = vpop.f32.mrf.mxu0 }
 0xa5e   :  { %2413 = vmatprep.subr.mxu1 %v1592_v49 }
 0xa5f   :  { %v2412_v50 = vpop.f32.mrf.mxu0  ;;  %2414 = vmatpush3.msra.mxu1 %v1592_v49 }
 0xa60   :  { %2416 = vmatmul.mubr.msk.f32.vlgmr.msra.gmra.mxu1 %vm223_vm2, %v2626_v20  ;;  %2423 = vmatprep.subr.mxu1 %v2536_v12 }
 0xa61   :  { %2427 = vmatprep.mubr.msk.f32.mxu1 %vm2545_vm8, %v2536_v12 }
 0xb20   :  { %v2417_v52 = vpop.f32.mrf.mxu1 }
 0xb21   :  { %2523 = vrcp.f32 %v2417_v52 }
 0xb22   :  { %v1662_v20 = vpop.f32.mrf.mxu1 }
 0xb23   :  { %2525 = vrcp.f32 %v1662_v20 }
 0xb2e   :  { %v2524_v53 = vpop.eup %2523 }
 0xb2f   :  { %v1674_v56 = vmul.f32 %v2524_v53, %v2520_v43 }
 0xb30   :  { %v2526_v54 = vpop.eup %2525 }
 0xb31   :  { %v1672_v55 = vmul.f32 %v2526_v54, %v2522_v44 }
 0xb33   :  { %2420 = vmatprep.mubr.msk.f32.mxu0 %vm1676_vm15, %v1672_v55 }
 0xb34   :  { %2421 = vmatmul.mubr.msk.f32.vlgmr.msra.gmra.mxu0 %vm1676_vm15, %v1674_v56 }
 0xb35   :  { %2438 = vmatprep.mubr.msk.f32.mxu0 %vm2545_vm8, %v2536_v12  ;;  %2431 = vmatpush3.msra.mxu0 %v1840_v57 }
 0xb36   :  { %2432 = vmatprep.subr.mxu0 %v2536_v12 }
 0xb37   :  { %2433 = vmatpush3.msra.mxu0 %v1839_v58 }
 0xb38   :  { %2434 = vmatprep.subr.mxu0 %v2536_v12 }
 0xb39   :  { %2435 = vmatpush3.msra.mxu0 %v1838_v59 }
 0xb3a   :  { %2436 = vmatprep.subr.mxu0 %v2536_v12 }
 0xb3b   :  { %2437 = vmatpush3.msra.mxu0 %v1837_v7 }
 0xb3c   :  { %2439 = vmatmul.mubr.msk.f32.vlgmr.msra.gmra.mxu0 %vm386_vm7, %v2583_v4  ;;  %2452 = vmatprep.subr.mxu0 %v2536_v12 }
 0xb3d   :  { %2460 = vmatprep.mubr.msk.f32.mxu0 %vm2545_vm8, %v2536_v12  ;;  %2453 = vmatpush3.msra.mxu0 %v2025_v27 }
 0xb3e   :  { %2454 = vmatprep.subr.mxu0 %v2536_v12 }
 0xb3f   :  { %2455 = vmatpush3.msra.mxu0 %v2024_v28 }
 0xb40   :  { %2456 = vmatprep.subr.mxu0 %v2536_v12 }
 0xb41   :  { %2457 = vmatpush3.msra.mxu0 %v2023_v21 }
 0xb42   :  { %2458 = vmatprep.subr.mxu0 %v2536_v12 }
 0xb43   :  { %2459 = vmatpush3.msra.mxu0 %v2022_v23 }
 0xbf4   :  { %v2422_v63 = vpop.f32.mrf.mxu0 }
 0xbf5   :  { %v1762_v2 = vmul.f32 %v2422_v63, %v1023_v14 }
 0xbf6   :  { %v1752_v3 = vpop.f32.mrf.mxu0 }
 0xbf7   :  { %v1761_v5 = vmul.f32 %v1752_v3, %v1022_v0  ;;  %2424 = vmatpush3.msra.mxu1 %v1762_v2 }
 0xbf8   :  { %2425 = vmatprep.subr.mxu1 %v2536_v12 }
 0xbf9   :  { %2426 = vmatpush3.msra.mxu1 %v1761_v5 }
 0xbfa   :  { %2428 = vmatmul.mubr.msk.f32.vlgmr.msra.gmra.mxu1 %vm1408_vm11, %v2802_v1  ;;  %2441 = vmatprep.subr.mxu1 %v2536_v12 }
 0xbfb   :  { %2442 = vmatpush3.msra.mxu1 %v1836_v6  ;;  %2449 = vmatprep.mubr.msk.f32.mxu1 %vm2545_vm8, %v2536_v12 }
 0xbfc   :  { %2443 = vmatprep.subr.mxu1 %v2536_v12  ;;  %v1907_v10 = vpop.f32.mrf.mxu0 }
 0xbfd   :  { %2444 = vmatpush3.msra.mxu1 %v1835_v24 }
 0xbfe   :  { %2445 = vmatprep.subr.mxu1 %v2536_v12  ;;  %v2440_v47 = vpop.f32.mrf.mxu0 }
 0xbff   :  { %2446 = vmatpush3.msra.mxu1 %v1834_v38 }
 0xc00   :  { %2447 = vmatprep.subr.mxu1 %v2536_v12  ;;  %v2199_v12 = vld [vmem:[%s2140_s10] ss:$0 sm:$0xff] }
 0xc01   :  { %2448 = vmatpush3.msra.mxu1 %v1833_v9 }
 0xcba   :  { %v1829_v1 = vpop.f32.mrf.mxu1 }
 0xcbb   :  { %2450 = vmatmul.mubr.msk.f32.vlgmr.msra.gmra.mxu1 %vm386_vm7, %v1829_v1 }
 0xcbc   :  { %v2429_v8 = vpop.f32.mrf.mxu1 }
 0xd7b   :  { %v1980_v11 = vpop.f32.mrf.mxu1 }
 0xd7c   :  { %v1981_v4 = vadd.f32 %v1980_v11, %v1907_v10 }
 0xd7d   :  { %v2451_v13 = vpop.f32.mrf.mxu1 }
 0xd7e   :  { %v1991_v15 = vadd.f32 %v2197_v48, %v1981_v4 }
 0xd80   :  { %v1994_v16 = vsel %vm386_vm7, %v1991_v15, 0.0 }
 0xd81   :  { %1995 = vadd.xlane.f32.xlu0 %v1994_v16 }
 0xe0a   :  { %v1996_v17 = vpop.xlane.xlu0 %1995 }
 0xe0b   :  { %v1997_v18 = vmul.f32 0.03125, %v1996_v17 }
 0xe0d   :  { %v1998_v22 = vsub.f32 %v1991_v15, %v1997_v18 }
 0xe0f   :  { %v1999_v25 = vmul.f32 %v1998_v22, %v1998_v22 }
 0xe11   :  { %v2000_v26 = vsel %vm386_vm7, %v1999_v25, 0.0 }
 0xe12   :  { %2001 = vadd.xlane.f32.xlu1 %v2000_v26 }
 0xe9b   :  { %v2002_v29 = vpop.xlane.xlu1 %2001 }
 0xe9c   :  { %v2003_v30 = vmul.f32 0.03125, %v2002_v29 }
 0xe9e   :  { %v2004_v31 = vadd.f32 1e-05, %v2003_v30 }
 0xea0   :  { %2527 = vrsqrt.f32 %v2004_v31 }
 0xead   :  { %v2528_v32 = vpop.eup %2527 }
 0xeae   :  { %v2006_v34 = vmul.f32 %v2528_v32, %v1998_v22 }
 0xeb0   :  { %v2013_v35 = vmul.f32 %v2198_v33, %v2006_v34 }
 0xeb2   :  { %v2020_v36 = vadd.f32 %v2199_v12, %v2013_v35 }
 0xeb4   :  { %v2021_v37 = vmax.f32 %v2020_v36, 0.0 }
 0xeb6   :  { %2461 = vmatmul.mubr.msk.f32.vlgmr.msra.gmra.mxu0 %vm386_vm7, %v2021_v37 }
 0xf76   :  { %v2102_v39 = vpop.f32.mrf.mxu0 }
 0xf77   :  { %v2103_v40 = vadd.f32 %v2200_v19, %v2102_v39 }
 0xf78   :  { %v2462_v41 = vpop.f32.mrf.mxu0 }
 0xf79   :  { %v2106_v43 = vadd.f32 %v2529_v42, %v2103_v40 }
 0xf7b   :  { %2107 = vst.msk [vmem:[%s2143_s19] sm:$0xff] %vm386_vm7, %v2106_v43 }

// kernel: forward.6
= control target key start
LH: loop header
LB: loop body
LE: loop exit
PB: predicated region body
PF: predicated region fallthrough
CT: control target
= control target key end

     0   :  { %v3624_v0 = vmov 0   ;;  %s3625_s3 = smov 3   ;;  %s3626_s10 = smov 4   ;;  %vm648_vm0 = vcmask 1043456   ;;  %v157_v17 = vlaneseq  ;;  %vm288_vm1 = vcmask 130048   ;;  %s4314_s0 = inlined_call_operand.smem [shape: u32[33], index: -1, kind: input, shape index: {}] }
   0x1   :  { %3541 = vset.pattern.permute.xlu1 %v3624_v0  ;;  %3540 = vset.pattern.permute.xlu0 %v3624_v0  ;;  %s2908_s6 = sld [smem:[%s4314_s0 + %s3625_s3]]   ;;  %s3627_s14 = smov 8   ;;  %v3629_v21 = vmov 0.0   ;;  %vm629_vm14 = vcmask 162816   ;;  %vm515_vm15 = vcmask 261120  }
   0x2   :  { %s3670_s9 = sld [smem:[%s4314_s0]]   ;;  %s3628_s18 = smov 7   ;;  %v161_v18 = vand.u32 127, %v157_v17 }
   0x3   :  { %s2909_s13 = sld [smem:[%s4314_s0 + %s3626_s10]]   ;;  %s3630_s22 = smov 1  }
   0x4   :  { %s3692_s17 = sld [smem:[%s4314_s0 + %s3627_s14]]   ;;  %s3631_s26 = smov 9  }
   0x5   :  { %s3697_s21 = sld [smem:[%s4314_s0 + %s3628_s18]]   ;;  %s3632_s30 = smov 10  }
   0x6   :  { %s2906_s25 = sld [smem:[%s4314_s0 + %s3630_s22]]   ;;  %s3633_s4 = smov 96  }
   0x7   :  { %v147_v1 = vld [vmem:[%s2908_s6 + $0x10] sm:$0xff]  ;;  %v145_v2 = vld [vmem:[%s2908_s6] sm:$0xff]  ;;  %v148_v3 = vld [vmem:[%s2908_s6 + $0x18] sm:$0xff]  ;;  %s3757_s29 = sld [smem:[%s4314_s0 + %s3631_s26]]   ;;  %s3634_s5 = smov 15  }
   0x8   :  { %179 = vperm.xlu1 %3541, %v147_v1   ;;  %173 = vperm.xlu0 %3540, %v145_v2   ;;  %v146_v4 = vld [vmem:[%s2908_s6 + $0x8] sm:$0xff]  ;;  %v3679_v6 = vld [vmem:[%s3670_s9] sm:$0xff]  ;;  %s2915_s3 = sld [smem:[%s4314_s0 + %s3632_s30]]   ;;  %s3635_s10 = smov 11  }
   0x9   :  { %v3676_v5 = vld [vmem:[%s3670_s9 + $0x8] sm:$0xff]  ;;  %v149_v8 = vld [vmem:[%s2908_s6 + $0x20] sm:$0xff]  ;;  %v154_v11 = vld [vmem:[%s2909_s13 + $0x18] sm:$0xff]  ;;  %s3877_s8 = sld [smem:[%s4314_s0 + %s3634_s5]]   ;;  %s3636_s14 = smov 12  }
   0xa   :  { %v150_v7 = vld [vmem:[%s2908_s6 + $0x28] sm:$0xff]  ;;  %3229 = vmatprep.subr.mxu0 %v3676_v5  ;;  %3242 = vmatprep.subr.mxu1 %v3676_v5  ;;  %v151_v10 = vld [vmem:[%s2909_s13] sm:$0xff]  ;;  %v153_v12 = vld [vmem:[%s2909_s13 + $0x10] sm:$0xff]  ;;  %s3637_s18 = smov 17   ;;  %s3638_s22 = smov 18  }
   0xb   :  { %3230 = vmatpush3.msra.mxu0 %v3676_v5  ;;  %3243 = vmatpush3.msra.mxu1 %v3676_v5  ;;  %v152_v9 = vld [vmem:[%s2909_s13 + $0x8] sm:$0xff]  ;;  %v155_v14 = vld [vmem:[%s2909_s13 + $0x20] sm:$0xff]  ;;  %v250_v15 = vld [vmem:[%s3692_s17 + $0x18] sm:$0xff]  ;;  %s3639_s26 = smov 13   ;;  %s3640_s30 = smov 23  }
   0xc   :  { %182 = vperm.xlu1 %3541, %v148_v3   ;;  %176 = vperm.xlu0 %3540, %v146_v4   ;;  %v156_v13 = vld [vmem:[%s2909_s13 + $0x28] sm:$0xff]  ;;  %v246_v16 = vld [vmem:[%s3697_s21 + $0x10] sm:$0xf]  ;;  %v247_v47 = vld [vmem:[%s3692_s17] sm:$0xff]  ;;  %s2916_s13 = sld [smem:[%s4314_s0 + %s3635_s10]]   ;;  %s3655_s1 = smov 28  }
   0xd   :  { %3231 = vmatprep.subr.mxu0 %v3679_v6  ;;  %3244 = vmatprep.subr.mxu1 %v3679_v6  ;;  %v249_v27 = vld [vmem:[%s3692_s17 + $0x10] sm:$0xff]  ;;  %v248_v45 = vld [vmem:[%s3692_s17 + $0x8] sm:$0xff]  ;;  %v244_v48 = vld [vmem:[%s3697_s21] sm:$0xff]  ;;  %s2917_s17 = sld [smem:[%s4314_s0 + %s3636_s14]]   ;;  %s3656_s5 = smov 29  }
   0xe   :  { %3232 = vmatpush3.msra.mxu0 %v3679_v6  ;;  %3245 = vmatpush3.msra.mxu1 %v3679_v6  ;;  %v245_v46 = vld [vmem:[%s3697_s21 + $0x8] sm:$0xff]  ;;  %v3759_v49 = vld [vmem:[%s2906_s25] sm:$0xff]  ;;  %v3767_v51 = vld [vmem:[%s2906_s25 + $0x10] sm:$0xff]  ;;  %s3894_s21 = sld [smem:[%s4314_s0 + %s3637_s18]]   ;;  %s3657_s10 = smov 31  }
   0xf   :  { %3255 = vmatprep.subr.mxu0 %v250_v15  ;;  %3272 = vmatprep.subr.msk.mxu1 %vm648_vm0, %v246_v16  ;;  %v3761_v50 = vld [vmem:[%s2906_s25 + $0x8] sm:$0xff]  ;;  %v3771_v52 = vld [vmem:[%s2906_s25 + $0x18] sm:$0xff]  ;;  %v3776_v54 = vld [vmem:[%s2906_s25 + $0x20] sm:$0xff]  ;;  %s3658_s14 = smov 32  }
  0x10   :  { %188 = vperm.xlu1 %3541, %v150_v7   ;;  %185 = vperm.xlu0 %3540, %v149_v8   ;;  %v254_v53 = vld [vmem:[%s3757_s29 + $0x18] sm:$0xff]  ;;  %v3780_v55 = vld [vmem:[%s2906_s25 + $0x28] sm:$0xff]  ;;  %v253_v58 = vld [vmem:[%s3757_s29 + $0x10] sm:$0xff]  ;;  %s2923_s25 = sld [smem:[%s4314_s0 + %s3638_s22]]  }
  0x11   :  { %v252_v60 = vld [vmem:[%s3757_s29 + $0x8] sm:$0xff]  ;;  %v251_v62 = vld [vmem:[%s3757_s29] sm:$0xff]  ;;  %s2918_s29 = sld [smem:[%s4314_s0 + %s3639_s26]]  }
  0x14   :  { %212 = vperm.xlu1 %3541, %v152_v9   ;;  %209 = vperm.xlu0 %3540, %v151_v10  }
  0x18   :  { %218 = vperm.xlu1 %3541, %v154_v11   ;;  %215 = vperm.xlu0 %3540, %v153_v12  }
  0x1c   :  { %224 = vperm.xlu1 %3541, %v156_v13   ;;  %221 = vperm.xlu0 %3540, %v155_v14  }
  0x83   :  { %v180_v19 = vpop.permute.xlu1 %179  ;;  %v174_v20 = vpop.permute.xlu0 %173 }
  0x84   :  { %vm190_vm2 = vcmp.eq.s32.totalorder %v161_v18, %v174_v20  ;;  %vm192_vm3 = vcmp.eq.s32.totalorder %v161_v18, %v180_v19 }
  0x85   :  { %v3704_v22 = vsel %vm190_vm2, 1.0, %v3629_v21  ;;  %v3709_v25 = vsel %vm192_vm3, 1.0, %v3629_v21 }
  0x86   :  { %3233 = vmatprep.mubr.msk.f32.mxu0 %vm288_vm1, %v3704_v22 }
  0x87   :  { %v183_v23 = vpop.permute.xlu1 %182  ;;  %v177_v24 = vpop.permute.xlu0 %176 }
  0x88   :  { %vm191_vm4 = vcmp.eq.s32.totalorder %v161_v18, %v177_v24  ;;  %vm193_vm5 = vcmp.eq.s32.totalorder %v161_v18, %v183_v23  ;;  %v2984_v23 = vld [vmem:[%s2915_s3] ss:$0 sm:$0xff]  ;;  %s4019_s3 = sld [smem:[%s4314_s0 + %s3640_s30]]  }
  0x89   :  { %v3712_v26 = vsel %vm191_vm4, 1.0, %v3629_v21  ;;  %v3720_v30 = vsel %vm193_vm5, 1.0, %v3629_v21  ;;  %vm2035_vm4 = vcmask 392192  }
  0x8a   :  { %3234 = vmatmul.mubr.msk.f32.vlgmr.msra.gmra.mxu0 %vm288_vm1, %v3712_v26 }
  0x8b   :  { %v189_v28 = vpop.permute.xlu1 %188  ;;  %v186_v29 = vpop.permute.xlu0 %185  ;;  %3236 = vmatprep.mubr.msk.f32.mxu0 %vm288_vm1, %v3709_v25  ;;  %3256 = vmatpush3.msra.mxu0 %v250_v15 }
  0x8c   :  { %vm194_vm6 = vcmp.eq.s32.totalorder %v161_v18, %v186_v29  ;;  %3257 = vmatprep.subr.mxu0 %v249_v27  ;;  %vm195_vm7 = vcmp.eq.s32.totalorder %v161_v18, %v189_v28 }
  0x8d   :  { %v3723_v31 = vsel %vm194_vm6, 1.0, %v3629_v21  ;;  %3258 = vmatpush3.msra.mxu0 %v249_v27  ;;  %v3730_v34 = vsel %vm195_vm7, 1.0, %v3629_v21  ;;  %vm2078_vm7 = vcmask 7168  }
  0x8e   :  { %3237 = vmatmul.mubr.msk.f32.gmra.mxu0 %vm288_vm1, %v3720_v30  ;;  %3259 = vmatprep.subr.mxu0 %v248_v45 }
  0x8f   :  { %v213_v32 = vpop.permute.xlu1 %212  ;;  %v210_v33 = vpop.permute.xlu0 %209  ;;  %3239 = vmatprep.mubr.msk.f32.mxu0 %vm288_vm1, %v3723_v31  ;;  %3260 = vmatpush3.msra.mxu0 %v248_v45 }
  0x90   :  { %vm227_vm8 = vcmp.eq.s32.totalorder %v161_v18, %v213_v32  ;;  %vm226_vm9 = vcmp.eq.s32.totalorder %v161_v18, %v210_v33  ;;  %3261 = vmatprep.subr.mxu0 %v247_v47 }
  0x91   :  { %v2948_v35 = vsel %vm227_vm8, 1.0, %v3629_v21  ;;  %v2947_v36 = vsel %vm226_vm9, 1.0, %v3629_v21  ;;  %3262 = vmatpush3.msra.mxu0 %v247_v47  ;;  %vm2081_vm8 = vcmask 15360   ;;  %vm2084_vm9 = vcmask 23552  }
  0x92   :  { %3240 = vmatmul.mubr.msk.f32.gmra.mxu0 %vm288_vm1, %v3730_v34  ;;  %3246 = vmatprep.mubr.msk.f32.mxu1 %vm288_vm1, %v2947_v36 }
  0x93   :  { %v219_v37 = vpop.permute.xlu1 %218  ;;  %v216_v38 = vpop.permute.xlu0 %215  ;;  %3247 = vmatmul.mubr.msk.f32.vlgmr.msra.gmra.mxu1 %vm288_vm1, %v2948_v35  ;;  %3287 = vmatprep.subr.mxu0 %v254_v53 }
  0x94   :  { %vm229_vm10 = vcmp.eq.s32.totalorder %v161_v18, %v219_v37  ;;  %vm228_vm11 = vcmp.eq.s32.totalorder %v161_v18, %v216_v38  ;;  %3273 = vmatpush3.msk.msra.mxu1 %vm648_vm0, %v246_v16 }
  0x95   :  { %v2950_v39 = vsel %vm229_vm10, 1.0, %v3629_v21  ;;  %v2949_v40 = vsel %vm228_vm11, 1.0, %v3629_v21  ;;  %3274 = vmatprep.subr.mxu1 %v245_v46 }
  0x96   :  { %3249 = vmatprep.mubr.msk.f32.mxu1 %vm288_vm1, %v2949_v40  ;;  %3275 = vmatpush3.msra.mxu1 %v245_v46 }
  0x97   :  { %v225_v41 = vpop.permute.xlu1 %224  ;;  %v222_v42 = vpop.permute.xlu0 %221  ;;  %3250 = vmatmul.mubr.msk.f32.gmra.mxu1 %vm288_vm1, %v2950_v39  ;;  %3276 = vmatprep.subr.mxu1 %v244_v48 }
  0x98   :  { %vm231_vm12 = vcmp.eq.s32.totalorder %v161_v18, %v225_v41  ;;  %vm230_vm13 = vcmp.eq.s32.totalorder %v161_v18, %v222_v42  ;;  %3277 = vmatpush3.msra.mxu1 %v244_v48 }
  0x99   :  { %v2952_v43 = vsel %vm231_vm12, 1.0, %v3629_v21  ;;  %v2951_v44 = vsel %vm230_vm13, 1.0, %v3629_v21 }
  0x9a   :  { %3252 = vmatprep.mubr.msk.f32.mxu1 %vm288_vm1, %v2951_v44 }
  0x9b   :  { %3253 = vmatmul.mubr.msk.f32.gmra.mxu1 %vm288_vm1, %v2952_v43 }
  0x9c   :  { %3278 = vmatprep.mubr.msk.f32.mxu1 %vm629_vm14, %v3759_v49 }
  0x9f   :  { %3279 = vmatmul.mubr.msk.f32.vlgmr.msra.gmra.mxu1 %vm629_vm14, %v3761_v50 }
  0xa0   :  { %3281 = vmatprep.mubr.msk.f32.mxu1 %vm629_vm14, %v3767_v51 }
  0xa3   :  { %3282 = vmatmul.mubr.msk.f32.gmra.mxu1 %vm629_vm14, %v3771_v52 }
  0xa4   :  { %3284 = vmatprep.mubr.msk.f32.mxu1 %vm629_vm14, %v3776_v54 }
  0xa7   :  { %3285 = vmatmul.mubr.msk.f32.gmra.mxu1 %vm629_vm14, %v3780_v55 }
 0x14a   :  { %v3235_v56 = vpop.f32.mrf.mxu0 }
 0x14c   :  { %v373_v57 = vpop.f32.mrf.mxu0 }
 0x14d   :  { %3263 = vmatprep.mubr.msk.f32.mxu0 %vm515_vm15, %v373_v57 }
 0x14e   :  { %v3238_v59 = vpop.f32.mrf.mxu0  ;;  %3264 = vmatmul.mubr.msk.f32.vlgmr.msra.gmra.mxu0 %vm515_vm15, %v3235_v56 }
 0x14f   :  { %3288 = vmatpush3.msra.mxu0 %v254_v53 }
 0x150   :  { %v383_v61 = vpop.f32.mrf.mxu0  ;;  %3289 = vmatprep.subr.mxu0 %v253_v58 }
 0x151   :  { %3266 = vmatprep.mubr.msk.f32.mxu0 %vm515_vm15, %v383_v61  ;;  %3290 = vmatpush3.msra.mxu0 %v253_v58 }
 0x152   :  { %v3241_v63 = vpop.f32.mrf.mxu0  ;;  %3267 = vmatmul.mubr.msk.f32.gmra.mxu0 %vm515_vm15, %v3238_v59  ;;  %3291 = vmatprep.subr.mxu0 %v252_v60 }
 0x153   :  { %v3248_v0 = vpop.f32.mrf.mxu1  ;;  %3292 = vmatpush3.msra.mxu0 %v252_v60 }
 0x154   :  { %v393_v1 = vpop.f32.mrf.mxu0  ;;  %3293 = vmatprep.subr.mxu0 %v251_v62 }
 0x155   :  { %v486_v2 = vpop.f32.mrf.mxu1  ;;  %3269 = vmatprep.mubr.msk.f32.mxu0 %vm515_vm15, %v393_v1  ;;  %3294 = vmatpush3.msra.mxu0 %v251_v62 }
 0x156   :  { %3270 = vmatmul.mubr.msk.f32.gmra.mxu0 %vm515_vm15, %v3241_v63 }
 0x157   :  { %v3251_v3 = vpop.f32.mrf.mxu1  ;;  %3295 = vmatprep.mubr.msk.f32.mxu0 %vm515_vm15, %v486_v2 }
 0x159   :  { %v496_v4 = vpop.f32.mrf.mxu1 }
 0x15a   :  { %3296 = vmatmul.mubr.msk.f32.vlgmr.msra.gmra.mxu0 %vm515_vm15, %v3248_v0 }
 0x15b   :  { %v3254_v7 = vpop.f32.mrf.mxu1  ;;  %3298 = vmatprep.mubr.msk.f32.mxu0 %vm515_vm15, %v496_v4 }
 0x15d   :  { %v506_v8 = vpop.f32.mrf.mxu1 }
 0x15e   :  { %3299 = vmatmul.mubr.msk.f32.gmra.mxu0 %vm515_vm15, %v3251_v3 }
 0x15f   :  { %3301 = vmatprep.mubr.msk.f32.mxu0 %vm515_vm15, %v506_v8  ;;  %v3280_v9 = vpop.f32.mrf.mxu1 }
 0x161   :  { %v718_v12 = vpop.f32.mrf.mxu1 }
 0x162   :  { %3302 = vmatmul.mubr.msk.f32.gmra.mxu0 %vm515_vm15, %v3254_v7 }
 0x163   :  { %v3283_v14 = vpop.f32.mrf.mxu1 }
 0x165   :  { %v728_v18 = vpop.f32.mrf.mxu1 }
 0x167   :  { %v3286_v29 = vpop.f32.mrf.mxu1 }
 0x169   :  { %v738_v41 = vpop.f32.mrf.mxu1 }
 0x20e   :  { %v3265_v10 = vpop.f32.mrf.mxu0 }
 0x20f   :  { %v724_v20 = vadd.f32 %v3280_v9, %v3265_v10 }
 0x210   :  { %v600_v11 = vpop.f32.mrf.mxu0 }
 0x211   :  { %v719_v27 = vadd.f32 %v718_v12, %v600_v11 }
 0x212   :  { %v3268_v13 = vpop.f32.mrf.mxu0 }
 0x213   :  { %v734_v33 = vadd.f32 %v3283_v14, %v3268_v13 }
 0x214   :  { %v610_v15 = vpop.f32.mrf.mxu0 }
 0x215   :  { %v729_v38 = vadd.f32 %v728_v18, %v610_v15 }
 0x216   :  { %v3271_v16 = vpop.f32.mrf.mxu0 }
 0x217   :  { %v744_v43 = vadd.f32 %v3286_v29, %v3271_v16 }
 0x218   :  { %v620_v19 = vpop.f32.mrf.mxu0 }
 0x219   :  { %v739_v47 = vadd.f32 %v738_v41, %v620_v19 }
 0x21a   :  { %v3297_v24 = vpop.f32.mrf.mxu0 }
 0x21b   :  { %v861_v28 = vadd.f32 %v3297_v24, %v724_v20 }
 0x21c   :  { %v831_v32 = vpop.f32.mrf.mxu0 }
 0x21d   :  { %v3802_v35 = vadd.f32 %v2984_v23, %v861_v28  ;;  %v860_v36 = vadd.f32 %v831_v32, %v719_v27 }
 0x21e   :  { %v3300_v37 = vpop.f32.mrf.mxu0 }
 0x21f   :  { %v3804_v39 = vadd.f32 %v2984_v23, %v860_v36  ;;  %v863_v40 = vadd.f32 %v3300_v37, %v734_v33  ;;  %995 = vrot.lane.b32.xlu1 %v3802_v35, %s3633_s4 }
 0x220   :  { %v841_v42 = vpop.f32.mrf.mxu0 }
 0x221   :  { %v3808_v44 = vadd.f32 %v2984_v23, %v863_v40  ;;  %v862_v45 = vadd.f32 %v841_v42, %v729_v38  ;;  %993 = vrot.lane.b32.xlu0 %v3804_v39, %s3633_s4 }
 0x222   :  { %v3303_v46 = vpop.f32.mrf.mxu0 }
 0x223   :  { %v3812_v48 = vadd.f32 %v2984_v23, %v862_v45  ;;  %v865_v53 = vadd.f32 %v3303_v46, %v744_v43  ;;  %999 = vrot.lane.b32.xlu1 %v3808_v44, %s3633_s4 }
 0x224   :  { %v851_v56 = vpop.f32.mrf.mxu0 }
 0x225   :  { %v3816_v57 = vadd.f32 %v2984_v23, %v865_v53  ;;  %v864_v58 = vadd.f32 %v851_v56, %v739_v47  ;;  %997 = vrot.lane.b32.xlu0 %v3812_v48, %s3633_s4 }
 0x227   :  { %v3820_v59 = vadd.f32 %v2984_v23, %v864_v58  ;;  %1003 = vrot.lane.b32.xlu1 %v3816_v57, %s3633_s4 }
 0x229   :  { %1001 = vrot.lane.b32.xlu0 %v3820_v59, %s3633_s4 }
 0x291   :  { %v996_v60 = vpop.permute.xlu1 %995 }
 0x292   :  { %v1014_v61 = vsel %vm515_vm15, %v996_v60, 0.0 }
 0x293   :  { %v994_v62 = vpop.permute.xlu0 %993  ;;  %1015 = vadd.xlane.f32.xlu1 %v1014_v61 }
 0x294   :  { %v1011_v63 = vsel %vm515_vm15, %v994_v62, 0.0 }
 0x295   :  { %1012 = vadd.xlane.f32.xlu0 %v1011_v63  ;;  %v1000_v0 = vpop.permute.xlu1 %999 }
 0x296   :  { %v1020_v4 = vsel %vm515_vm15, %v1000_v0, 0.0 }
 0x297   :  { %v998_v1 = vpop.permute.xlu0 %997 }
 0x298   :  { %v1017_v2 = vsel %vm515_vm15, %v998_v1, 0.0 }
 0x299   :  { %1018 = vadd.xlane.f32.xlu0 %v1017_v2  ;;  %v1004_v8 = vpop.permute.xlu1 %1003  ;;  %v266_v2 = vld [vmem:[%s3877_s8 + $0x18] sm:$0xff] }
 0x29a   :  { %v1026_v9 = vsel %vm515_vm15, %v1004_v8, 0.0  ;;  %3321 = vmatprep.subr.mxu0 %v266_v2 }
 0x29b   :  { %v1002_v3 = vpop.permute.xlu0 %1001  ;;  %3322 = vmatpush3.msra.mxu0 %v266_v2 }
 0x29c   :  { %v1023_v7 = vsel %vm515_vm15, %v1002_v3, 0.0  ;;  %v265_v3 = vld [vmem:[%s3877_s8 + $0x10] sm:$0xff] }
 0x29d   :  { %1021 = vadd.xlane.f32.xlu0 %v1020_v4  ;;  %1024 = vadd.xlane.f32.xlu1 %v1023_v7  ;;  %v264_v4 = vld [vmem:[%s3877_s8 + $0x8] sm:$0xff] }
 0x29e   :  { %3323 = vmatprep.subr.mxu0 %v265_v3 }
 0x29f   :  { %3324 = vmatpush3.msra.mxu0 %v265_v3 }
 0x2a0   :  { %3325 = vmatprep.subr.mxu0 %v264_v4 }
 0x2a1   :  { %1027 = vadd.xlane.f32.xlu0 %v1026_v9  ;;  %3326 = vmatpush3.msra.mxu0 %v264_v4 }
 0x31c   :  { %v1016_v10 = vpop.xlane.xlu1 %1015 }
 0x31d   :  { %v1030_v11 = vmul.f32 0.03125, %v1016_v10 }
 0x31e   :  { %v1013_v12 = vpop.xlane.xlu0 %1012 }
 0x31f   :  { %v3833_v13 = vsub.f32 %v3802_v35, %v1030_v11  ;;  %v1029_v14 = vmul.f32 0.03125, %v1013_v12 }
 0x321   :  { %v3836_v15 = vsub.f32 %v3804_v39, %v1029_v14  ;;  %v1042_v16 = vmul.f32 %v3833_v13, %v3833_v13 }
 0x322   :  { %v1019_v18 = vpop.xlane.xlu0 %1018 }
 0x323   :  { %v1031_v19 = vmul.f32 0.03125, %v1019_v18  ;;  %1055 = vrot.lane.b32.xlu0 %v1042_v16, %s3633_s4  ;;  %v1041_v20 = vmul.f32 %v3836_v15, %v3836_v15 }
 0x325   :  { %v3844_v23 = vsub.f32 %v3812_v48, %v1031_v19  ;;  %1053 = vrot.lane.b32.xlu1 %v1041_v20, %s3633_s4 }
 0x326   :  { %v1025_v24 = vpop.xlane.xlu1 %1024  ;;  %v1022_v27 = vpop.xlane.xlu0 %1021 }
 0x327   :  { %v1033_v28 = vmul.f32 0.03125, %v1025_v24  ;;  %v1032_v29 = vmul.f32 0.03125, %v1022_v27  ;;  %v1043_v32 = vmul.f32 %v3844_v23, %v3844_v23 }
 0x329   :  { %v3850_v33 = vsub.f32 %v3820_v59, %v1033_v28  ;;  %v3853_v36 = vsub.f32 %v3808_v44, %v1032_v29  ;;  %1057 = vrot.lane.b32.xlu1 %v1043_v32, %s3633_s4  ;;  %v263_v32 = vld [vmem:[%s3877_s8] sm:$0xff]  ;;  %s3642_s8 = smov 24  }
 0x32a   :  { %v1028_v37 = vpop.xlane.xlu0 %1027  ;;  %3327 = vmatprep.subr.mxu0 %v263_v32  ;;  %s2929_s12 = sld [smem:[%s4314_s0 + %s3642_s8]]  }
 0x32b   :  { %v1034_v38 = vmul.f32 0.03125, %v1028_v37  ;;  %v1045_v40 = vmul.f32 %v3850_v33, %v3850_v33  ;;  %v1044_v41 = vmul.f32 %v3853_v36, %v3853_v36  ;;  %3328 = vmatpush3.msra.mxu0 %v263_v32  ;;  %v890_v32 = vsel %vm515_vm15, %v3820_v59, 0.0  ;;  %s2934_s8 = sld [smem:[%s4314_s0 + %s3656_s5]]  }
 0x32d   :  { %v3861_v42 = vsub.f32 %v3816_v57, %v1034_v38  ;;  %1061 = vrot.lane.b32.xlu0 %v1045_v40, %s3633_s4  ;;  %1059 = vrot.lane.b32.xlu1 %v1044_v41, %s3633_s4 }
 0x32f   :  { %v1046_v43 = vmul.f32 %v3861_v42, %v3861_v42 }
 0x331   :  { %1063 = vrot.lane.b32.xlu1 %v1046_v43, %s3633_s4  ;;  %v3889_v43 = vld [vmem:[%s2916_s13] ss:$0 sm:$0xff]  ;;  %s3643_s13 = smov 19  }
 0x332   :  { %s2924_s16 = sld [smem:[%s4314_s0 + %s3643_s13]]  }
 0x333   :  { %s2936_s13 = sld [smem:[%s4314_s0 + %s3657_s10]]  }
 0x395   :  { %v1056_v45 = vpop.permute.xlu0 %1055 }
 0x396   :  { %v1074_v46 = vsel %vm515_vm15, %v1056_v45, 0.0 }
 0x397   :  { %v1054_v47 = vpop.permute.xlu1 %1053  ;;  %1075 = vadd.xlane.f32.xlu1 %v1074_v46 }
 0x398   :  { %v1071_v53 = vsel %vm515_vm15, %v1054_v47, 0.0  ;;  %v3897_v47 = vld [vmem:[%s2917_s17] ss:$0 sm:$0xff]  ;;  %s3644_s17 = smov 20  }
 0x399   :  { %1072 = vadd.xlane.f32.xlu0 %v1071_v53  ;;  %s2925_s20 = sld [smem:[%s4314_s0 + %s3644_s17]]  }
 0x39a   :  { %s2937_s17 = sld [smem:[%s4314_s0 + %s3658_s14]]  }
 0x39b   :  { %v1058_v56 = vpop.permute.xlu1 %1057 }
 0x39c   :  { %v1077_v58 = vsel %vm515_vm15, %v1058_v56, 0.0 }
 0x39d   :  { %1078 = vadd.xlane.f32.xlu0 %v1077_v58 }
 0x39f   :  { %v1060_v60 = vpop.permute.xlu1 %1059  ;;  %v1062_v61 = vpop.permute.xlu0 %1061 }
 0x3a0   :  { %v1080_v62 = vsel %vm515_vm15, %v1060_v60, 0.0  ;;  %v1083_v63 = vsel %vm515_vm15, %v1062_v61, 0.0 }
 0x3a1   :  { %1081 = vadd.xlane.f32.xlu0 %v1080_v62  ;;  %1084 = vadd.xlane.f32.xlu1 %v1083_v63  ;;  %v271_v62 = vld [vmem:[%s3894_s21 + $0x18] sm:$0xff] }
 0x3a2   :  { %3353 = vmatprep.subr.mxu0 %v271_v62 }
 0x3a3   :  { %v1064_v0 = vpop.permute.xlu1 %1063 }
 0x3a4   :  { %v1086_v1 = vsel %vm515_vm15, %v1064_v0, 0.0 }
 0x3a5   :  { %1087 = vadd.xlane.f32.xlu0 %v1086_v1 }
 0x420   :  { %v1076_v7 = vpop.xlane.xlu1 %1075 }
 0x421   :  { %v1090_v8 = vmul.f32 0.03125, %v1076_v7 }
 0x422   :  { %v1073_v9 = vpop.xlane.xlu0 %1072 }
 0x423   :  { %v1096_v10 = vadd.f32 1e-05, %v1090_v8  ;;  %v1089_v11 = vmul.f32 0.03125, %v1073_v9 }
 0x425   :  { %3542 = vrsqrt.f32 %v1096_v10  ;;  %v1095_v12 = vadd.f32 1e-05, %v1089_v11 }
 0x426   :  { %v1079_v14 = vpop.xlane.xlu0 %1078 }
 0x427   :  { %3544 = vrsqrt.f32 %v1095_v12  ;;  %v1091_v16 = vmul.f32 0.03125, %v1079_v14 }
 0x429   :  { %v1097_v18 = vadd.f32 1e-05, %v1091_v16 }
 0x42a   :  { %v1085_v19 = vpop.xlane.xlu1 %1084  ;;  %v1082_v20 = vpop.xlane.xlu0 %1081 }
 0x42b   :  { %3546 = vrsqrt.f32 %v1097_v18  ;;  %v1093_v24 = vmul.f32 0.03125, %v1085_v19  ;;  %v1092_v27 = vmul.f32 0.03125, %v1082_v20 }
 0x42d   :  { %v1099_v28 = vadd.f32 1e-05, %v1093_v24  ;;  %v1098_v29 = vadd.f32 1e-05, %v1092_v27  ;;  %v878_v24 = vsel %vm515_vm15, %v3804_v39, 0.0  ;;  %v887_v27 = vsel %vm515_vm15, %v3808_v44, 0.0 }
 0x42e   :  { %v1088_v37 = vpop.xlane.xlu0 %1087 }
 0x42f   :  { %3548 = vrsqrt.f32 %v1099_v28  ;;  %v1094_v38 = vmul.f32 0.03125, %v1088_v37  ;;  %v881_v28 = vsel %vm515_vm15, %v3802_v35, 0.0 }
 0x430   :  { %3550 = vrsqrt.f32 %v1098_v29  ;;  %v893_v29 = vsel %vm515_vm15, %v3816_v57, 0.0 }
 0x431   :  { %v1100_v40 = vadd.f32 1e-05, %v1094_v38 }
 0x432   :  { %v3543_v41 = vpop.eup %3542 }
 0x433   :  { %3552 = vrsqrt.f32 %v1100_v40  ;;  %v1108_v45 = vmul.f32 %v3543_v41, %v3833_v13  ;;  %v270_v40 = vld [vmem:[%s3894_s21 + $0x10] sm:$0xff]  ;;  %v269_v41 = vld [vmem:[%s3894_s21 + $0x8] sm:$0xff] }
 0x434   :  { %v3545_v46 = vpop.eup %3544 }
 0x435   :  { %v1114_v53 = vmul.f32 %v3889_v43, %v1108_v45  ;;  %v1107_v56 = vmul.f32 %v3545_v46, %v3836_v15  ;;  %v268_v46 = vld [vmem:[%s3894_s21] sm:$0xff]  ;;  %s3645_s21 = smov 5  }
 0x436   :  { %s2910_s24 = sld [smem:[%s4314_s0 + %s3645_s21]]  }
 0x437   :  { %v1120_v58 = vadd.f32 %v3897_v47, %v1114_v53  ;;  %v1113_v60 = vmul.f32 %v3889_v43, %v1107_v56 }
 0x438   :  { %v3547_v61 = vpop.eup %3546 }
 0x439   :  { %v1126_v63 = vmax.f32 %v1120_v58, 0.0  ;;  %v1119_v0 = vadd.f32 %v3897_v47, %v1113_v60  ;;  %v1109_v1 = vmul.f32 %v3547_v61, %v3844_v23 }
 0x43b   :  { %1264 = vrot.lane.b32.xlu0 %v1126_v63, %s3633_s4  ;;  %v1125_v13 = vmax.f32 %v1119_v0, 0.0  ;;  %v1115_v2 = vmul.f32 %v3889_v43, %v1109_v1 }
 0x43c   :  { %v3549_v3 = vpop.eup %3548 }
 0x43d   :  { %v3551_v4 = vpop.eup %3550  ;;  %1262 = vrot.lane.b32.xlu1 %v1125_v13, %s3633_s4  ;;  %v1121_v15 = vadd.f32 %v3897_v47, %v1115_v2  ;;  %v1111_v7 = vmul.f32 %v3549_v3, %v3850_v33 }
 0x43e   :  { %v1110_v8 = vmul.f32 %v3551_v4, %v3853_v36 }
 0x43f   :  { %v1127_v9 = vmax.f32 %v1121_v15, 0.0  ;;  %v1117_v10 = vmul.f32 %v3889_v43, %v1111_v7  ;;  %v3015_v7 = vld [vmem:[%s2923_s25] ss:$0 sm:$0xff]  ;;  %s3646_s25 = smov 22  }
 0x440   :  { %v3553_v23 = vpop.eup %3552  ;;  %v1116_v11 = vmul.f32 %v3889_v43, %v1110_v8  ;;  %s2927_s28 = sld [smem:[%s4314_s0 + %s3646_s25]]  }
 0x441   :  { %1266 = vrot.lane.b32.xlu1 %v1127_v9, %s3633_s4  ;;  %v1123_v12 = vadd.f32 %v3897_v47, %v1117_v10  ;;  %v1112_v14 = vmul.f32 %v3553_v23, %v3861_v42  ;;  %v884_v42 = vsel %vm515_vm15, %v3812_v48, 0.0 }
 0x442   :  { %v1122_v16 = vadd.f32 %v3897_v47, %v1116_v11 }
 0x443   :  { %v1129_v18 = vmax.f32 %v1123_v12, 0.0  ;;  %v1118_v19 = vmul.f32 %v3889_v43, %v1112_v14 }
 0x444   :  { %v1128_v33 = vmax.f32 %v1122_v16, 0.0 }
 0x445   :  { %1270 = vrot.lane.b32.xlu0 %v1129_v18, %s3633_s4  ;;  %v1124_v36 = vadd.f32 %v3897_v47, %v1118_v19 }
 0x446   :  { %1268 = vrot.lane.b32.xlu1 %v1128_v33, %s3633_s4 }
 0x447   :  { %v1130_v20 = vmax.f32 %v1124_v36, 0.0 }
 0x44a   :  { %1272 = vrot.lane.b32.xlu1 %v1130_v20, %s3633_s4  ;;  %s3641_s4 = smov 21  }
 0x44b   :  { %s4035_s7 = sld [smem:[%s4314_s0 + %s3641_s4]]  }
 0x44c   :  { %s2933_s4 = sld [smem:[%s4314_s0 + %s3655_s1]]  }
 0x464   :  { %879 = vadd.xlane.f32.xlu0 %v878_v24 }
 0x468   :  { %885 = vadd.xlane.f32.xlu0 %v884_v42 }
 0x46c   :  { %888 = vadd.xlane.f32.xlu0 %v887_v27 }
 0x46e   :  { %882 = vadd.xlane.f32.xlu1 %v881_v28 }
 0x470   :  { %894 = vadd.xlane.f32.xlu0 %v893_v29 }
 0x472   :  { %891 = vadd.xlane.f32.xlu1 %v890_v32 }
 0x4ad   :  { %v1265_v38 = vpop.permute.xlu0 %1264 }
 0x4af   :  { %v1263_v37 = vpop.permute.xlu1 %1262 }
 0x4b0   :  { %3329 = vmatprep.mubr.msk.f32.mxu0 %vm515_vm15, %v1263_v37 }
 0x4b1   :  { %3330 = vmatmul.mubr.msk.f32.vlgmr.msra.gmra.mxu0 %vm515_vm15, %v1265_v38 }
 0x4b2   :  { %3354 = vmatpush3.msra.mxu0 %v271_v62 }
 0x4b3   :  { %v1267_v45 = vpop.permute.xlu1 %1266  ;;  %3355 = vmatprep.subr.mxu0 %v270_v40 }
 0x4b4   :  { %3332 = vmatprep.mubr.msk.f32.mxu0 %vm515_vm15, %v1267_v45  ;;  %3356 = vmatpush3.msra.mxu0 %v270_v40  ;;  %v261_v45 = vld [vmem:[%s2918_s29 + $0x18] sm:$0xff] }
 0x4b5   :  { %3357 = vmatprep.subr.mxu0 %v269_v41  ;;  %3304 = vmatprep.subr.mxu1 %v261_v45 }
 0x4b6   :  { %3358 = vmatpush3.msra.mxu0 %v269_v41  ;;  %3305 = vmatpush3.msra.mxu1 %v261_v45 }
 0x4b7   :  { %v1271_v53 = vpop.permute.xlu0 %1270  ;;  %3359 = vmatprep.subr.mxu0 %v268_v46 }
 0x4b8   :  { %v1269_v56 = vpop.permute.xlu1 %1268  ;;  %3360 = vmatpush3.msra.mxu0 %v268_v46  ;;  %v260_v46 = vld [vmem:[%s2918_s29 + $0x10] sm:$0xff] }
 0x4b9   :  { %3333 = vmatmul.mubr.msk.f32.gmra.mxu0 %vm515_vm15, %v1269_v56  ;;  %3306 = vmatprep.subr.mxu1 %v260_v46  ;;  %v258_v56 = vld [vmem:[%s2918_s29] sm:$0xff] }
 0x4ba   :  { %3335 = vmatprep.mubr.msk.f32.mxu0 %vm515_vm15, %v1271_v53  ;;  %v259_v53 = vld [vmem:[%s2918_s29 + $0x8] sm:$0xff]  ;;  %3307 = vmatpush3.msra.mxu1 %v260_v46  ;;  %s3647_s29 = smov 14  }
 0x4bb   :  { %3308 = vmatprep.subr.mxu1 %v259_v53  ;;  %s2919_s2 = sld [smem:[%s4314_s0 + %s3647_s29]]  }
 0x4bc   :  { %v1273_v58 = vpop.permute.xlu1 %1272  ;;  %3309 = vmatpush3.msra.mxu1 %v259_v53  ;;  %v282_v53 = vld [vmem:[%s4019_s3 + $0x10] sm:$0xf] }
 0x4bd   :  { %3336 = vmatmul.mubr.msk.f32.gmra.mxu0 %vm515_vm15, %v1273_v58  ;;  %3310 = vmatprep.subr.mxu1 %v258_v56 }
 0x4be   :  { %3361 = vmatprep.mubr.msk.f32.mxu0 %vm515_vm15, %v3679_v6  ;;  %3311 = vmatpush3.msra.mxu1 %v258_v56 }
 0x4bf   :  { %3338 = vmatprep.subr.msk.mxu1 %vm648_vm0, %v282_v53 }
 0x4c1   :  { %3362 = vmatmul.mubr.msk.f32.vlgmr.msra.gmra.mxu0 %vm515_vm15, %v3676_v5 }
 0x4c2   :  { %3379 = vmatprep.mubr.msk.f32.mxu0 %vm288_vm1, %v3704_v22 }
 0x4ed   :  { %v880_v60 = vpop.xlane.xlu0 %879 }
 0x4ee   :  { %v897_v3 = vmul.f32 0.03125, %v880_v60 }
 0x4f0   :  { %v3969_v23 = vsub.f32 %v3804_v39, %v897_v3 }
 0x4f1   :  { %v886_v62 = vpop.xlane.xlu0 %885 }
 0x4f2   :  { %v899_v11 = vmul.f32 0.03125, %v886_v62 }
 0x4f4   :  { %v3978_v20 = vsub.f32 %v3812_v48, %v899_v11 }
 0x4f5   :  { %v889_v6 = vpop.xlane.xlu0 %888 }
 0x4f6   :  { %v900_v4 = vmul.f32 0.03125, %v889_v6  ;;  %v911_v32 = vmul.f32 %v3978_v20, %v3978_v20 }
 0x4f7   :  { %v883_v0 = vpop.xlane.xlu1 %882 }
 0x4f8   :  { %v898_v5 = vmul.f32 0.03125, %v883_v0  ;;  %v3972_v14 = vsub.f32 %v3808_v44, %v900_v4  ;;  %v909_v44 = vmul.f32 %v3969_v23, %v3969_v23  ;;  %v921_v38 = vsel %vm515_vm15, %v911_v32, 0.0 }
 0x4f9   :  { %v895_v9 = vpop.xlane.xlu0 %894 }
 0x4fa   :  { %v3966_v8 = vsub.f32 %v3802_v35, %v898_v5  ;;  %v902_v19 = vmul.f32 0.03125, %v895_v9  ;;  %v912_v28 = vmul.f32 %v3972_v14, %v3972_v14  ;;  %v915_v48 = vsel %vm515_vm15, %v909_v44, 0.0 }
 0x4fb   :  { %v892_v16 = vpop.xlane.xlu1 %891 }
 0x4fc   :  { %v910_v35 = vmul.f32 %v3966_v8, %v3966_v8  ;;  %v901_v39 = vmul.f32 0.03125, %v892_v16  ;;  %v3984_v42 = vsub.f32 %v3816_v57, %v902_v19  ;;  %v924_v37 = vsel %vm515_vm15, %v912_v28, 0.0 }
 0x4fe   :  { %v918_v27 = vsel %vm515_vm15, %v910_v35, 0.0  ;;  %v3990_v29 = vsub.f32 %v3820_v59, %v901_v39  ;;  %v914_v57 = vmul.f32 %v3984_v42, %v3984_v42 }
 0x500   :  { %v913_v40 = vmul.f32 %v3990_v29, %v3990_v29  ;;  %v930_v59 = vsel %vm515_vm15, %v914_v57, 0.0 }
 0x502   :  { %v927_v41 = vsel %vm515_vm15, %v913_v40, 0.0 }
 0x571   :  { %v3950_v61 = vpop.f32.mrf.mxu0 }
 0x573   :  { %v3952_v63 = vpop.f32.mrf.mxu0 }
 0x579   :  { %v3957_v1 = vpop.f32.mrf.mxu0 }
 0x57b   :  { %v3959_v13 = vpop.f32.mrf.mxu0 }
 0x57d   :  { %v3961_v2 = vpop.f32.mrf.mxu0 }
 0x57f   :  { %v3963_v15 = vpop.f32.mrf.mxu0 }
 0x581   :  { %v3363_v10 = vpop.f32.mrf.mxu0 }
 0x582   :  { %v1641_v12 = vadd.f32 %v3363_v10, %v3015_v7 }
 0x583   :  { %v1635_v18 = vpop.f32.mrf.mxu0 }
 0x584   :  { %v1636_v33 = vadd.f32 %v3015_v7, %v1635_v18  ;;  %v1647_v36 = vsel %vm515_vm15, %v1641_v12, 0.0 }
 0x585   :  { %1648 = vadd.xlane.f32.xlu0 %v1647_v36 }
 0x586   :  { %v1644_v24 = vsel %vm515_vm15, %v1636_v33, 0.0 }
 0x587   :  { %1645 = vadd.xlane.f32.xlu1 %v1644_v24 }
 0x589   :  { %919 = vadd.xlane.f32.xlu0 %v918_v27 }
 0x58b   :  { %916 = vadd.xlane.f32.xlu1 %v915_v48 }
 0x58d   :  { %925 = vadd.xlane.f32.xlu0 %v924_v37 }
 0x58f   :  { %922 = vadd.xlane.f32.xlu1 %v921_v38 }
 0x591   :  { %931 = vadd.xlane.f32.xlu0 %v930_v59 }
 0x593   :  { %928 = vadd.xlane.f32.xlu1 %v927_v41 }
 0x60e   :  { %v1649_v58 = vpop.xlane.xlu0 %1648 }
 0x60f   :  { %v1651_v60 = vmul.f32 0.03125, %v1649_v58 }
 0x610   :  { %v1646_v62 = vpop.xlane.xlu1 %1645 }
 0x611   :  { %v4006_v0 = vsub.f32 %v1641_v12, %v1651_v60  ;;  %v1650_v6 = vmul.f32 0.03125, %v1646_v62 }
 0x612   :  { %v920_v5 = vpop.xlane.xlu0 %919 }
 0x613   :  { %v4008_v3 = vsub.f32 %v1636_v33, %v1650_v6  ;;  %v934_v4 = vmul.f32 0.03125, %v920_v5  ;;  %v1655_v7 = vmul.f32 %v4006_v0, %v4006_v0 }
 0x614   :  { %v917_v9 = vpop.xlane.xlu1 %916 }
 0x615   :  { %v940_v10 = vadd.f32 1e-05, %v934_v4  ;;  %v933_v11 = vmul.f32 0.03125, %v917_v9  ;;  %v1659_v16 = vsel %vm515_vm15, %v1655_v7, 0.0  ;;  %v1654_v18 = vmul.f32 %v4008_v3, %v4008_v3 }
 0x616   :  { %1660 = vadd.xlane.f32.xlu0 %v1659_v16  ;;  %v926_v19 = vpop.xlane.xlu0 %925 }
 0x617   :  { %3554 = vrsqrt.f32 %v940_v10  ;;  %v939_v12 = vadd.f32 1e-05, %v933_v11  ;;  %v936_v36 = vmul.f32 0.03125, %v926_v19  ;;  %v1656_v33 = vsel %vm515_vm15, %v1654_v18, 0.0  ;;  %v281_v19 = vld [vmem:[%s4019_s3 + $0x8] sm:$0xff] }
 0x618   :  { %1657 = vadd.xlane.f32.xlu1 %v1656_v33  ;;  %v923_v35 = vpop.xlane.xlu1 %922 }
 0x619   :  { %3556 = vrsqrt.f32 %v939_v12  ;;  %v942_v39 = vadd.f32 1e-05, %v936_v36  ;;  %v935_v24 = vmul.f32 0.03125, %v923_v35 }
 0x61a   :  { %v932_v44 = vpop.xlane.xlu0 %931 }
 0x61b   :  { %3558 = vrsqrt.f32 %v942_v39  ;;  %v941_v27 = vadd.f32 1e-05, %v935_v24  ;;  %v938_v28 = vmul.f32 0.03125, %v932_v44  ;;  %v278_v39 = vld [vmem:[%s4035_s7 + $0x18] sm:$0xff]  ;;  %v277_v44 = vld [vmem:[%s4035_s7 + $0x10] sm:$0xff] }
 0x61c   :  { %v929_v48 = vpop.xlane.xlu1 %928 }
 0x61d   :  { %3560 = vrsqrt.f32 %v941_v27  ;;  %v944_v32 = vadd.f32 1e-05, %v938_v28  ;;  %v937_v37 = vmul.f32 0.03125, %v929_v48  ;;  %v275_v27 = vld [vmem:[%s4035_s7] sm:$0xff] }
 0x61f   :  { %3562 = vrsqrt.f32 %v944_v32  ;;  %v943_v57 = vadd.f32 1e-05, %v937_v37  ;;  %v3018_v32 = vld [vmem:[%s2924_s16] ss:$0 sm:$0xff]  ;;  %s3651_s16 = smov 16  }
 0x620   :  { %s2921_s19 = sld [smem:[%s4314_s0 + %s3651_s16]]  }
 0x621   :  { %3564 = vrsqrt.f32 %v943_v57 }
 0x624   :  { %v3555_v38 = vpop.eup %3554 }
 0x625   :  { %v952_v40 = vmul.f32 %v3555_v38, %v3966_v8  ;;  %v3019_v38 = vld [vmem:[%s2925_s20] ss:$0 sm:$0xff]  ;;  %s3652_s20 = smov 25  }
 0x626   :  { %v3557_v59 = vpop.eup %3556  ;;  %s4267_s23 = sld [smem:[%s4314_s0 + %s3652_s20]]  }
 0x627   :  { %v964_v41 = vmul.f32 %v3889_v43, %v952_v40  ;;  %v951_v45 = vmul.f32 %v3557_v59, %v3969_v23 }
 0x628   :  { %v3559_v46 = vpop.eup %3558 }
 0x629   :  { %v963_v56 = vmul.f32 %v3889_v43, %v951_v45  ;;  %v954_v58 = vmul.f32 %v3559_v46, %v3972_v14  ;;  %v976_v62 = vadd.f32 %v3897_v47, %v964_v41 }
 0x62a   :  { %v3561_v60 = vpop.eup %3560 }
 0x62b   :  { %v975_v6 = vadd.f32 %v3897_v47, %v963_v56  ;;  %v953_v8 = vmul.f32 %v3561_v60, %v3978_v20  ;;  %v966_v5 = vmul.f32 %v3889_v43, %v954_v58  ;;  %v982_v10 = vmax.f32 %v976_v62, 0.0 }
 0x62c   :  { %v3563_v23 = vpop.eup %3562 }
 0x62d   :  { %v981_v14 = vmax.f32 %v975_v6, 0.0  ;;  %v965_v4 = vmul.f32 %v3889_v43, %v953_v8  ;;  %v956_v7 = vmul.f32 %v3563_v23, %v3984_v42  ;;  %v978_v11 = vadd.f32 %v3897_v47, %v966_v5  ;;  %v280_v42 = vld [vmem:[%s4019_s3] sm:$0xff]  ;;  %s3648_s3 = smov 2  }
 0x62e   :  { %v3565_v9 = vpop.eup %3564  ;;  %s2907_s6 = sld [smem:[%s4314_s0 + %s3648_s3]]  }
 0x62f   :  { %3312 = vmatprep.mubr.msk.f32.mxu1 %vm515_vm15, %v981_v14  ;;  %v977_v20 = vadd.f32 %v3897_v47, %v965_v4  ;;  %v955_v16 = vmul.f32 %v3565_v9, %v3990_v29  ;;  %v968_v18 = vmul.f32 %v3889_v43, %v956_v7  ;;  %v984_v33 = vmax.f32 %v978_v11, 0.0 }
 0x630   :  { %3313 = vmatmul.mubr.msk.f32.vlgmr.msra.gmra.mxu1 %vm515_vm15, %v982_v10 }
 0x631   :  { %v983_v12 = vmax.f32 %v977_v20, 0.0  ;;  %v967_v36 = vmul.f32 %v3889_v43, %v955_v16  ;;  %3339 = vmatpush3.msk.msra.mxu1 %vm648_vm0, %v282_v53  ;;  %v980_v35 = vadd.f32 %v3897_v47, %v968_v18  ;;  %v287_v16 = vld [vmem:[%s2910_s24 + $0x18] sm:$0xff] }
 0x632   :  { %3340 = vmatprep.subr.mxu1 %v281_v19 }
 0x633   :  { %3315 = vmatprep.mubr.msk.f32.mxu1 %vm515_vm15, %v983_v12  ;;  %v979_v29 = vadd.f32 %v3897_v47, %v967_v36  ;;  %3341 = vmatpush3.msra.mxu1 %v281_v19  ;;  %v986_v24 = vmax.f32 %v980_v35, 0.0  ;;  %v276_v47 = vld [vmem:[%s4035_s7 + $0x8] sm:$0xff]  ;;  %v3020_v19 = vld [vmem:[%s2927_s28] ss:$0 sm:$0xff]  ;;  %v286_v35 = vld [vmem:[%s2910_s24 + $0x10] sm:$0xff]  ;;  %s3649_s7 = smov 6  }
 0x634   :  { %3316 = vmatmul.mubr.msk.f32.gmra.mxu1 %vm515_vm15, %v984_v33  ;;  %3342 = vmatprep.subr.mxu1 %v280_v42  ;;  %s2911_s11 = sld [smem:[%s4314_s0 + %s3649_s7]]  }
 0x635   :  { %v985_v43 = vmax.f32 %v979_v29, 0.0  ;;  %3343 = vmatpush3.msra.mxu1 %v280_v42  ;;  %v285_v29 = vld [vmem:[%s2910_s24 + $0x8] sm:$0xff] }
 0x636   :  { %3364 = vmatprep.subr.mxu1 %v278_v39 }
 0x637   :  { %3318 = vmatprep.mubr.msk.f32.mxu1 %vm515_vm15, %v985_v43  ;;  %v2987_v43 = vld [vmem:[%s2919_s2] ss:$0 sm:$0xff] }
 0x638   :  { %3319 = vmatmul.mubr.msk.f32.gmra.mxu1 %vm515_vm15, %v986_v24 }
 0x639   :  { %3344 = vmatprep.mubr.msk.f32.mxu1 %vm629_vm14, %v3759_v49  ;;  %v70_v49 = vstv %s2929_s12  ;;  %s3650_s12 = smov 26  }
 0x63a   :  { %71 = vst [vmem:[#allocation2] sm:$0x1] %v70_v49  ;;  %s4253_s15 = sld [smem:[%s4314_s0 + %s3650_s12]]  }
 0x63c   :  { %3345 = vmatmul.mubr.msk.f32.vlgmr.msra.gmra.mxu1 %vm629_vm14, %v3761_v50 }
 0x63d   :  { %3347 = vmatprep.mubr.msk.f32.mxu1 %vm629_vm14, %v3767_v51  ;;  %3365 = vmatpush3.msra.mxu1 %v278_v39  ;;  %v284_v39 = vld [vmem:[%s2910_s24] sm:$0xff]  ;;  %s3653_s24 = smov 27  }
 0x63e   :  { %3366 = vmatprep.subr.mxu1 %v277_v44  ;;  %s2932_s27 = sld [smem:[%s4314_s0 + %s3653_s24]]  }
 0x63f   :  { %3367 = vmatpush3.msra.mxu1 %v277_v44 }
 0x640   :  { %3348 = vmatmul.mubr.msk.f32.gmra.mxu1 %vm629_vm14, %v3771_v52  ;;  %3368 = vmatprep.subr.mxu1 %v276_v47 }
 0x641   :  { %3350 = vmatprep.mubr.msk.f32.mxu1 %vm629_vm14, %v3776_v54  ;;  %3369 = vmatpush3.msra.mxu1 %v276_v47  ;;  %v4086_v5 = vld [vmem:[#allocation2] ss:$0 sm:$0xff] }
 0x642   :  { %3370 = vmatprep.subr.mxu1 %v275_v27 }
 0x643   :  { %3371 = vmatpush3.msra.mxu1 %v275_v27 }
 0x644   :  { %3351 = vmatmul.mubr.msk.f32.gmra.mxu1 %vm629_vm14, %v3780_v55  ;;  %3388 = vmatprep.subr.mxu1 %v287_v16 }
 0x69f   :  { %v1661_v50 = vpop.xlane.xlu0 %1660 }
 0x6a0   :  { %v1663_v51 = vmul.f32 0.03125, %v1661_v50 }
 0x6a1   :  { %v1658_v52 = vpop.xlane.xlu1 %1657 }
 0x6a2   :  { %v1665_v28 = vadd.f32 1e-05, %v1663_v51  ;;  %v1662_v48 = vmul.f32 0.03125, %v1658_v52 }
 0x6a4   :  { %3566 = vrsqrt.f32 %v1665_v28  ;;  %v1664_v54 = vadd.f32 1e-05, %v1662_v48 }
 0x6a6   :  { %3568 = vrsqrt.f32 %v1664_v54 }
 0x6b1   :  { %v3567_v55 = vpop.eup %3566 }
 0x6b2   :  { %v1669_v37 = vmul.f32 %v3567_v55, %v4006_v0 }
 0x6b3   :  { %v3569_v57 = vpop.eup %3568 }
 0x6b4   :  { %v1668_v40 = vmul.f32 %v3569_v57, %v4008_v3  ;;  %v1677_v59 = vmul.f32 %v3018_v32, %v1669_v37 }
 0x6b6   :  { %v1676_v41 = vmul.f32 %v3018_v32, %v1668_v40  ;;  %v1685_v45 = vadd.f32 %v3019_v38, %v1677_v59 }
 0x6b8   :  { %v1684_v46 = vadd.f32 %v3019_v38, %v1676_v41  ;;  %v1687_v56 = vmax.f32 %v1685_v45, 0.0  ;;  %v158_v41 = vshrl.u32 %v157_v17, 7 }
 0x6ba   :  { %v1686_v53 = vmax.f32 %v1684_v46, 0.0  ;;  %v159_v45 = vadd.s32 8, %v158_v41 }
 0x6bc   :  { %3372 = vmatprep.mubr.msk.f32.mxu1 %vm515_vm15, %v1686_v53  ;;  %v2938_v53 = vld [vmem:[%s2907_s6] ss:$0 sm:$0xff] }
 0x6bd   :  { %3373 = vmatmul.mubr.msk.f32.vlgmr.msra.gmra.mxu1 %vm515_vm15, %v1687_v56  ;;  %vm167_vm2 = vcmp.eq.s32.totalorder %v159_v45, %v2938_v53  ;;  %vm166_vm3 = vcmp.eq.s32.totalorder %v158_v41, %v2938_v53 }
 0x6be   :  { %3389 = vmatpush3.msra.mxu1 %v287_v16 }
 0x6bf   :  { %3390 = vmatprep.subr.mxu1 %v286_v35 }
 0x6c0   :  { %3391 = vmatpush3.msra.mxu1 %v286_v35  ;;  %v2044_v35 = vsub.s32 1, %v158_v41 }
 0x6c1   :  { %3392 = vmatprep.subr.mxu1 %v285_v29 }
 0x6c2   :  { %3393 = vmatpush3.msra.mxu1 %v285_v29 }
 0x6c3   :  { %3394 = vmatprep.subr.mxu1 %v284_v39 }
 0x6c4   :  { %3395 = vmatpush3.msra.mxu1 %v284_v39 }
 0x6f0   :  { %v3314_v58 = vpop.f32.mrf.mxu1 }
 0x6f1   :  { %v1227_v47 = vadd.f32 %v3314_v58, %v2987_v43 }
 0x6f2   :  { %v1221_v60 = vpop.f32.mrf.mxu1 }
 0x6f3   :  { %v1222_v44 = vadd.f32 %v2987_v43, %v1221_v60 }
 0x6f4   :  { %v3317_v62 = vpop.f32.mrf.mxu1 }
 0x6f5   :  { %v1237_v28 = vadd.f32 %v3317_v62, %v2987_v43  ;;  %v4139_v62 = vsel %vm166_vm3, 1.0, %v3629_v21 }
 0x6f6   :  { %v1231_v6 = vpop.f32.mrf.mxu1  ;;  %vm2027_vm6 = vcmp.gt.f32.partialorder %v4139_v62, 0.5 }
 0x6f7   :  { %v1232_v52 = vadd.f32 %v2987_v43, %v1231_v6 }
 0x6f8   :  { %v4084_v8 = vpop.f32.mrf.mxu1 }
 0x6f9   :  { %v1247_v57 = vadd.f32 %v4084_v8, %v2987_v43 }
 0x6fa   :  { %v1241_v0 = vpop.f32.mrf.mxu1 }
 0x6fb   :  { %v1242_v37 = vadd.f32 %v2987_v43, %v1241_v0 }
 0x6fc   :  { %v3346_v3 = vpop.f32.mrf.mxu1 }
 0x6fd   :  { %v4089_v23 = vadd.f32 %v3346_v3, %v4086_v5 }
 0x6fe   :  { %v4091_v14 = vpop.f32.mrf.mxu1 }
 0x6ff   :  { %v1457_v3 = vadd.f32 %v4086_v5, %v4091_v14  ;;  %v3010_v53 = vmul.f32 -1.442695, %v4089_v23 }
 0x700   :  { %v3349_v4 = vpop.f32.mrf.mxu1 }
 0x701   :  { %v4094_v7 = vadd.f32 %v3349_v4, %v4086_v5 }
 0x702   :  { %v1466_v9 = vpop.f32.mrf.mxu1 }
 0x703   :  { %v4097_v10 = vadd.f32 %v4086_v5, %v1466_v9 }
 0x704   :  { %v3352_v11 = vpop.f32.mrf.mxu1 }
 0x705   :  { %v4100_v20 = vadd.f32 %v3352_v11, %v4086_v5  ;;  %v3009_v11 = vmul.f32 -1.442695, %v1457_v3 }
 0x706   :  { %v4108_v18 = vpop.f32.mrf.mxu1 }
 0x707   :  { %3570 = vpow2.f32 %v3009_v11 }
 0x77d   :  { %v3374_v12 = vpop.f32.mrf.mxu1 }
 0x77e   :  { %v1772_v36 = vadd.f32 %v3374_v12, %v3020_v19  ;;  %v3571_v12 = vpop.eup %3570 }
 0x77f   :  { %v1766_v42 = vpop.f32.mrf.mxu1 }
 0x780   :  { %v1767_v33 = vadd.f32 %v3020_v19, %v1766_v42  ;;  %3375 = vmatprep.subr.mxu0 %v1772_v36  ;;  %v4163_v42 = vsel %vm167_vm2, 1.0, %v3629_v21 }
 0x781   :  { %3376 = vmatpush3.msra.mxu0 %v1772_v36  ;;  %v1503_v36 = vadd.f32 1.0, %v3571_v12  ;;  %vm2028_vm5 = vcmp.gt.f32.partialorder %v4163_v42, 0.5 }
 0x782   :  { %3377 = vmatprep.subr.mxu0 %v1767_v33 }
 0x783   :  { %3378 = vmatpush3.msra.mxu0 %v1767_v33  ;;  %3572 = vrcp.f32 %v1503_v36  ;;  %v2031_v33 = vsub.s32 0, %v158_v41 }
 0x784   :  { %3380 = vmatmul.mubr.msk.f32.vlgmr.msra.gmra.mxu0 %vm288_vm1, %v3712_v26 }
 0x785   :  { %3382 = vmatprep.mubr.msk.f32.mxu0 %vm288_vm1, %v3709_v25 }
 0x788   :  { %3383 = vmatmul.mubr.msk.f32.gmra.mxu0 %vm288_vm1, %v3720_v30 }
 0x789   :  { %3385 = vmatprep.mubr.msk.f32.mxu0 %vm288_vm1, %v3723_v31 }
 0x78c   :  { %3386 = vmatmul.mubr.msk.f32.gmra.mxu0 %vm288_vm1, %v3730_v34 }
 0x78d   :  { %3409 = vmatprep.mubr.msk.f32.mxu0 %vm288_vm1, %v3704_v22 }
 0x790   :  { %v3573_v14 = vpop.eup %3572 }
 0x844   :  { %v3381_v24 = vpop.f32.mrf.mxu0 }
 0x845   :  { %v1871_v50 = vmul.f32 %v3381_v24, %v1227_v47  ;;  %v2056_v24 = vsub.s32 2, %v158_v41 }
 0x846   :  { %v1841_v27 = vpop.f32.mrf.mxu0 }
 0x847   :  { %v1870_v49 = vmul.f32 %v1841_v27, %v1222_v44 }
 0x848   :  { %v3384_v51 = vpop.f32.mrf.mxu0 }
 0x849   :  { %3396 = vmatprep.mubr.msk.f32.mxu1 %vm515_vm15, %v1870_v49  ;;  %v1873_v55 = vmul.f32 %v3384_v51, %v1237_v28  ;;  %v2068_v28 = vsub.s32 3, %v158_v41  ;;  %v3011_v41 = vmul.f32 -1.442695, %v4097_v10 }
 0x84a   :  { %v1851_v48 = vpop.f32.mrf.mxu0  ;;  %3397 = vmatmul.mubr.msk.f32.vlgmr.msra.gmra.mxu1 %vm515_vm15, %v1871_v50 }
 0x84b   :  { %v1872_v54 = vmul.f32 %v1851_v48, %v1232_v52 }
 0x84c   :  { %v3387_v32 = vpop.f32.mrf.mxu0 }
 0x84d   :  { %3399 = vmatprep.mubr.msk.f32.mxu1 %vm515_vm15, %v1872_v54  ;;  %v1875_v59 = vmul.f32 %v3387_v32, %v1247_v57  ;;  %v3014_v54 = vmul.f32 -1.442695, %v4100_v20  ;;  %v3012_v20 = vmul.f32 -1.442695, %v4094_v7 }
 0x84e   :  { %v1861_v38 = vpop.f32.mrf.mxu0  ;;  %3400 = vmatmul.mubr.msk.f32.gmra.mxu1 %vm515_vm15, %v1873_v55  ;;  %v1477_v55 = vadd.f32 %v4086_v5, %v4108_v18 }
 0x84f   :  { %v1874_v40 = vmul.f32 %v1861_v38, %v1242_v37  ;;  %3574 = vpow2.f32 %v3014_v54 }
 0x850   :  { %v3013_v38 = vmul.f32 -1.442695, %v1477_v55 }
 0x851   :  { %3402 = vmatprep.mubr.msk.f32.mxu1 %vm515_vm15, %v1874_v40 }
 0x852   :  { %3403 = vmatmul.mubr.msk.f32.gmra.mxu1 %vm515_vm15, %v1875_v59  ;;  %3576 = vpow2.f32 %v3013_v38 }
 0x853   :  { %3430 = vmatprep.mubr.msk.f32.mxu1 %vm2035_vm4, %v4139_v62  ;;  %3578 = vpow2.f32 %v3012_v20 }
 0x854   :  { %3580 = vpow2.f32 %v3011_v41 }
 0x855   :  { %3582 = vpow2.f32 %v3010_v53 }
 0x85c   :  { %v3575_v7 = vpop.eup %3574 }
 0x90a   :  { %v3398_v46 = vpop.f32.mrf.mxu1 }
 0x90b   :  { %v4144_v6 = vmul.f32 0.35355338, %v3398_v46 }
 0x90c   :  { %v1960_v56 = vpop.f32.mrf.mxu1 }
 0x90d   :  { %v4136_v58 = vmul.f32 0.35355338, %v1960_v56  ;;  %v1508_v56 = vadd.f32 1.0, %v3575_v7 }
 0x90e   :  { %v3401_v60 = vpop.f32.mrf.mxu1 }
 0x90f   :  { %1995 = vxpose.xlu1.b32.start [1/6] (short) (narrow) %v4136_v58, 8  ;;  %v4152_v4 = vmul.f32 0.35355338, %v3401_v60  ;;  %v3577_v60 = vpop.eup %3576  ;;  %3584 = vrcp.f32 %v1508_v56 }
 0x910   :  { %v1970_v17 = vpop.f32.mrf.mxu1 }
 0x911   :  { %v4147_v8 = vmul.f32 0.35355338, %v1970_v17  ;;  %v1507_v17 = vadd.f32 1.0, %v3577_v60 }
 0x912   :  { %v3404_v0 = vpop.f32.mrf.mxu1 }
 0x913   :  { %1996 = vxpose.xlu1.b32.cont [2/6] (short) (narrow) %v4144_v6, 8  ;;  %v4158_v19 = vmul.f32 0.35355338, %v3404_v0  ;;  %v3579_v0 = vpop.eup %3578  ;;  %3586 = vrcp.f32 %v1507_v17 }
 0x914   :  { %v1980_v9 = vpop.f32.mrf.mxu1  ;;  %v1506_v3 = vadd.f32 1.0, %v3579_v0  ;;  %v3581_v10 = vpop.eup %3580 }
 0x915   :  { %v4155_v16 = vmul.f32 0.35355338, %v1980_v9  ;;  %v1505_v9 = vadd.f32 1.0, %v3581_v10  ;;  %v3583_v11 = vpop.eup %3582 }
 0x916   :  { %3588 = vrcp.f32 %v1506_v3  ;;  %v1504_v12 = vadd.f32 1.0, %v3583_v11 }
 0x917   :  { %1997 = vxpose.xlu1.b32.cont [3/6] (short) (narrow) %v4147_v8, 8  ;;  %3590 = vrcp.f32 %v1505_v9 }
 0x918   :  { %3592 = vrcp.f32 %v1504_v12 }
 0x91b   :  { %1998 = vxpose.xlu1.b32.cont [4/6] (short) (narrow) %v4152_v4, 8 }
 0x91c   :  { %v3585_v36 = vpop.eup %3584 }
 0x91f   :  { %1999 = vxpose.xlu1.b32.cont [5/6] (short) (narrow) %v4155_v16, 8 }
 0x920   :  { %v3587_v23 = vpop.eup %3586 }
 0x923   :  { %2000 = vxpose.xlu1.b32.end [6/6] (short) (narrow) %v4158_v19, 8 }
 0x941   :  { %1523 = vperm.xlu1 %3541, %v3573_v14   ;;  %v3589_v14 = vpop.eup %3588 }
 0x98b   :  { %v2011_v29 = vpop.trf.xlu1 }
 0x98c   :  { %v2032_v39 = vrot.slane %v2011_v29, %v2031_v33  ;;  %v2045_v43 = vrot.slane %v2011_v29, %v2044_v35  ;;  %v2057_v49 = vrot.slane %v2011_v29, %v2056_v24  ;;  %v2069_v37 = vrot.slane %v2011_v29, %v2068_v28  ;;  %v3591_v33 = vpop.eup %3590 }
 0x98d   :  { %v3593_v35 = vpop.eup %3592 }
 0x98e   :  { %v2034_v44 = vsel %vm2028_vm5, %v2032_v39, -1e+30  ;;  %v2047_v27 = vsel %vm2028_vm5, %v2045_v43, -1e+30  ;;  %v2059_v50 = vsel %vm2028_vm5, %v2057_v49, -1e+30 }
 0x98f   :  { %v2039_v47 = vsel %vm2035_vm4, %v2034_v44, -inf  ;;  %v2051_v21 = vsel %vm2035_vm4, %v2047_v27, -inf  ;;  %v2063_v51 = vsel %vm2035_vm4, %v2059_v50, -inf  ;;  %v2033_v52 = vsel %vm2027_vm6, %v2032_v39, -1e+30 }
 0x990   :  { %2040 = vmax.xlane.f32.xlu0 %v2039_v47  ;;  %v2036_v48 = vsel %vm2035_vm4, %v2033_v52, -inf  ;;  %v2046_v32 = vsel %vm2027_vm6, %v2045_v43, -1e+30  ;;  %v2071_v40 = vsel %vm2028_vm5, %v2069_v37, -1e+30 }
 0x991   :  { %v2048_v57 = vsel %vm2035_vm4, %v2046_v32, -inf  ;;  %v2075_v59 = vsel %vm2035_vm4, %v2071_v40, -inf  ;;  %v2058_v5 = vsel %vm2027_vm6, %v2057_v49, -1e+30  ;;  %v2070_v45 = vsel %vm2027_vm6, %v2069_v37, -1e+30 }
 0x992   :  { %v2060_v18 = vsel %vm2035_vm4, %v2058_v5, -inf  ;;  %v2072_v46 = vsel %vm2035_vm4, %v2070_v45, -inf }
 0x994   :  { %2052 = vmax.xlane.f32.xlu0 %v2051_v21 }
 0x998   :  { %2064 = vmax.xlane.f32.xlu0 %v2063_v51 }
 0x99c   :  { %2037 = vmax.xlane.f32.xlu0 %v2036_v48 }
 0x9a0   :  { %2049 = vmax.xlane.f32.xlu0 %v2048_v57 }
 0x9a4   :  { %2076 = vmax.xlane.f32.xlu0 %v2075_v59 }
 0x9a8   :  { %2061 = vmax.xlane.f32.xlu0 %v2060_v18 }
 0x9ac   :  { %2073 = vmax.xlane.f32.xlu0 %v2072_v46 }
 0x9c2   :  { %1548 = vperm.xlu0 %3540, %v3585_v36  }
 0x9c6   :  { %1543 = vperm.xlu0 %3540, %v3587_v23  }
 0x9ca   :  { %1538 = vperm.xlu0 %3540, %v3589_v14  }
 0x9ce   :  { %1533 = vperm.xlu0 %3540, %v3591_v33  }
 0x9d2   :  { %1528 = vperm.xlu0 %3540, %v3593_v35  }
 0xa19   :  { %v2041_v29 = vpop.xlane.xlu0 %2040 }
 0xa1d   :  { %v2053_v39 = vpop.xlane.xlu0 %2052 }
 0xa1e   :  { %v2080_v47 = vsel %vm2078_vm7, %v2041_v29, %v2053_v39 }
 0xa21   :  { %v2065_v43 = vpop.xlane.xlu0 %2064 }
 0xa22   :  { %v2083_v27 = vsel %vm2081_vm8, %v2080_v47, %v2065_v43  ;;  %v4246_v43 = vld [vmem:[%s3670_s9] sm:$0xff] }
 0xa25   :  { %v2038_v24 = vpop.xlane.xlu0 %2037 }
 0xa29   :  { %v2050_v44 = vpop.xlane.xlu0 %2049 }
 0xa2a   :  { %v2079_v51 = vsel %vm2078_vm7, %v2038_v24, %v2050_v44  ;;  %v2594_v24 = vld [vmem:[%s4253_s15 + $0x18] sm:$0xff]  ;;  %v2593_v44 = vld [vmem:[%s4253_s15 + $0x10] sm:$0xff] }
 0xa2d   :  { %v2077_v49 = vpop.xlane.xlu0 %2076 }
 0xa2e   :  { %v2086_v21 = vsel %vm2084_vm9, %v2083_v27, %v2077_v49 }
 0xa2f   :  { %3405 = vmatprep.subr.mxu0 %v2086_v21 }
 0xa30   :  { %3406 = vmatpush3.msra.mxu0 %v2086_v21 }
 0xa31   :  { %v2062_v50 = vpop.xlane.xlu0 %2061 }
 0xa32   :  { %v2082_v52 = vsel %vm2081_vm8, %v2079_v51, %v2062_v50  ;;  %v2994_v51 = vld [vmem:[%s2921_s19] ss:$0 sm:$0xff] }
 0xa35   :  { %v2074_v28 = vpop.xlane.xlu0 %2073 }
 0xa36   :  { %v2085_v48 = vsel %vm2084_vm9, %v2082_v52, %v2074_v28  ;;  %v1378_v28 = vadd.f32 %v3961_v2, %v2994_v51  ;;  %v1358_v2 = vadd.f32 %v3950_v61, %v2994_v51 }
 0xa37   :  { %3407 = vmatprep.subr.mxu0 %v2085_v48 }
 0xa38   :  { %3408 = vmatpush3.msra.mxu0 %v2085_v48 }
 0xa39   :  { %3410 = vmatmul.mubr.msk.f32.vlgmr.msra.gmra.mxu0 %vm288_vm1, %v3712_v26 }
 0xa3a   :  { %3412 = vmatprep.mubr.msk.f32.mxu0 %vm288_vm1, %v3709_v25 }
 0xa3d   :  { %3413 = vmatmul.mubr.msk.f32.gmra.mxu0 %vm288_vm1, %v3720_v30  ;;  %v1549_v47 = vpop.permute.xlu0 %1548 }
 0xa3e   :  { %3415 = vmatprep.mubr.msk.f32.mxu0 %vm288_vm1, %v3723_v31 }
 0xa41   :  { %3416 = vmatmul.mubr.msk.f32.gmra.mxu0 %vm288_vm1, %v3730_v34  ;;  %v1544_v27 = vpop.permute.xlu0 %1543 }
 0xa45   :  { %v1539_v49 = vpop.permute.xlu0 %1538 }
 0xa49   :  { %v1534_v48 = vpop.permute.xlu0 %1533 }
 0xaf9   :  { %v3411_v54 = vpop.f32.mrf.mxu0 }
 0xafa   :  { %v2183_v41 = vsub.f32 %v4144_v6, %v3411_v54 }
 0xafb   :  { %v2153_v55 = vpop.f32.mrf.mxu0 }
 0xafc   :  { %v2182_v53 = vsub.f32 %v4136_v58, %v2153_v55  ;;  %v2190_v56 = vmul.f32 1.442695, %v2183_v41  ;;  %v1373_v55 = vadd.f32 %v2994_v51, %v3963_v15  ;;  %v1529_v41 = vpop.permute.xlu0 %1528 }
 0xafd   :  { %v3414_v32 = vpop.f32.mrf.mxu0 }
 0xafe   :  { %v2185_v38 = vsub.f32 %v4152_v4, %v3414_v32  ;;  %v2188_v4 = vmul.f32 1.442695, %v2182_v53  ;;  %v1556_v32 = vmul.f32 %v1549_v47, %v1378_v28 }
 0xaff   :  { %v2163_v37 = vpop.f32.mrf.mxu0 }
 0xb00   :  { %v2184_v20 = vsub.f32 %v4147_v8, %v2163_v37  ;;  %v2194_v45 = vmul.f32 1.442695, %v2185_v38  ;;  %v1555_v38 = vmul.f32 %v1544_v27, %v1373_v55 }
 0xb01   :  { %v3417_v57 = vpop.f32.mrf.mxu0 }
 0xb02   :  { %v2187_v40 = vsub.f32 %v4158_v19, %v3417_v57  ;;  %v2192_v7 = vmul.f32 1.442695, %v2184_v20  ;;  %v1368_v57 = vadd.f32 %v3957_v1, %v2994_v51  ;;  %v1363_v20 = vadd.f32 %v2994_v51, %v3959_v13 }
 0xb03   :  { %v2173_v59 = vpop.f32.mrf.mxu0  ;;  %v1353_v13 = vadd.f32 %v2994_v51, %v3952_v63  ;;  %v2592_v63 = vld [vmem:[%s4253_s15 + $0x8] sm:$0xff] }
 0xb04   :  { %v2198_v5 = vmul.f32 1.442695, %v2187_v40  ;;  %v2186_v18 = vsub.f32 %v4155_v16, %v2173_v59  ;;  %v1553_v15 = vmul.f32 %v1534_v48, %v1363_v20 }
 0xb06   :  { %3594 = vpow2.f32 %v2198_v5  ;;  %v2196_v46 = vmul.f32 1.442695, %v2186_v18  ;;  %v1554_v5 = vmul.f32 %v1539_v49, %v1368_v57 }
 0xb08   :  { %3596 = vpow2.f32 %v2196_v46  ;;  %v1552_v46 = vmul.f32 %v1529_v41, %v1358_v2  ;;  %v3065_v41 = vld [vmem:[%s2936_s13] ss:$0 sm:$0xff] }
 0xb09   :  { %3598 = vpow2.f32 %v2194_v45  ;;  %v1524_v45 = vpop.permute.xlu1 %1523 }
 0xb0a   :  { %3600 = vpow2.f32 %v2192_v7  ;;  %v1551_v7 = vmul.f32 %v1524_v45, %v1353_v13 }
 0xb0b   :  { %3602 = vpow2.f32 %v2190_v56 }
 0xb0c   :  { %3604 = vpow2.f32 %v2188_v4  ;;  %v2590_v4 = vld [vmem:[%s4267_s23 + $0x18] sm:$0xff] }
 0xb13   :  { %v4213_v19 = vpop.eup %3594 }
 0xb14   :  { %3418 = vmatprep.subr.mxu1 %v4213_v19 }
 0xb15   :  { %v3597_v8 = vpop.eup %3596  ;;  %3419 = vmatpush3.msra.mxu1 %v4213_v19 }
 0xb16   :  { %3420 = vmatprep.subr.mxu1 %v3597_v8  ;;  %v3599_v6 = vpop.eup %3598 }
 0xb17   :  { %3421 = vmatpush3.msra.mxu1 %v3597_v8  ;;  %v3601_v58 = vpop.eup %3600 }
 0xb18   :  { %3422 = vmatprep.subr.mxu1 %v3599_v6  ;;  %v3603_v16 = vpop.eup %3602 }
 0xb19   :  { %3423 = vmatpush3.msra.mxu1 %v3599_v6  ;;  %v3605_v60 = vpop.eup %3604 }
 0xb1a   :  { %3424 = vmatprep.subr.mxu1 %v3601_v58 }
 0xb1b   :  { %3425 = vmatpush3.msra.mxu1 %v3601_v58 }
 0xb1c   :  { %3426 = vmatprep.subr.mxu1 %v3603_v16 }
 0xb1d   :  { %3427 = vmatpush3.msra.mxu1 %v3603_v16 }
 0xb1e   :  { %3428 = vmatprep.subr.mxu1 %v3605_v60 }
 0xb1f   :  { %3429 = vmatpush3.msra.mxu1 %v3605_v60 }
 0xb20   :  { %3431 = vmatmul.mubr.msk.f32.vlgmr.msra.gmra.mxu1 %vm2035_vm4, %v4163_v42 }
 0xb21   :  { %3437 = vmatprep.mubr.msk.f32.mxu1 %vm288_vm1, %v3704_v22  ;;  %v2388_v22 = vld [vmem:[%s2911_s11] sm:$0xf] }
 0xb22   :  { %3446 = vmatprep.subr.msk.mxu0 %vm648_vm0, %v2388_v22 }
 0xb23   :  { %3447 = vmatpush3.msk.msra.mxu0 %vm648_vm0, %v2388_v22  ;;  %v3062_v22 = vld [vmem:[%s2932_s27] ss:$0 sm:$0xff] }
 0xb24   :  { %3472 = vmatprep.subr.mxu0 %v2594_v24 }
 0xbe0   :  { %v3432_v17 = vpop.f32.mrf.mxu1 }
 0xbe1   :  { %3433 = vmatprep.subr.mxu1 %v3432_v17 }
 0xbe2   :  { %v2272_v0 = vpop.f32.mrf.mxu1  ;;  %3434 = vmatpush3.msra.mxu1 %v3432_v17 }
 0xbe3   :  { %3435 = vmatprep.subr.mxu1 %v2272_v0 }
 0xbe4   :  { %3436 = vmatpush3.msra.mxu1 %v2272_v0 }
 0xbe5   :  { %3438 = vmatmul.mubr.msk.f32.vlgmr.msra.gmra.mxu1 %vm288_vm1, %v3712_v26 }
 0xbe6   :  { %3440 = vmatprep.mubr.msk.f32.mxu1 %vm288_vm1, %v3709_v25 }
 0xbe9   :  { %3441 = vmatmul.mubr.msk.f32.gmra.mxu1 %vm288_vm1, %v3720_v30 }
 0xbea   :  { %3443 = vmatprep.mubr.msk.f32.mxu1 %vm288_vm1, %v3723_v31 }
 0xbed   :  { %3444 = vmatmul.mubr.msk.f32.gmra.mxu1 %vm288_vm1, %v3730_v34  ;;  %vm2389_vm1 = vcmask 31744  }
 0xbee   :  { %3469 = vmatprep.mubr.msk.f32.mxu1 %vm2035_vm4, %v4139_v62 }
 0xca5   :  { %v3439_v25 = vpop.f32.mrf.mxu1 }
 0xca6   :  { %3606 = vrcp.f32 %v3439_v25 }
 0xca7   :  { %v2347_v26 = vpop.f32.mrf.mxu1 }
 0xca8   :  { %3608 = vrcp.f32 %v2347_v26 }
 0xca9   :  { %v3442_v30 = vpop.f32.mrf.mxu1 }
 0xcaa   :  { %3610 = vrcp.f32 %v3442_v30 }
 0xcab   :  { %v2357_v31 = vpop.f32.mrf.mxu1 }
 0xcac   :  { %3612 = vrcp.f32 %v2357_v31 }
 0xcad   :  { %v3445_v34 = vpop.f32.mrf.mxu1 }
 0xcae   :  { %3614 = vrcp.f32 %v3445_v34 }
 0xcaf   :  { %v2367_v62 = vpop.f32.mrf.mxu1 }
 0xcb0   :  { %3616 = vrcp.f32 %v2367_v62 }
 0xcb3   :  { %v3607_v3 = vpop.eup %3606 }
 0xcb4   :  { %v2379_v11 = vmul.f32 %v3607_v3, %v3603_v16  ;;  %v4280_v16 = vld [vmem:[%s3670_s9 + $0x8] sm:$0xff]  ;;  %s3654_s9 = smov 30  }
 0xcb5   :  { %v3609_v10 = vpop.eup %3608  ;;  %s2935_s30 = sld [smem:[%s4314_s0 + %s3654_s9]]  }
 0xcb6   :  { %v2377_v9 = vmul.f32 %v3609_v10, %v3605_v60 }
 0xcb7   :  { %v3611_v12 = vpop.eup %3610 }
 0xcb8   :  { %3448 = vmatprep.mubr.msk.f32.mxu0 %vm2389_vm1, %v2377_v9  ;;  %v2383_v14 = vmul.f32 %v3611_v12, %v3599_v6  ;;  %v2591_v6 = vld [vmem:[%s4253_s15] sm:$0xff] }
 0xcb9   :  { %v3613_v36 = vpop.eup %3612  ;;  %3449 = vmatmul.mubr.msk.f32.vlgmr.msra.gmra.mxu0 %vm2389_vm1, %v2379_v11 }
 0xcba   :  { %v2381_v23 = vmul.f32 %v3613_v36, %v3601_v58  ;;  %3473 = vmatpush3.msra.mxu0 %v2594_v24  ;;  %v2587_v58 = vld [vmem:[%s4267_s23] sm:$0xff] }
 0xcbb   :  { %v3615_v33 = vpop.eup %3614  ;;  %3474 = vmatprep.subr.mxu0 %v2593_v44  ;;  %v2809_v24 = vld [vmem:[%s2935_s30 + $0x18] sm:$0xff]  ;;  %v2807_v47 = vld [vmem:[%s2935_s30 + $0x8] sm:$0xff]  ;;  %v2806_v27 = vld [vmem:[%s2935_s30] sm:$0xff] }
 0xcbc   :  { %3451 = vmatprep.mubr.msk.f32.mxu0 %vm2389_vm1, %v2381_v23  ;;  %v2387_v39 = vmul.f32 %v3615_v33, %v4213_v19  ;;  %3475 = vmatpush3.msra.mxu0 %v2593_v44  ;;  %v2589_v19 = vld [vmem:[%s4267_s23 + $0x10] sm:$0xff] }
 0xcbd   :  { %v3617_v35 = vpop.eup %3616  ;;  %3452 = vmatmul.mubr.msk.f32.gmra.mxu0 %vm2389_vm1, %v2383_v14  ;;  %3476 = vmatprep.subr.mxu0 %v2592_v63  ;;  %v2808_v44 = vld [vmem:[%s2935_s30 + $0x10] sm:$0xff] }
 0xcbe   :  { %v2385_v29 = vmul.f32 %v3617_v35, %v3597_v8  ;;  %v2588_v8 = vld [vmem:[%s4267_s23 + $0x8] sm:$0xff]  ;;  %3477 = vmatpush3.msra.mxu0 %v2592_v63 }
 0xcbf   :  { %3478 = vmatprep.subr.mxu0 %v2591_v6 }
 0xcc0   :  { %3454 = vmatprep.mubr.msk.f32.mxu0 %vm2389_vm1, %v2385_v29  ;;  %3479 = vmatpush3.msra.mxu0 %v2591_v6 }
 0xcc1   :  { %3455 = vmatmul.mubr.msk.f32.gmra.mxu0 %vm2389_vm1, %v2387_v39  ;;  %3494 = vmatprep.subr.mxu0 %v2809_v24 }
 0xcc2   :  { %3480 = vmatprep.mubr.msk.f32.mxu0 %vm515_vm15, %v4246_v43 }
 0xcc5   :  { %3481 = vmatmul.mubr.msk.f32.vlgmr.msra.gmra.mxu0 %vm515_vm15, %v4280_v16 }
 0xcc6   :  { %3495 = vmatpush3.msra.mxu0 %v2809_v24 }
 0xcc7   :  { %3496 = vmatprep.subr.mxu0 %v2808_v44 }
 0xcc8   :  { %3497 = vmatpush3.msra.mxu0 %v2808_v44 }
 0xcc9   :  { %3498 = vmatprep.subr.mxu0 %v2807_v47 }
 0xcca   :  { %3499 = vmatpush3.msra.mxu0 %v2807_v47 }
 0xccb   :  { %3500 = vmatprep.subr.mxu0 %v2806_v27 }
 0xccc   :  { %3501 = vmatpush3.msra.mxu0 %v2806_v27 }
 0xd79   :  { %v3450_v21 = vpop.f32.mrf.mxu0 }
 0xd7a   :  { %v2507_v56 = vmul.f32 %v3450_v21, %v1552_v46 }
 0xd7b   :  { %v2477_v50 = vpop.f32.mrf.mxu0 }
 0xd7c   :  { %v2506_v61 = vmul.f32 %v2477_v50, %v1551_v7 }
 0xd7d   :  { %v3453_v52 = vpop.f32.mrf.mxu0 }
 0xd7e   :  { %v2509_v1 = vmul.f32 %v3453_v52, %v1554_v5 }
 0xd7f   :  { %v2487_v54 = vpop.f32.mrf.mxu0 }
 0xd80   :  { %v2508_v53 = vmul.f32 %v2487_v54, %v1553_v15  ;;  %v3063_v54 = vld [vmem:[%s2933_s4] ss:$0 sm:$0xff] }
 0xd81   :  { %v3456_v37 = vpop.f32.mrf.mxu0 }
 0xd82   :  { %v2511_v40 = vmul.f32 %v3456_v37, %v1556_v32  ;;  %v3064_v32 = vld [vmem:[%s2934_s8] ss:$0 sm:$0xff] }
 0xd83   :  { %v2497_v59 = vpop.f32.mrf.mxu0 }
 0xd84   :  { %v2510_v18 = vmul.f32 %v2497_v59, %v1555_v38  ;;  %3457 = vmatprep.subr.mxu1 %v2511_v40 }
 0xd85   :  { %3458 = vmatpush3.msra.mxu1 %v2511_v40  ;;  %v3482_v17 = vpop.f32.mrf.mxu0 }
 0xd86   :  { %3459 = vmatprep.subr.mxu1 %v2510_v18 }
 0xd87   :  { %3460 = vmatpush3.msra.mxu1 %v2510_v18  ;;  %v2661_v26 = vpop.f32.mrf.mxu0 }
 0xd88   :  { %3461 = vmatprep.subr.mxu1 %v2509_v1 }
 0xd89   :  { %3462 = vmatpush3.msra.mxu1 %v2509_v1 }
 0xd8a   :  { %3463 = vmatprep.subr.mxu1 %v2508_v53 }
 0xd8b   :  { %3464 = vmatpush3.msra.mxu1 %v2508_v53 }
 0xd8c   :  { %3465 = vmatprep.subr.mxu1 %v2507_v56 }
 0xd8d   :  { %3466 = vmatpush3.msra.mxu1 %v2507_v56 }
 0xd8e   :  { %3467 = vmatprep.subr.mxu1 %v2506_v61 }
 0xd8f   :  { %3468 = vmatpush3.msra.mxu1 %v2506_v61 }
 0xd90   :  { %3470 = vmatmul.mubr.msk.f32.vlgmr.msra.gmra.mxu1 %vm2035_vm4, %v4163_v42  ;;  %3483 = vmatprep.subr.mxu1 %v2590_v4 }
 0xd91   :  { %3484 = vmatpush3.msra.mxu1 %v2590_v4 }
 0xd92   :  { %3485 = vmatprep.subr.mxu1 %v2589_v19 }
 0xd93   :  { %3486 = vmatpush3.msra.mxu1 %v2589_v19 }
 0xd94   :  { %3487 = vmatprep.subr.mxu1 %v2588_v8 }
 0xd95   :  { %3488 = vmatpush3.msra.mxu1 %v2588_v8 }
 0xd96   :  { %3489 = vmatprep.subr.mxu1 %v2587_v58 }
 0xd97   :  { %3490 = vmatpush3.msra.mxu1 %v2587_v58 }
 0xe50   :  { %v3471_v42 = vpop.f32.mrf.mxu1 }
 0xe52   :  { %v2578_v60 = vpop.f32.mrf.mxu1 }
 0xe53   :  { %3491 = vmatprep.mubr.msk.f32.mxu1 %vm515_vm15, %v2578_v60 }
 0xe54   :  { %3492 = vmatmul.mubr.msk.f32.vlgmr.msra.gmra.mxu1 %vm515_vm15, %v3471_v42 }
 0xf14   :  { %v3493_v0 = vpop.f32.mrf.mxu1 }
 0xf15   :  { %v2748_v25 = vadd.f32 %v3493_v0, %v3482_v17 }
 0xf16   :  { %v2742_v30 = vpop.f32.mrf.mxu1 }
 0xf17   :  { %v2743_v31 = vadd.f32 %v2742_v30, %v2661_v26  ;;  %v2759_v34 = vadd.f32 %v3062_v22, %v2748_v25 }
 0xf19   :  { %v2765_v62 = vsel %vm515_vm15, %v2759_v34, 0.0  ;;  %v2758_v3 = vadd.f32 %v3062_v22, %v2743_v31 }
 0xf1a   :  { %2766 = vadd.xlane.f32.xlu1 %v2765_v62 }
 0xf1b   :  { %v2762_v10 = vsel %vm515_vm15, %v2758_v3, 0.0 }
 0xf1c   :  { %2763 = vadd.xlane.f32.xlu0 %v2762_v10 }
 0xfa3   :  { %v2767_v9 = vpop.xlane.xlu1 %2766 }
 0xfa4   :  { %v2769_v11 = vmul.f32 0.03125, %v2767_v9 }
 0xfa5   :  { %v2764_v12 = vpop.xlane.xlu0 %2763 }
 0xfa6   :  { %v2768_v36 = vmul.f32 0.03125, %v2764_v12  ;;  %v2771_v23 = vsub.f32 %v2759_v34, %v2769_v11 }
 0xfa8   :  { %v2770_v14 = vsub.f32 %v2758_v3, %v2768_v36  ;;  %v2773_v29 = vmul.f32 %v2771_v23, %v2771_v23 }
 0xfaa   :  { %v2772_v33 = vmul.f32 %v2770_v14, %v2770_v14  ;;  %v2777_v39 = vsel %vm515_vm15, %v2773_v29, 0.0 }
 0xfac   :  { %v2774_v35 = vsel %vm515_vm15, %v2772_v33, 0.0 }
 0xfad   :  { %2775 = vadd.xlane.f32.xlu0 %v2774_v35 }
 0xfb1   :  { %2778 = vadd.xlane.f32.xlu0 %v2777_v39 }
0x1036   :  { %v2776_v49 = vpop.xlane.xlu0 %2775 }
0x1037   :  { %v2780_v21 = vmul.f32 0.03125, %v2776_v49 }
0x1039   :  { %v2782_v50 = vadd.f32 1e-05, %v2780_v21 }
0x103a   :  { %v2779_v51 = vpop.xlane.xlu0 %2778 }
0x103b   :  { %3618 = vrsqrt.f32 %v2782_v50  ;;  %v2781_v52 = vmul.f32 0.03125, %v2779_v51 }
0x103d   :  { %v2783_v28 = vadd.f32 1e-05, %v2781_v52 }
0x103f   :  { %3620 = vrsqrt.f32 %v2783_v28 }
0x1048   :  { %v3619_v48 = vpop.eup %3618 }
0x1049   :  { %v2786_v55 = vmul.f32 %v3619_v48, %v2770_v14 }
0x104b   :  { %v2794_v37 = vmul.f32 %v3063_v54, %v2786_v55 }
0x104c   :  { %v3621_v57 = vpop.eup %3620 }
0x104d   :  { %v2787_v38 = vmul.f32 %v3621_v57, %v2771_v23  ;;  %v2802_v40 = vadd.f32 %v3064_v32, %v2794_v37 }
0x104f   :  { %v2795_v59 = vmul.f32 %v3063_v54, %v2787_v38  ;;  %v2804_v20 = vmax.f32 %v2802_v40, 0.0 }
0x1051   :  { %v2803_v5 = vadd.f32 %v3064_v32, %v2795_v59  ;;  %3502 = vmatprep.mubr.msk.f32.mxu0 %vm515_vm15, %v2804_v20 }
0x1053   :  { %v2805_v18 = vmax.f32 %v2803_v5, 0.0 }
0x1055   :  { %3503 = vmatmul.mubr.msk.f32.vlgmr.msra.gmra.mxu0 %vm515_vm15, %v2805_v18 }
0x1115   :  { %v3504_v2 = vpop.f32.mrf.mxu0 }
0x1116   :  { %v2895_v15 = vadd.f32 %v3504_v2, %v3065_v41 }
0x1117   :  { %v2889_v1 = vpop.f32.mrf.mxu0 }
0x1118   :  { %v2899_v45 = vadd.f32 %v4280_v16, %v2895_v15  ;;  %v2890_v13 = vadd.f32 %v3065_v41, %v2889_v1 }
0x111a   :  { %2901 = vst.msk [vmem:[%s2937_s17 + $0x8] sm:$0xff] %vm515_vm15, %v2899_v45  ;;  %v2898_v46 = vadd.f32 %v4246_v43, %v2890_v13 }
0x111c   :  { %2900 = vst.msk [vmem:[%s2937_s17] sm:$0xff] %vm515_vm15, %v2898_v46 }

// kernel: forward.9
= control target key start
LH: loop header
LB: loop body
LE: loop exit
PB: predicated region body
PF: predicated region fallthrough
CT: control target
= control target key end

     0   :  { %v3016_v0 = vmov 0   ;;  %vm594_vm0 = vcmask 1043456   ;;  %v103_v17 = vlaneseq  ;;  %vm234_vm1 = vcmask 130048   ;;  %s3845_s4 = inlined_call_operand.vmem [shape: s32[48,1], index: 4, kind: input, shape index: {}]   ;;  %s3846_s0 = inlined_call_operand.vmem [shape: f32[16,32], index: 0, kind: input, shape index: {}]   ;;  %s3847_s5 = inlined_call_operand.vmem [shape: s32[48,1], index: 5, kind: input, shape index: {}]   ;;  %s3848_s8 = inlined_call_operand.vmem [shape: f32[32,64], index: 8, kind: input, shape index: {}]   ;;  %s3849_s7 = inlined_call_operand.vmem [shape: f32[20,64], index: 7, kind: input, shape index: {}]   ;;  %s3850_s1 = inlined_call_operand.vmem [shape: f32[48,20], index: 1, kind: input, shape index: {}]   ;;  %s3851_s9 = inlined_call_operand.vmem [shape: f32[32,64], index: 9, kind: input, shape index: {}]   ;;  %s3852_s10 = inlined_call_operand.vmem [shape: f32[1,64], index: 10, kind: input, shape index: {}]   ;;  %s3853_s15 = inlined_call_operand.vmem [shape: f32[32,4], index: 15, kind: input, shape index: {}]   ;;  %s3854_s11 = inlined_call_operand.vmem [shape: f32[1,64], index: 11, kind: input, shape index: {}]   ;;  %s3855_s12 = inlined_call_operand.vmem [shape: f32[1,64], index: 12, kind: input, shape index: {}]   ;;  %s3856_s17 = inlined_call_operand.vmem [shape: f32[32,32], index: 17, kind: input, shape index: {}]   ;;  %s3857_s18 = inlined_call_operand.vmem [shape: f32[1,32], index: 18, kind: input, shape index: {}]   ;;  %s3858_s13 = inlined_call_operand.vmem [shape: f32[32,32], index: 13, kind: input, shape index: {}]   ;;  %s3859_s23 = inlined_call_operand.vmem [shape: f32[20,1], index: 23, kind: input, shape index: {}]   ;;  %s3860_s21 = inlined_call_operand.vmem [shape: f32[32,32], index: 21, kind: input, shape index: {}]   ;;  %s3861_s24 = inlined_call_operand.<no memory space> [shape: f32[1,1], index: 24, kind: input, shape index: {}]   ;;  %s3862_s19 = inlined_call_operand.vmem [shape: f32[1,32], index: 19, kind: input, shape index: {}]   ;;  %s3863_s20 = inlined_call_operand.vmem [shape: f32[1,32], index: 20, kind: input, shape index: {}]   ;;  %s3864_s6 = inlined_call_operand.vmem [shape: f32[32,4], index: 6, kind: input, shape index: {}]   ;;  %s3865_s22 = inlined_call_operand.vmem [shape: f32[1,32], index: 22, kind: input, shape index: {}]   ;;  %s3866_s14 = inlined_call_operand.vmem [shape: f32[1,32], index: 14, kind: input, shape index: {}]   ;;  %s3867_s3 = inlined_call_operand.vmem [shape: s32[1,48], index: 3, kind: input, shape index: {}]   ;;  %s3868_s16 = inlined_call_operand.vmem [shape: f32[1,4], index: 16, kind: input, shape index: {}]   ;;  %s3869_s2 = inlined_call_operand.vmem [shape: f32[48,3], index: 2, kind: input, shape index: {}]   ;;  %s3870_s25 = inlined_call_operand.vmem [shape: f32[16,3], index: 25, kind: output, shape index: {}]  }
   0x1   :  { %3879 = sst [smem:[#allocation3_spill]] %s3845_s4  ;;  %2939 = vset.pattern.permute.xlu1 %v3016_v0  ;;  %2938 = vset.pattern.permute.xlu0 %v3016_v0  ;;  %v3017_v21 = vmov 0.0   ;;  %vm575_vm14 = vcmask 162816   ;;  %vm461_vm15 = vcmask 261120  }
   0x2   :  { %3880 = sst [smem:[#allocation4_spill]] %s3846_s0  ;;  %v107_v18 = vand.u32 127, %v103_v17 }
   0x3   :  { %3881 = sst [smem:[#allocation5_spill]] %s3847_s5 }
   0x4   :  { %3882 = sst [smem:[#allocation6_spill]] %s3848_s8 }
   0x5   :  { %3883 = sst [smem:[#allocation7_spill]] %s3849_s7 }
   0x6   :  { %3884 = sst [smem:[#allocation8_spill]] %s3850_s1 }
   0x7   :  { %3885 = sst [smem:[#allocation9_spill]] %s3851_s9 }
   0x8   :  { %3886 = sst [smem:[#allocation10_spill]] %s3852_s10 }
   0x9   :  { %3887 = sst [smem:[#allocation11_spill]] %s3853_s15 }
   0xa   :  { %3888 = sst [smem:[#allocation12_spill]] %s3854_s11  ;;  %s3018_s11 = smov 96  }
   0xb   :  { %s3889_s9 = sld [smem:[#allocation3_spill]] }
   0xc   :  { %s3890_s28 = sld [smem:[#allocation4_spill]] }
   0xd   :  { %s3891_s26 = sld [smem:[#allocation5_spill]] }
   0xe   :  { %s3892_s10 = sld [smem:[#allocation6_spill]] }
   0xf   :  { %s3894_s0 = sld [smem:[#allocation8_spill]] }
  0x10   :  { %s3895_s1 = sld [smem:[#allocation9_spill]] }
  0x11   :  { %v93_v1 = vld [vmem:[%s3889_s9 + $0x10] sm:$0xff]  ;;  %v91_v2 = vld [vmem:[%s3889_s9] sm:$0xff]  ;;  %v94_v3 = vld [vmem:[%s3889_s9 + $0x18] sm:$0xff]  ;;  %s3897_s29 = sld [smem:[#allocation11_spill]] }
  0x12   :  { %125 = vperm.xlu1 %2939, %v93_v1   ;;  %119 = vperm.xlu0 %2938, %v91_v2   ;;  %v92_v4 = vld [vmem:[%s3889_s9 + $0x8] sm:$0xff]  ;;  %v3169_v6 = vld [vmem:[%s3890_s28] sm:$0xff]  ;;  %s3898_s27 = sld [smem:[#allocation12_spill]] }
  0x13   :  { %v3164_v5 = vld [vmem:[%s3890_s28 + $0x8] sm:$0xff]  ;;  %v95_v8 = vld [vmem:[%s3889_s9 + $0x20] sm:$0xff]  ;;  %v100_v11 = vld [vmem:[%s3891_s26 + $0x18] sm:$0xff]  ;;  %s3896_s28 = sld [smem:[#allocation10_spill]] }
  0x14   :  { %v96_v7 = vld [vmem:[%s3889_s9 + $0x28] sm:$0xff]  ;;  %2703 = vmatprep.subr.mxu0 %v3164_v5  ;;  %2716 = vmatprep.subr.mxu1 %v3164_v5  ;;  %v97_v10 = vld [vmem:[%s3891_s26] sm:$0xff]  ;;  %v99_v12 = vld [vmem:[%s3891_s26 + $0x10] sm:$0xff]  ;;  %s3893_s9 = sld [smem:[#allocation7_spill]] }
  0x15   :  { %2704 = vmatpush3.msra.mxu0 %v3164_v5  ;;  %2717 = vmatpush3.msra.mxu1 %v3164_v5  ;;  %v98_v9 = vld [vmem:[%s3891_s26 + $0x8] sm:$0xff]  ;;  %v101_v14 = vld [vmem:[%s3891_s26 + $0x20] sm:$0xff]  ;;  %v196_v15 = vld [vmem:[%s3892_s10 + $0x18] sm:$0xff] }
  0x16   :  { %128 = vperm.xlu1 %2939, %v94_v3   ;;  %122 = vperm.xlu0 %2938, %v92_v4   ;;  %v102_v13 = vld [vmem:[%s3891_s26 + $0x28] sm:$0xff]  ;;  %v195_v27 = vld [vmem:[%s3892_s10 + $0x10] sm:$0xff]  ;;  %v193_v47 = vld [vmem:[%s3892_s10] sm:$0xff] }
  0x17   :  { %2705 = vmatprep.subr.mxu0 %v3169_v6  ;;  %2718 = vmatprep.subr.mxu1 %v3169_v6  ;;  %v194_v45 = vld [vmem:[%s3892_s10 + $0x8] sm:$0xff]  ;;  %v3272_v49 = vld [vmem:[%s3894_s0] sm:$0xff]  ;;  %v3286_v51 = vld [vmem:[%s3894_s0 + $0x10] sm:$0xff] }
  0x18   :  { %2706 = vmatpush3.msra.mxu0 %v3169_v6  ;;  %2719 = vmatpush3.msra.mxu1 %v3169_v6  ;;  %v3277_v50 = vld [vmem:[%s3894_s0 + $0x8] sm:$0xff]  ;;  %v3293_v52 = vld [vmem:[%s3894_s0 + $0x18] sm:$0xff]  ;;  %v3303_v54 = vld [vmem:[%s3894_s0 + $0x20] sm:$0xff] }
  0x19   :  { %2729 = vmatprep.subr.mxu0 %v196_v15  ;;  %v200_v53 = vld [vmem:[%s3895_s1 + $0x18] sm:$0xff]  ;;  %v3310_v55 = vld [vmem:[%s3894_s0 + $0x28] sm:$0xff]  ;;  %v199_v58 = vld [vmem:[%s3895_s1 + $0x10] sm:$0xff] }
  0x1a   :  { %134 = vperm.xlu1 %2939, %v96_v7   ;;  %131 = vperm.xlu0 %2938, %v95_v8   ;;  %v192_v16 = vld [vmem:[%s3893_s9 + $0x10] sm:$0xf]  ;;  %v191_v46 = vld [vmem:[%s3893_s9 + $0x8] sm:$0xff]  ;;  %v190_v48 = vld [vmem:[%s3893_s9] sm:$0xff] }
  0x1b   :  { %2746 = vmatprep.subr.msk.mxu1 %vm594_vm0, %v192_v16  ;;  %v198_v60 = vld [vmem:[%s3895_s1 + $0x8] sm:$0xff]  ;;  %v197_v62 = vld [vmem:[%s3895_s1] sm:$0xff] }
  0x1e   :  { %158 = vperm.xlu1 %2939, %v98_v9   ;;  %155 = vperm.xlu0 %2938, %v97_v10  }
  0x22   :  { %164 = vperm.xlu1 %2939, %v100_v11   ;;  %161 = vperm.xlu0 %2938, %v99_v12  }
  0x26   :  { %170 = vperm.xlu1 %2939, %v102_v13   ;;  %167 = vperm.xlu0 %2938, %v101_v14  }
  0x8d   :  { %v126_v19 = vpop.permute.xlu1 %125  ;;  %v120_v20 = vpop.permute.xlu0 %119 }
  0x8e   :  { %vm136_vm2 = vcmp.eq.s32.totalorder %v107_v18, %v120_v20  ;;  %vm138_vm3 = vcmp.eq.s32.totalorder %v107_v18, %v126_v19 }
  0x8f   :  { %v3212_v22 = vsel %vm136_vm2, 1.0, %v3017_v21  ;;  %v3217_v25 = vsel %vm138_vm3, 1.0, %v3017_v21  ;;  %vm1981_vm3 = vcmask 392192  }
  0x90   :  { %2707 = vmatprep.mubr.msk.f32.mxu0 %vm234_vm1, %v3212_v22 }
  0x91   :  { %v129_v23 = vpop.permute.xlu1 %128  ;;  %v123_v24 = vpop.permute.xlu0 %122 }
  0x92   :  { %vm137_vm4 = vcmp.eq.s32.totalorder %v107_v18, %v123_v24  ;;  %vm139_vm5 = vcmp.eq.s32.totalorder %v107_v18, %v129_v23  ;;  %v2500_v23 = vld [vmem:[%s3896_s28] ss:$0 sm:$0xff] }
  0x93   :  { %v3220_v26 = vsel %vm137_vm4, 1.0, %v3017_v21  ;;  %v3230_v30 = vsel %vm139_vm5, 1.0, %v3017_v21 }
  0x94   :  { %2708 = vmatmul.mubr.msk.f32.vlgmr.msra.gmra.mxu0 %vm234_vm1, %v3220_v26 }
  0x95   :  { %v135_v28 = vpop.permute.xlu1 %134  ;;  %v132_v29 = vpop.permute.xlu0 %131  ;;  %2710 = vmatprep.mubr.msk.f32.mxu0 %vm234_vm1, %v3217_v25  ;;  %2730 = vmatpush3.msra.mxu0 %v196_v15 }
  0x96   :  { %vm140_vm6 = vcmp.eq.s32.totalorder %v107_v18, %v132_v29  ;;  %2731 = vmatprep.subr.mxu0 %v195_v27  ;;  %vm141_vm7 = vcmp.eq.s32.totalorder %v107_v18, %v135_v28 }
  0x97   :  { %v3233_v31 = vsel %vm140_vm6, 1.0, %v3017_v21  ;;  %2732 = vmatpush3.msra.mxu0 %v195_v27  ;;  %v3240_v34 = vsel %vm141_vm7, 1.0, %v3017_v21  ;;  %vm2024_vm6 = vcmask 7168   ;;  %vm2027_vm7 = vcmask 15360  }
  0x98   :  { %2711 = vmatmul.mubr.msk.f32.gmra.mxu0 %vm234_vm1, %v3230_v30  ;;  %2733 = vmatprep.subr.mxu0 %v194_v45 }
  0x99   :  { %v159_v32 = vpop.permute.xlu1 %158  ;;  %v156_v33 = vpop.permute.xlu0 %155  ;;  %2713 = vmatprep.mubr.msk.f32.mxu0 %vm234_vm1, %v3233_v31  ;;  %2734 = vmatpush3.msra.mxu0 %v194_v45 }
  0x9a   :  { %vm173_vm8 = vcmp.eq.s32.totalorder %v107_v18, %v159_v32  ;;  %vm172_vm9 = vcmp.eq.s32.totalorder %v107_v18, %v156_v33  ;;  %2735 = vmatprep.subr.mxu0 %v193_v47 }
  0x9b   :  { %v2464_v35 = vsel %vm173_vm8, 1.0, %v3017_v21  ;;  %v2463_v36 = vsel %vm172_vm9, 1.0, %v3017_v21  ;;  %2736 = vmatpush3.msra.mxu0 %v193_v47  ;;  %vm2030_vm8 = vcmask 23552  }
  0x9c   :  { %2714 = vmatmul.mubr.msk.f32.gmra.mxu0 %vm234_vm1, %v3240_v34  ;;  %2720 = vmatprep.mubr.msk.f32.mxu1 %vm234_vm1, %v2463_v36 }
  0x9d   :  { %v165_v37 = vpop.permute.xlu1 %164  ;;  %v162_v38 = vpop.permute.xlu0 %161  ;;  %2721 = vmatmul.mubr.msk.f32.vlgmr.msra.gmra.mxu1 %vm234_vm1, %v2464_v35  ;;  %2761 = vmatprep.subr.mxu0 %v200_v53 }
  0x9e   :  { %vm175_vm10 = vcmp.eq.s32.totalorder %v107_v18, %v165_v37  ;;  %vm174_vm11 = vcmp.eq.s32.totalorder %v107_v18, %v162_v38  ;;  %2747 = vmatpush3.msk.msra.mxu1 %vm594_vm0, %v192_v16 }
  0x9f   :  { %v2466_v39 = vsel %vm175_vm10, 1.0, %v3017_v21  ;;  %v2465_v40 = vsel %vm174_vm11, 1.0, %v3017_v21  ;;  %2748 = vmatprep.subr.mxu1 %v191_v46 }
  0xa0   :  { %2723 = vmatprep.mubr.msk.f32.mxu1 %vm234_vm1, %v2465_v40  ;;  %2749 = vmatpush3.msra.mxu1 %v191_v46 }
  0xa1   :  { %v171_v41 = vpop.permute.xlu1 %170  ;;  %v168_v42 = vpop.permute.xlu0 %167  ;;  %2724 = vmatmul.mubr.msk.f32.gmra.mxu1 %vm234_vm1, %v2466_v39  ;;  %2750 = vmatprep.subr.mxu1 %v190_v48 }
  0xa2   :  { %vm177_vm12 = vcmp.eq.s32.totalorder %v107_v18, %v171_v41  ;;  %vm176_vm13 = vcmp.eq.s32.totalorder %v107_v18, %v168_v42  ;;  %2751 = vmatpush3.msra.mxu1 %v190_v48 }
  0xa3   :  { %v2468_v43 = vsel %vm177_vm12, 1.0, %v3017_v21  ;;  %v2467_v44 = vsel %vm176_vm13, 1.0, %v3017_v21 }
  0xa4   :  { %2726 = vmatprep.mubr.msk.f32.mxu1 %vm234_vm1, %v2467_v44 }
  0xa5   :  { %2727 = vmatmul.mubr.msk.f32.gmra.mxu1 %vm234_vm1, %v2468_v43 }
  0xa6   :  { %2752 = vmatprep.mubr.msk.f32.mxu1 %vm575_vm14, %v3272_v49 }
  0xa9   :  { %2753 = vmatmul.mubr.msk.f32.vlgmr.msra.gmra.mxu1 %vm575_vm14, %v3277_v50 }
  0xaa   :  { %2755 = vmatprep.mubr.msk.f32.mxu1 %vm575_vm14, %v3286_v51 }
  0xad   :  { %2756 = vmatmul.mubr.msk.f32.gmra.mxu1 %vm575_vm14, %v3293_v52 }
  0xae   :  { %2758 = vmatprep.mubr.msk.f32.mxu1 %vm575_vm14, %v3303_v54 }
  0xb1   :  { %2759 = vmatmul.mubr.msk.f32.gmra.mxu1 %vm575_vm14, %v3310_v55 }
 0x154   :  { %v2709_v56 = vpop.f32.mrf.mxu0 }
 0x156   :  { %v319_v57 = vpop.f32.mrf.mxu0 }
 0x157   :  { %2737 = vmatprep.mubr.msk.f32.mxu0 %vm461_vm15, %v319_v57 }
 0x158   :  { %v2712_v59 = vpop.f32.mrf.mxu0  ;;  %2738 = vmatmul.mubr.msk.f32.vlgmr.msra.gmra.mxu0 %vm461_vm15, %v2709_v56 }
 0x159   :  { %2762 = vmatpush3.msra.mxu0 %v200_v53 }
 0x15a   :  { %v329_v61 = vpop.f32.mrf.mxu0  ;;  %2763 = vmatprep.subr.mxu0 %v199_v58 }
 0x15b   :  { %2740 = vmatprep.mubr.msk.f32.mxu0 %vm461_vm15, %v329_v61  ;;  %2764 = vmatpush3.msra.mxu0 %v199_v58 }
 0x15c   :  { %v2715_v63 = vpop.f32.mrf.mxu0  ;;  %2741 = vmatmul.mubr.msk.f32.gmra.mxu0 %vm461_vm15, %v2712_v59  ;;  %2765 = vmatprep.subr.mxu0 %v198_v60 }
 0x15d   :  { %v2722_v0 = vpop.f32.mrf.mxu1  ;;  %2766 = vmatpush3.msra.mxu0 %v198_v60 }
 0x15e   :  { %v339_v1 = vpop.f32.mrf.mxu0  ;;  %2767 = vmatprep.subr.mxu0 %v197_v62 }
 0x15f   :  { %v432_v2 = vpop.f32.mrf.mxu1  ;;  %2743 = vmatprep.mubr.msk.f32.mxu0 %vm461_vm15, %v339_v1  ;;  %2768 = vmatpush3.msra.mxu0 %v197_v62 }
 0x160   :  { %2744 = vmatmul.mubr.msk.f32.gmra.mxu0 %vm461_vm15, %v2715_v63 }
 0x161   :  { %v2725_v3 = vpop.f32.mrf.mxu1  ;;  %2769 = vmatprep.mubr.msk.f32.mxu0 %vm461_vm15, %v432_v2 }
 0x163   :  { %v442_v4 = vpop.f32.mrf.mxu1 }
 0x164   :  { %2770 = vmatmul.mubr.msk.f32.vlgmr.msra.gmra.mxu0 %vm461_vm15, %v2722_v0 }
 0x165   :  { %v2728_v7 = vpop.f32.mrf.mxu1  ;;  %2772 = vmatprep.mubr.msk.f32.mxu0 %vm461_vm15, %v442_v4 }
 0x167   :  { %v452_v8 = vpop.f32.mrf.mxu1 }
 0x168   :  { %2773 = vmatmul.mubr.msk.f32.gmra.mxu0 %vm461_vm15, %v2725_v3 }
 0x169   :  { %2775 = vmatprep.mubr.msk.f32.mxu0 %vm461_vm15, %v452_v8  ;;  %v2754_v9 = vpop.f32.mrf.mxu1 }
 0x16b   :  { %v664_v12 = vpop.f32.mrf.mxu1 }
 0x16c   :  { %2776 = vmatmul.mubr.msk.f32.gmra.mxu0 %vm461_vm15, %v2728_v7 }
 0x16d   :  { %v2757_v14 = vpop.f32.mrf.mxu1 }
 0x16f   :  { %v674_v18 = vpop.f32.mrf.mxu1 }
 0x171   :  { %v2760_v29 = vpop.f32.mrf.mxu1 }
 0x173   :  { %v684_v41 = vpop.f32.mrf.mxu1 }
 0x218   :  { %v2739_v10 = vpop.f32.mrf.mxu0 }
 0x219   :  { %v670_v20 = vadd.f32 %v2754_v9, %v2739_v10 }
 0x21a   :  { %v546_v11 = vpop.f32.mrf.mxu0 }
 0x21b   :  { %v665_v27 = vadd.f32 %v664_v12, %v546_v11 }
 0x21c   :  { %v2742_v13 = vpop.f32.mrf.mxu0 }
 0x21d   :  { %v680_v33 = vadd.f32 %v2757_v14, %v2742_v13 }
 0x21e   :  { %v556_v15 = vpop.f32.mrf.mxu0 }
 0x21f   :  { %v675_v38 = vadd.f32 %v674_v18, %v556_v15 }
 0x220   :  { %v2745_v16 = vpop.f32.mrf.mxu0 }
 0x221   :  { %v690_v43 = vadd.f32 %v2760_v29, %v2745_v16 }
 0x222   :  { %v566_v19 = vpop.f32.mrf.mxu0 }
 0x223   :  { %v685_v47 = vadd.f32 %v684_v41, %v566_v19 }
 0x224   :  { %v2771_v24 = vpop.f32.mrf.mxu0 }
 0x225   :  { %v807_v28 = vadd.f32 %v2771_v24, %v670_v20 }
 0x226   :  { %v777_v32 = vpop.f32.mrf.mxu0 }
 0x227   :  { %v3338_v35 = vadd.f32 %v2500_v23, %v807_v28  ;;  %v806_v36 = vadd.f32 %v777_v32, %v665_v27 }
 0x228   :  { %v2774_v37 = vpop.f32.mrf.mxu0 }
 0x229   :  { %v3340_v39 = vadd.f32 %v2500_v23, %v806_v36  ;;  %v809_v40 = vadd.f32 %v2774_v37, %v680_v33  ;;  %941 = vrot.lane.b32.xlu1 %v3338_v35, %s3018_s11 }
 0x22a   :  { %v787_v42 = vpop.f32.mrf.mxu0 }
 0x22b   :  { %v3344_v44 = vadd.f32 %v2500_v23, %v809_v40  ;;  %v808_v45 = vadd.f32 %v787_v42, %v675_v38  ;;  %939 = vrot.lane.b32.xlu0 %v3340_v39, %s3018_s11 }
 0x22c   :  { %v2777_v46 = vpop.f32.mrf.mxu0 }
 0x22d   :  { %v3348_v48 = vadd.f32 %v2500_v23, %v808_v45  ;;  %v811_v53 = vadd.f32 %v2777_v46, %v690_v43  ;;  %945 = vrot.lane.b32.xlu1 %v3344_v44, %s3018_s11 }
 0x22e   :  { %v797_v56 = vpop.f32.mrf.mxu0 }
 0x22f   :  { %v3352_v57 = vadd.f32 %v2500_v23, %v811_v53  ;;  %v810_v58 = vadd.f32 %v797_v56, %v685_v47  ;;  %943 = vrot.lane.b32.xlu0 %v3348_v48, %s3018_s11 }
 0x231   :  { %v3356_v59 = vadd.f32 %v2500_v23, %v810_v58  ;;  %949 = vrot.lane.b32.xlu1 %v3352_v57, %s3018_s11 }
 0x233   :  { %947 = vrot.lane.b32.xlu0 %v3356_v59, %s3018_s11 }
 0x29b   :  { %v942_v60 = vpop.permute.xlu1 %941 }
 0x29c   :  { %v960_v61 = vsel %vm461_vm15, %v942_v60, 0.0 }
 0x29d   :  { %v940_v62 = vpop.permute.xlu0 %939  ;;  %961 = vadd.xlane.f32.xlu1 %v960_v61 }
 0x29e   :  { %v957_v63 = vsel %vm461_vm15, %v940_v62, 0.0 }
 0x29f   :  { %958 = vadd.xlane.f32.xlu0 %v957_v63  ;;  %v946_v0 = vpop.permute.xlu1 %945 }
 0x2a0   :  { %v966_v4 = vsel %vm461_vm15, %v946_v0, 0.0 }
 0x2a1   :  { %v944_v1 = vpop.permute.xlu0 %943 }
 0x2a2   :  { %v963_v2 = vsel %vm461_vm15, %v944_v1, 0.0 }
 0x2a3   :  { %964 = vadd.xlane.f32.xlu0 %v963_v2  ;;  %v950_v8 = vpop.permute.xlu1 %949  ;;  %v212_v2 = vld [vmem:[%s3897_s29 + $0x18] sm:$0xff] }
 0x2a4   :  { %v972_v9 = vsel %vm461_vm15, %v950_v8, 0.0  ;;  %2795 = vmatprep.subr.mxu0 %v212_v2 }
 0x2a5   :  { %v948_v3 = vpop.permute.xlu0 %947  ;;  %2796 = vmatpush3.msra.mxu0 %v212_v2 }
 0x2a6   :  { %v969_v7 = vsel %vm461_vm15, %v948_v3, 0.0  ;;  %v211_v3 = vld [vmem:[%s3897_s29 + $0x10] sm:$0xff] }
 0x2a7   :  { %967 = vadd.xlane.f32.xlu0 %v966_v4  ;;  %970 = vadd.xlane.f32.xlu1 %v969_v7  ;;  %v210_v4 = vld [vmem:[%s3897_s29 + $0x8] sm:$0xff] }
 0x2a8   :  { %2797 = vmatprep.subr.mxu0 %v211_v3 }
 0x2a9   :  { %2798 = vmatpush3.msra.mxu0 %v211_v3 }
 0x2aa   :  { %2799 = vmatprep.subr.mxu0 %v210_v4 }
 0x2ab   :  { %973 = vadd.xlane.f32.xlu0 %v972_v9  ;;  %2800 = vmatpush3.msra.mxu0 %v210_v4 }
 0x326   :  { %v962_v10 = vpop.xlane.xlu1 %961 }
 0x327   :  { %v976_v11 = vmul.f32 0.03125, %v962_v10 }
 0x328   :  { %v959_v12 = vpop.xlane.xlu0 %958 }
 0x329   :  { %v3369_v13 = vsub.f32 %v3338_v35, %v976_v11  ;;  %v975_v14 = vmul.f32 0.03125, %v959_v12 }
 0x32b   :  { %v3372_v15 = vsub.f32 %v3340_v39, %v975_v14  ;;  %v988_v16 = vmul.f32 %v3369_v13, %v3369_v13 }
 0x32c   :  { %v965_v18 = vpop.xlane.xlu0 %964 }
 0x32d   :  { %v977_v19 = vmul.f32 0.03125, %v965_v18  ;;  %1001 = vrot.lane.b32.xlu0 %v988_v16, %s3018_s11  ;;  %v987_v20 = vmul.f32 %v3372_v15, %v3372_v15 }
 0x32f   :  { %v3380_v23 = vsub.f32 %v3348_v48, %v977_v19  ;;  %999 = vrot.lane.b32.xlu1 %v987_v20, %s3018_s11 }
 0x330   :  { %v971_v24 = vpop.xlane.xlu1 %970  ;;  %v968_v27 = vpop.xlane.xlu0 %967 }
 0x331   :  { %v979_v28 = vmul.f32 0.03125, %v971_v24  ;;  %v978_v29 = vmul.f32 0.03125, %v968_v27  ;;  %v989_v32 = vmul.f32 %v3380_v23, %v3380_v23 }
 0x333   :  { %v3386_v33 = vsub.f32 %v3356_v59, %v979_v28  ;;  %v3389_v36 = vsub.f32 %v3344_v44, %v978_v29  ;;  %1003 = vrot.lane.b32.xlu1 %v989_v32, %s3018_s11  ;;  %v209_v32 = vld [vmem:[%s3897_s29] sm:$0xff] }
 0x334   :  { %v974_v37 = vpop.xlane.xlu0 %973  ;;  %2801 = vmatprep.subr.mxu0 %v209_v32 }
 0x335   :  { %v980_v38 = vmul.f32 0.03125, %v974_v37  ;;  %v991_v40 = vmul.f32 %v3386_v33, %v3386_v33  ;;  %v990_v41 = vmul.f32 %v3389_v36, %v3389_v36  ;;  %2802 = vmatpush3.msra.mxu0 %v209_v32  ;;  %v836_v32 = vsel %vm461_vm15, %v3356_v59, 0.0 }
 0x337   :  { %v3397_v42 = vsub.f32 %v3352_v57, %v980_v38  ;;  %1007 = vrot.lane.b32.xlu0 %v991_v40, %s3018_s11  ;;  %1005 = vrot.lane.b32.xlu1 %v990_v41, %s3018_s11 }
 0x339   :  { %v992_v43 = vmul.f32 %v3397_v42, %v3397_v42 }
 0x33b   :  { %1009 = vrot.lane.b32.xlu1 %v992_v43, %s3018_s11  ;;  %v3425_v43 = vld [vmem:[%s3898_s27] ss:$0 sm:$0xff] }
 0x39f   :  { %v1002_v45 = vpop.permute.xlu0 %1001 }
 0x3a0   :  { %v1020_v46 = vsel %vm461_vm15, %v1002_v45, 0.0 }
 0x3a1   :  { %v1000_v47 = vpop.permute.xlu1 %999  ;;  %1021 = vadd.xlane.f32.xlu1 %v1020_v46 }
 0x3a2   :  { %v1017_v53 = vsel %vm461_vm15, %v1000_v47, 0.0  ;;  %v3431_v47 = vld [vmem:[%s3855_s12] ss:$0 sm:$0xff] }
 0x3a3   :  { %1018 = vadd.xlane.f32.xlu0 %v1017_v53 }
 0x3a5   :  { %v1004_v56 = vpop.permute.xlu1 %1003 }
 0x3a6   :  { %v1023_v58 = vsel %vm461_vm15, %v1004_v56, 0.0 }
 0x3a7   :  { %1024 = vadd.xlane.f32.xlu0 %v1023_v58 }
 0x3a9   :  { %v1006_v60 = vpop.permute.xlu1 %1005  ;;  %v1008_v61 = vpop.permute.xlu0 %1007 }
 0x3aa   :  { %v1026_v62 = vsel %vm461_vm15, %v1006_v60, 0.0  ;;  %v1029_v63 = vsel %vm461_vm15, %v1008_v61, 0.0 }
 0x3ab   :  { %1027 = vadd.xlane.f32.xlu0 %v1026_v62  ;;  %1030 = vadd.xlane.f32.xlu1 %v1029_v63  ;;  %v217_v62 = vld [vmem:[%s3856_s17 + $0x18] sm:$0xff] }
 0x3ac   :  { %2827 = vmatprep.subr.mxu0 %v217_v62 }
 0x3ad   :  { %v1010_v0 = vpop.permute.xlu1 %1009 }
 0x3ae   :  { %v1032_v1 = vsel %vm461_vm15, %v1010_v0, 0.0 }
 0x3af   :  { %1033 = vadd.xlane.f32.xlu0 %v1032_v1 }
 0x42a   :  { %v1022_v7 = vpop.xlane.xlu1 %1021 }
 0x42b   :  { %v1036_v8 = vmul.f32 0.03125, %v1022_v7 }
 0x42c   :  { %v1019_v9 = vpop.xlane.xlu0 %1018 }
 0x42d   :  { %v1042_v10 = vadd.f32 1e-05, %v1036_v8  ;;  %v1035_v11 = vmul.f32 0.03125, %v1019_v9 }
 0x42f   :  { %2940 = vrsqrt.f32 %v1042_v10  ;;  %v1041_v12 = vadd.f32 1e-05, %v1035_v11 }
 0x430   :  { %v1025_v14 = vpop.xlane.xlu0 %1024 }
 0x431   :  { %2942 = vrsqrt.f32 %v1041_v12  ;;  %v1037_v16 = vmul.f32 0.03125, %v1025_v14 }
 0x433   :  { %v1043_v18 = vadd.f32 1e-05, %v1037_v16 }
 0x434   :  { %v1031_v19 = vpop.xlane.xlu1 %1030  ;;  %v1028_v20 = vpop.xlane.xlu0 %1027 }
 0x435   :  { %2944 = vrsqrt.f32 %v1043_v18  ;;  %v1039_v24 = vmul.f32 0.03125, %v1031_v19  ;;  %v1038_v27 = vmul.f32 0.03125, %v1028_v20 }
 0x437   :  { %v1045_v28 = vadd.f32 1e-05, %v1039_v24  ;;  %v1044_v29 = vadd.f32 1e-05, %v1038_v27  ;;  %v824_v24 = vsel %vm461_vm15, %v3340_v39, 0.0  ;;  %v833_v27 = vsel %vm461_vm15, %v3344_v44, 0.0 }
 0x438   :  { %v1034_v37 = vpop.xlane.xlu0 %1033 }
 0x439   :  { %2946 = vrsqrt.f32 %v1045_v28  ;;  %v1040_v38 = vmul.f32 0.03125, %v1034_v37  ;;  %v827_v28 = vsel %vm461_vm15, %v3338_v35, 0.0 }
 0x43a   :  { %2948 = vrsqrt.f32 %v1044_v29  ;;  %v839_v29 = vsel %vm461_vm15, %v3352_v57, 0.0 }
 0x43b   :  { %v1046_v40 = vadd.f32 1e-05, %v1040_v38 }
 0x43c   :  { %v2941_v41 = vpop.eup %2940 }
 0x43d   :  { %2950 = vrsqrt.f32 %v1046_v40  ;;  %v1054_v45 = vmul.f32 %v2941_v41, %v3369_v13  ;;  %v216_v40 = vld [vmem:[%s3856_s17 + $0x10] sm:$0xff]  ;;  %v215_v41 = vld [vmem:[%s3856_s17 + $0x8] sm:$0xff] }
 0x43e   :  { %v2943_v46 = vpop.eup %2942 }
 0x43f   :  { %v1060_v53 = vmul.f32 %v3425_v43, %v1054_v45  ;;  %v1053_v56 = vmul.f32 %v2943_v46, %v3372_v15  ;;  %v214_v46 = vld [vmem:[%s3856_s17] sm:$0xff] }
 0x441   :  { %v1066_v58 = vadd.f32 %v3431_v47, %v1060_v53  ;;  %v1059_v60 = vmul.f32 %v3425_v43, %v1053_v56 }
 0x442   :  { %v2945_v61 = vpop.eup %2944 }
 0x443   :  { %v1072_v13 = vmax.f32 %v1066_v58, 0.0  ;;  %v1065_v63 = vadd.f32 %v3431_v47, %v1059_v60  ;;  %v1055_v0 = vmul.f32 %v2945_v61, %v3380_v23 }
 0x445   :  { %1210 = vrot.lane.b32.xlu0 %v1072_v13, %s3018_s11  ;;  %v1071_v1 = vmax.f32 %v1065_v63, 0.0  ;;  %v1061_v15 = vmul.f32 %v3425_v43, %v1055_v0 }
 0x446   :  { %v2947_v2 = vpop.eup %2946 }
 0x447   :  { %v2949_v3 = vpop.eup %2948  ;;  %1208 = vrot.lane.b32.xlu1 %v1071_v1, %s3018_s11  ;;  %v1067_v4 = vadd.f32 %v3431_v47, %v1061_v15  ;;  %v1057_v7 = vmul.f32 %v2947_v2, %v3386_v33 }
 0x448   :  { %v1056_v8 = vmul.f32 %v2949_v3, %v3389_v36 }
 0x449   :  { %v1073_v9 = vmax.f32 %v1067_v4, 0.0  ;;  %v1063_v10 = vmul.f32 %v3425_v43, %v1057_v7  ;;  %v2531_v7 = vld [vmem:[%s3857_s18] ss:$0 sm:$0xff] }
 0x44a   :  { %v2951_v23 = vpop.eup %2950  ;;  %v1062_v11 = vmul.f32 %v3425_v43, %v1056_v8 }
 0x44b   :  { %1212 = vrot.lane.b32.xlu1 %v1073_v9, %s3018_s11  ;;  %v1069_v12 = vadd.f32 %v3431_v47, %v1063_v10  ;;  %v1058_v14 = vmul.f32 %v2951_v23, %v3397_v42  ;;  %v830_v42 = vsel %vm461_vm15, %v3348_v48, 0.0 }
 0x44c   :  { %v1068_v16 = vadd.f32 %v3431_v47, %v1062_v11 }
 0x44d   :  { %v1075_v18 = vmax.f32 %v1069_v12, 0.0  ;;  %v1064_v19 = vmul.f32 %v3425_v43, %v1058_v14 }
 0x44e   :  { %v1074_v33 = vmax.f32 %v1068_v16, 0.0 }
 0x44f   :  { %1216 = vrot.lane.b32.xlu0 %v1075_v18, %s3018_s11  ;;  %v1070_v36 = vadd.f32 %v3431_v47, %v1064_v19 }
 0x450   :  { %1214 = vrot.lane.b32.xlu1 %v1074_v33, %s3018_s11 }
 0x451   :  { %v1076_v20 = vmax.f32 %v1070_v36, 0.0 }
 0x454   :  { %1218 = vrot.lane.b32.xlu1 %v1076_v20, %s3018_s11 }
 0x46e   :  { %825 = vadd.xlane.f32.xlu0 %v824_v24 }
 0x472   :  { %831 = vadd.xlane.f32.xlu0 %v830_v42 }
 0x476   :  { %834 = vadd.xlane.f32.xlu0 %v833_v27 }
 0x478   :  { %828 = vadd.xlane.f32.xlu1 %v827_v28 }
 0x47a   :  { %840 = vadd.xlane.f32.xlu0 %v839_v29 }
 0x47c   :  { %837 = vadd.xlane.f32.xlu1 %v836_v32 }
 0x4b7   :  { %v1211_v38 = vpop.permute.xlu0 %1210 }
 0x4b9   :  { %v1209_v37 = vpop.permute.xlu1 %1208 }
 0x4ba   :  { %2803 = vmatprep.mubr.msk.f32.mxu0 %vm461_vm15, %v1209_v37 }
 0x4bb   :  { %2804 = vmatmul.mubr.msk.f32.vlgmr.msra.gmra.mxu0 %vm461_vm15, %v1211_v38 }
 0x4bc   :  { %2828 = vmatpush3.msra.mxu0 %v217_v62 }
 0x4bd   :  { %v1213_v45 = vpop.permute.xlu1 %1212  ;;  %2829 = vmatprep.subr.mxu0 %v216_v40 }
 0x4be   :  { %2806 = vmatprep.mubr.msk.f32.mxu0 %vm461_vm15, %v1213_v45  ;;  %2830 = vmatpush3.msra.mxu0 %v216_v40  ;;  %v207_v45 = vld [vmem:[%s3858_s13 + $0x18] sm:$0xff] }
 0x4bf   :  { %2831 = vmatprep.subr.mxu0 %v215_v41  ;;  %2778 = vmatprep.subr.mxu1 %v207_v45 }
 0x4c0   :  { %2832 = vmatpush3.msra.mxu0 %v215_v41  ;;  %2779 = vmatpush3.msra.mxu1 %v207_v45 }
 0x4c1   :  { %v1217_v53 = vpop.permute.xlu0 %1216  ;;  %2833 = vmatprep.subr.mxu0 %v214_v46 }
 0x4c2   :  { %v1215_v56 = vpop.permute.xlu1 %1214  ;;  %2834 = vmatpush3.msra.mxu0 %v214_v46  ;;  %v206_v46 = vld [vmem:[%s3858_s13 + $0x10] sm:$0xff] }
 0x4c3   :  { %2807 = vmatmul.mubr.msk.f32.gmra.mxu0 %vm461_vm15, %v1215_v56  ;;  %2780 = vmatprep.subr.mxu1 %v206_v46  ;;  %v204_v56 = vld [vmem:[%s3858_s13] sm:$0xff] }
 0x4c4   :  { %2809 = vmatprep.mubr.msk.f32.mxu0 %vm461_vm15, %v1217_v53  ;;  %v205_v53 = vld [vmem:[%s3858_s13 + $0x8] sm:$0xff]  ;;  %2781 = vmatpush3.msra.mxu1 %v206_v46  ;;  %v228_v46 = vld [vmem:[%s3859_s23 + $0x10] sm:$0xf] }
 0x4c5   :  { %2782 = vmatprep.subr.mxu1 %v205_v53 }
 0x4c6   :  { %v1219_v58 = vpop.permute.xlu1 %1218  ;;  %2783 = vmatpush3.msra.mxu1 %v205_v53 }
 0x4c7   :  { %2810 = vmatmul.mubr.msk.f32.gmra.mxu0 %vm461_vm15, %v1219_v58  ;;  %2784 = vmatprep.subr.mxu1 %v204_v56 }
 0x4c8   :  { %2835 = vmatprep.mubr.msk.f32.mxu0 %vm461_vm15, %v3169_v6  ;;  %2785 = vmatpush3.msra.mxu1 %v204_v56 }
 0x4c9   :  { %2812 = vmatprep.subr.msk.mxu1 %vm594_vm0, %v228_v46 }
 0x4cb   :  { %2836 = vmatmul.mubr.msk.f32.vlgmr.msra.gmra.mxu0 %vm461_vm15, %v3164_v5 }
 0x4cc   :  { %2853 = vmatprep.mubr.msk.f32.mxu0 %vm234_vm1, %v3212_v22 }
 0x4f7   :  { %v826_v60 = vpop.xlane.xlu0 %825 }
 0x4f8   :  { %v843_v3 = vmul.f32 0.03125, %v826_v60 }
 0x4fa   :  { %v3511_v23 = vsub.f32 %v3340_v39, %v843_v3 }
 0x4fb   :  { %v832_v62 = vpop.xlane.xlu0 %831 }
 0x4fc   :  { %v845_v11 = vmul.f32 0.03125, %v832_v62 }
 0x4fe   :  { %v3520_v20 = vsub.f32 %v3348_v48, %v845_v11 }
 0x4ff   :  { %v835_v1 = vpop.xlane.xlu0 %834 }
 0x500   :  { %v846_v5 = vmul.f32 0.03125, %v835_v1  ;;  %v857_v32 = vmul.f32 %v3520_v20, %v3520_v20 }
 0x501   :  { %v829_v63 = vpop.xlane.xlu1 %828 }
 0x502   :  { %v844_v2 = vmul.f32 0.03125, %v829_v63  ;;  %v3514_v14 = vsub.f32 %v3344_v44, %v846_v5  ;;  %v855_v44 = vmul.f32 %v3511_v23, %v3511_v23  ;;  %v867_v38 = vsel %vm461_vm15, %v857_v32, 0.0 }
 0x503   :  { %v841_v9 = vpop.xlane.xlu0 %840 }
 0x504   :  { %v3508_v8 = vsub.f32 %v3338_v35, %v844_v2  ;;  %v848_v19 = vmul.f32 0.03125, %v841_v9  ;;  %v858_v28 = vmul.f32 %v3514_v14, %v3514_v14  ;;  %v861_v48 = vsel %vm461_vm15, %v855_v44, 0.0 }
 0x505   :  { %v838_v16 = vpop.xlane.xlu1 %837 }
 0x506   :  { %v856_v35 = vmul.f32 %v3508_v8, %v3508_v8  ;;  %v847_v39 = vmul.f32 0.03125, %v838_v16  ;;  %v3526_v42 = vsub.f32 %v3352_v57, %v848_v19  ;;  %v870_v37 = vsel %vm461_vm15, %v858_v28, 0.0 }
 0x508   :  { %v864_v27 = vsel %vm461_vm15, %v856_v35, 0.0  ;;  %v3532_v29 = vsub.f32 %v3356_v59, %v847_v39  ;;  %v860_v57 = vmul.f32 %v3526_v42, %v3526_v42 }
 0x50a   :  { %v859_v40 = vmul.f32 %v3532_v29, %v3532_v29  ;;  %v876_v59 = vsel %vm461_vm15, %v860_v57, 0.0 }
 0x50c   :  { %v873_v41 = vsel %vm461_vm15, %v859_v40, 0.0 }
 0x57b   :  { %v3492_v61 = vpop.f32.mrf.mxu0 }
 0x57d   :  { %v3494_v13 = vpop.f32.mrf.mxu0 }
 0x583   :  { %v3496_v0 = vpop.f32.mrf.mxu0 }
 0x585   :  { %v3498_v15 = vpop.f32.mrf.mxu0 }
 0x587   :  { %v3500_v6 = vpop.f32.mrf.mxu0 }
 0x589   :  { %v3502_v4 = vpop.f32.mrf.mxu0 }
 0x58b   :  { %v2837_v10 = vpop.f32.mrf.mxu0 }
 0x58c   :  { %v1587_v12 = vadd.f32 %v2837_v10, %v2531_v7 }
 0x58d   :  { %v1581_v18 = vpop.f32.mrf.mxu0 }
 0x58e   :  { %v1582_v33 = vadd.f32 %v2531_v7, %v1581_v18  ;;  %v1593_v36 = vsel %vm461_vm15, %v1587_v12, 0.0 }
 0x58f   :  { %1594 = vadd.xlane.f32.xlu0 %v1593_v36 }
 0x590   :  { %v1590_v24 = vsel %vm461_vm15, %v1582_v33, 0.0 }
 0x591   :  { %1591 = vadd.xlane.f32.xlu1 %v1590_v24 }
 0x593   :  { %865 = vadd.xlane.f32.xlu0 %v864_v27 }
 0x595   :  { %862 = vadd.xlane.f32.xlu1 %v861_v48 }
 0x597   :  { %871 = vadd.xlane.f32.xlu0 %v870_v37 }
 0x599   :  { %868 = vadd.xlane.f32.xlu1 %v867_v38 }
 0x59b   :  { %877 = vadd.xlane.f32.xlu0 %v876_v59 }
 0x59d   :  { %874 = vadd.xlane.f32.xlu1 %v873_v41 }
 0x618   :  { %v1595_v58 = vpop.xlane.xlu0 %1594 }
 0x619   :  { %v1597_v60 = vmul.f32 0.03125, %v1595_v58 }
 0x61a   :  { %v1592_v62 = vpop.xlane.xlu1 %1591 }
 0x61b   :  { %v3557_v63 = vsub.f32 %v1587_v12, %v1597_v60  ;;  %v1596_v1 = vmul.f32 0.03125, %v1592_v62 }
 0x61c   :  { %v866_v2 = vpop.xlane.xlu0 %865 }
 0x61d   :  { %v3559_v3 = vsub.f32 %v1582_v33, %v1596_v1  ;;  %v880_v5 = vmul.f32 0.03125, %v866_v2  ;;  %v1601_v7 = vmul.f32 %v3557_v63, %v3557_v63 }
 0x61e   :  { %v863_v9 = vpop.xlane.xlu1 %862 }
 0x61f   :  { %v886_v10 = vadd.f32 1e-05, %v880_v5  ;;  %v879_v11 = vmul.f32 0.03125, %v863_v9  ;;  %v1605_v16 = vsel %vm461_vm15, %v1601_v7, 0.0  ;;  %v1600_v18 = vmul.f32 %v3559_v3, %v3559_v3 }
 0x620   :  { %1606 = vadd.xlane.f32.xlu0 %v1605_v16  ;;  %v872_v19 = vpop.xlane.xlu0 %871 }
 0x621   :  { %2952 = vrsqrt.f32 %v886_v10  ;;  %v885_v12 = vadd.f32 1e-05, %v879_v11  ;;  %v882_v36 = vmul.f32 0.03125, %v872_v19  ;;  %v1602_v33 = vsel %vm461_vm15, %v1600_v18, 0.0  ;;  %v227_v19 = vld [vmem:[%s3859_s23 + $0x8] sm:$0xff] }
 0x622   :  { %1603 = vadd.xlane.f32.xlu1 %v1602_v33  ;;  %v869_v35 = vpop.xlane.xlu1 %868 }
 0x623   :  { %2954 = vrsqrt.f32 %v885_v12  ;;  %v888_v39 = vadd.f32 1e-05, %v882_v36  ;;  %v881_v24 = vmul.f32 0.03125, %v869_v35  ;;  %v226_v36 = vld [vmem:[%s3859_s23] sm:$0xff] }
 0x624   :  { %v878_v44 = vpop.xlane.xlu0 %877 }
 0x625   :  { %2956 = vrsqrt.f32 %v888_v39  ;;  %v887_v27 = vadd.f32 1e-05, %v881_v24  ;;  %v884_v28 = vmul.f32 0.03125, %v878_v44  ;;  %v224_v39 = vld [vmem:[%s3860_s21 + $0x18] sm:$0xff]  ;;  %v222_v44 = vld [vmem:[%s3860_s21 + $0x8] sm:$0xff] }
 0x626   :  { %v875_v48 = vpop.xlane.xlu1 %874 }
 0x627   :  { %2958 = vrsqrt.f32 %v887_v27  ;;  %v890_v32 = vadd.f32 1e-05, %v884_v28  ;;  %v883_v37 = vmul.f32 0.03125, %v875_v48 }
 0x629   :  { %2960 = vrsqrt.f32 %v890_v32  ;;  %v889_v57 = vadd.f32 1e-05, %v883_v37  ;;  %v2534_v37 = vld [vmem:[%s3862_s19] ss:$0 sm:$0xff] }
 0x62b   :  { %2962 = vrsqrt.f32 %v889_v57 }
 0x62e   :  { %v2953_v38 = vpop.eup %2952 }
 0x62f   :  { %v898_v40 = vmul.f32 %v2953_v38, %v3508_v8  ;;  %v2535_v38 = vld [vmem:[%s3863_s20] ss:$0 sm:$0xff] }
 0x630   :  { %v2955_v59 = vpop.eup %2954 }
 0x631   :  { %v910_v41 = vmul.f32 %v3425_v43, %v898_v40  ;;  %v897_v45 = vmul.f32 %v2955_v59, %v3511_v23 }
 0x632   :  { %v2957_v53 = vpop.eup %2956 }
 0x633   :  { %v909_v56 = vmul.f32 %v3425_v43, %v897_v45  ;;  %v900_v58 = vmul.f32 %v2957_v53, %v3514_v14  ;;  %v922_v62 = vadd.f32 %v3431_v47, %v910_v41 }
 0x634   :  { %v2959_v60 = vpop.eup %2958 }
 0x635   :  { %v921_v8 = vadd.f32 %v3431_v47, %v909_v56  ;;  %v899_v1 = vmul.f32 %v2959_v60, %v3520_v20  ;;  %v912_v23 = vmul.f32 %v3425_v43, %v900_v58  ;;  %v928_v11 = vmax.f32 %v922_v62, 0.0 }
 0x636   :  { %v2961_v2 = vpop.eup %2960 }
 0x637   :  { %v927_v5 = vmax.f32 %v921_v8, 0.0  ;;  %v911_v7 = vmul.f32 %v3425_v43, %v899_v1  ;;  %v902_v9 = vmul.f32 %v2961_v2, %v3526_v42  ;;  %v924_v16 = vadd.f32 %v3431_v47, %v912_v23 }
 0x638   :  { %v2963_v10 = vpop.eup %2962 }
 0x639   :  { %2786 = vmatprep.mubr.msk.f32.mxu1 %vm461_vm15, %v927_v5  ;;  %v923_v14 = vadd.f32 %v3431_v47, %v911_v7  ;;  %v901_v18 = vmul.f32 %v2963_v10, %v3532_v29  ;;  %v914_v20 = vmul.f32 %v3425_v43, %v902_v9  ;;  %v930_v33 = vmax.f32 %v924_v16, 0.0 }
 0x63a   :  { %2787 = vmatmul.mubr.msk.f32.vlgmr.msra.gmra.mxu1 %vm461_vm15, %v928_v11 }
 0x63b   :  { %v929_v12 = vmax.f32 %v923_v14, 0.0  ;;  %v913_v42 = vmul.f32 %v3425_v43, %v901_v18  ;;  %2813 = vmatpush3.msk.msra.mxu1 %vm594_vm0, %v228_v46  ;;  %v926_v29 = vadd.f32 %v3431_v47, %v914_v20  ;;  %v233_v18 = vld [vmem:[%s3864_s6 + $0x18] sm:$0xff] }
 0x63c   :  { %2814 = vmatprep.subr.mxu1 %v227_v19 }
 0x63d   :  { %2789 = vmatprep.mubr.msk.f32.mxu1 %vm461_vm15, %v929_v12  ;;  %v925_v35 = vadd.f32 %v3431_v47, %v913_v42  ;;  %2815 = vmatpush3.msra.mxu1 %v227_v19  ;;  %v932_v24 = vmax.f32 %v926_v29, 0.0  ;;  %v223_v47 = vld [vmem:[%s3860_s21 + $0x10] sm:$0xff]  ;;  %v2536_v19 = vld [vmem:[%s3865_s22] ss:$0 sm:$0xff] }
 0x63e   :  { %2790 = vmatmul.mubr.msk.f32.gmra.mxu1 %vm461_vm15, %v930_v33  ;;  %2816 = vmatprep.subr.mxu1 %v226_v36  ;;  %v232_v29 = vld [vmem:[%s3864_s6 + $0x10] sm:$0xff] }
 0x63f   :  { %v931_v43 = vmax.f32 %v925_v35, 0.0  ;;  %2817 = vmatpush3.msra.mxu1 %v226_v36  ;;  %v231_v35 = vld [vmem:[%s3864_s6 + $0x8] sm:$0xff] }
 0x640   :  { %2838 = vmatprep.subr.mxu1 %v224_v39 }
 0x641   :  { %2792 = vmatprep.mubr.msk.f32.mxu1 %vm461_vm15, %v931_v43  ;;  %v2503_v43 = vld [vmem:[%s3866_s14] ss:$0 sm:$0xff] }
 0x642   :  { %2793 = vmatmul.mubr.msk.f32.gmra.mxu1 %vm461_vm15, %v932_v24 }
 0x643   :  { %2818 = vmatprep.mubr.msk.f32.mxu1 %vm575_vm14, %v3272_v49  ;;  %v221_v49 = vld [vmem:[%s3860_s21] sm:$0xff] }
 0x646   :  { %2819 = vmatmul.mubr.msk.f32.vlgmr.msra.gmra.mxu1 %vm575_vm14, %v3277_v50  ;;  %v30_v50 = vstv %s3861_s24 }
 0x647   :  { %2821 = vmatprep.mubr.msk.f32.mxu1 %vm575_vm14, %v3286_v51  ;;  %2839 = vmatpush3.msra.mxu1 %v224_v39  ;;  %31 = vst [vmem:[#allocation2] sm:$0x1] %v30_v50  ;;  %v230_v39 = vld [vmem:[%s3864_s6] sm:$0xff] }
 0x648   :  { %2840 = vmatprep.subr.mxu1 %v223_v47 }
 0x649   :  { %2841 = vmatpush3.msra.mxu1 %v223_v47 }
 0x64a   :  { %2822 = vmatmul.mubr.msk.f32.gmra.mxu1 %vm575_vm14, %v3293_v52  ;;  %2842 = vmatprep.subr.mxu1 %v222_v44 }
 0x64b   :  { %2824 = vmatprep.mubr.msk.f32.mxu1 %vm575_vm14, %v3303_v54  ;;  %2843 = vmatpush3.msra.mxu1 %v222_v44 }
 0x64c   :  { %2844 = vmatprep.subr.mxu1 %v221_v49 }
 0x64d   :  { %2845 = vmatpush3.msra.mxu1 %v221_v49 }
 0x64e   :  { %2825 = vmatmul.mubr.msk.f32.gmra.mxu1 %vm575_vm14, %v3310_v55  ;;  %v3639_v23 = vld [vmem:[#allocation2] ss:$0 sm:$0xff]  ;;  %2862 = vmatprep.subr.mxu1 %v233_v18 }
 0x6a9   :  { %v1607_v51 = vpop.xlane.xlu0 %1606 }
 0x6aa   :  { %v1609_v27 = vmul.f32 0.03125, %v1607_v51 }
 0x6ab   :  { %v1604_v28 = vpop.xlane.xlu1 %1603 }
 0x6ac   :  { %v1611_v48 = vadd.f32 1e-05, %v1609_v27  ;;  %v1608_v52 = vmul.f32 0.03125, %v1604_v28 }
 0x6ae   :  { %2964 = vrsqrt.f32 %v1611_v48  ;;  %v1610_v32 = vadd.f32 1e-05, %v1608_v52 }
 0x6b0   :  { %2966 = vrsqrt.f32 %v1610_v32 }
 0x6bb   :  { %v2965_v54 = vpop.eup %2964 }
 0x6bc   :  { %v1615_v55 = vmul.f32 %v2965_v54, %v3557_v63 }
 0x6bd   :  { %v2967_v57 = vpop.eup %2966 }
 0x6be   :  { %v1614_v40 = vmul.f32 %v2967_v57, %v3559_v3  ;;  %v1623_v59 = vmul.f32 %v2534_v37, %v1615_v55 }
 0x6c0   :  { %v1622_v41 = vmul.f32 %v2534_v37, %v1614_v40  ;;  %v1631_v45 = vadd.f32 %v2535_v38, %v1623_v59 }
 0x6c2   :  { %v1630_v46 = vadd.f32 %v2535_v38, %v1622_v41  ;;  %v1633_v56 = vmax.f32 %v1631_v45, 0.0  ;;  %v104_v41 = vshrl.u32 %v103_v17, 7 }
 0x6c4   :  { %v1632_v53 = vmax.f32 %v1630_v46, 0.0  ;;  %v105_v45 = vadd.s32 8, %v104_v41 }
 0x6c6   :  { %2846 = vmatprep.mubr.msk.f32.mxu1 %vm461_vm15, %v1632_v53  ;;  %v2454_v53 = vld [vmem:[%s3867_s3] ss:$0 sm:$0xff] }
 0x6c7   :  { %2847 = vmatmul.mubr.msk.f32.vlgmr.msra.gmra.mxu1 %vm461_vm15, %v1633_v56  ;;  %vm113_vm0 = vcmp.eq.s32.totalorder %v105_v45, %v2454_v53  ;;  %vm112_vm2 = vcmp.eq.s32.totalorder %v104_v41, %v2454_v53 }
 0x6c8   :  { %2863 = vmatpush3.msra.mxu1 %v233_v18 }
 0x6c9   :  { %2864 = vmatprep.subr.mxu1 %v232_v29 }
 0x6ca   :  { %2865 = vmatpush3.msra.mxu1 %v232_v29  ;;  %v1990_v29 = vsub.s32 1, %v104_v41 }
 0x6cb   :  { %2866 = vmatprep.subr.mxu1 %v231_v35 }
 0x6cc   :  { %2867 = vmatpush3.msra.mxu1 %v231_v35 }
 0x6cd   :  { %2868 = vmatprep.subr.mxu1 %v230_v39 }
 0x6ce   :  { %2869 = vmatpush3.msra.mxu1 %v230_v39 }
 0x6fa   :  { %v2788_v58 = vpop.f32.mrf.mxu1 }
 0x6fb   :  { %v1173_v44 = vadd.f32 %v2788_v58, %v2503_v43 }
 0x6fc   :  { %v1167_v60 = vpop.f32.mrf.mxu1 }
 0x6fd   :  { %v1168_v47 = vadd.f32 %v2503_v43, %v1167_v60 }
 0x6fe   :  { %v2791_v63 = vpop.f32.mrf.mxu1 }
 0x6ff   :  { %v1183_v48 = vadd.f32 %v2791_v63, %v2503_v43  ;;  %v3700_v63 = vsel %vm112_vm2, 1.0, %v3017_v21 }
 0x700   :  { %v1177_v62 = vpop.f32.mrf.mxu1  ;;  %vm1973_vm5 = vcmp.gt.f32.partialorder %v3700_v63, 0.5 }
 0x701   :  { %v1178_v28 = vadd.f32 %v2503_v43, %v1177_v62 }
 0x702   :  { %v2794_v8 = vpop.f32.mrf.mxu1 }
 0x703   :  { %v1193_v57 = vadd.f32 %v2794_v8, %v2503_v43 }
 0x704   :  { %v1187_v1 = vpop.f32.mrf.mxu1 }
 0x705   :  { %v1188_v55 = vadd.f32 %v2503_v43, %v1187_v1 }
 0x706   :  { %v2820_v2 = vpop.f32.mrf.mxu1 }
 0x707   :  { %v3642_v3 = vadd.f32 %v2820_v2, %v3639_v23 }
 0x708   :  { %v3644_v5 = vpop.f32.mrf.mxu1 }
 0x709   :  { %v1403_v2 = vadd.f32 %v3639_v23, %v3644_v5  ;;  %v2526_v53 = vmul.f32 -1.442695, %v3642_v3 }
 0x70a   :  { %v2823_v7 = vpop.f32.mrf.mxu1 }
 0x70b   :  { %v3647_v9 = vadd.f32 %v2823_v7, %v3639_v23 }
 0x70c   :  { %v1412_v10 = vpop.f32.mrf.mxu1 }
 0x70d   :  { %v3650_v11 = vadd.f32 %v3639_v23, %v1412_v10 }
 0x70e   :  { %v2826_v16 = vpop.f32.mrf.mxu1 }
 0x70f   :  { %v3653_v14 = vadd.f32 %v2826_v16, %v3639_v23  ;;  %v2525_v16 = vmul.f32 -1.442695, %v1403_v2 }
 0x710   :  { %v3658_v20 = vpop.f32.mrf.mxu1 }
 0x711   :  { %2968 = vpow2.f32 %v2525_v16 }
 0x787   :  { %v2848_v12 = vpop.f32.mrf.mxu1 }
 0x788   :  { %v1718_v42 = vadd.f32 %v2848_v12, %v2536_v19  ;;  %v2969_v12 = vpop.eup %2968 }
 0x789   :  { %v1712_v36 = vpop.f32.mrf.mxu1 }
 0x78a   :  { %v1713_v33 = vadd.f32 %v2536_v19, %v1712_v36  ;;  %2849 = vmatprep.subr.mxu0 %v1718_v42  ;;  %v3724_v36 = vsel %vm113_vm0, 1.0, %v3017_v21 }
 0x78b   :  { %2850 = vmatpush3.msra.mxu0 %v1718_v42  ;;  %v1449_v42 = vadd.f32 1.0, %v2969_v12  ;;  %vm1974_vm4 = vcmp.gt.f32.partialorder %v3724_v36, 0.5 }
 0x78c   :  { %2851 = vmatprep.subr.mxu0 %v1713_v33 }
 0x78d   :  { %2852 = vmatpush3.msra.mxu0 %v1713_v33  ;;  %2970 = vrcp.f32 %v1449_v42  ;;  %v1977_v33 = vsub.s32 0, %v104_v41 }
 0x78e   :  { %2854 = vmatmul.mubr.msk.f32.vlgmr.msra.gmra.mxu0 %vm234_vm1, %v3220_v26 }
 0x78f   :  { %2856 = vmatprep.mubr.msk.f32.mxu0 %vm234_vm1, %v3217_v25 }
 0x792   :  { %2857 = vmatmul.mubr.msk.f32.gmra.mxu0 %vm234_vm1, %v3230_v30 }
 0x793   :  { %2859 = vmatprep.mubr.msk.f32.mxu0 %vm234_vm1, %v3233_v31 }
 0x796   :  { %2860 = vmatmul.mubr.msk.f32.gmra.mxu0 %vm234_vm1, %v3240_v34 }
 0x797   :  { %2883 = vmatprep.mubr.msk.f32.mxu0 %vm234_vm1, %v3212_v22 }
 0x79a   :  { %v2971_v5 = vpop.eup %2970 }
 0x84e   :  { %v2855_v24 = vpop.f32.mrf.mxu0 }
 0x84f   :  { %v1817_v51 = vmul.f32 %v2855_v24, %v1173_v44  ;;  %v2002_v24 = vsub.s32 2, %v104_v41 }
 0x850   :  { %v1787_v49 = vpop.f32.mrf.mxu0 }
 0x851   :  { %v1816_v50 = vmul.f32 %v1787_v49, %v1168_v47 }
 0x852   :  { %v2858_v27 = vpop.f32.mrf.mxu0 }
 0x853   :  { %2870 = vmatprep.mubr.msk.f32.mxu1 %vm461_vm15, %v1816_v50  ;;  %v1819_v54 = vmul.f32 %v2858_v27, %v1183_v48  ;;  %v2014_v48 = vsub.s32 3, %v104_v41  ;;  %v2527_v41 = vmul.f32 -1.442695, %v3650_v11 }
 0x854   :  { %v1797_v52 = vpop.f32.mrf.mxu0  ;;  %2871 = vmatmul.mubr.msk.f32.vlgmr.msra.gmra.mxu1 %vm461_vm15, %v1817_v51 }
 0x855   :  { %v1818_v32 = vmul.f32 %v1797_v52, %v1178_v28 }
 0x856   :  { %v2861_v37 = vpop.f32.mrf.mxu0 }
 0x857   :  { %2873 = vmatprep.mubr.msk.f32.mxu1 %vm461_vm15, %v1818_v32  ;;  %v1821_v59 = vmul.f32 %v2861_v37, %v1193_v57  ;;  %v2530_v32 = vmul.f32 -1.442695, %v3653_v14  ;;  %v2528_v14 = vmul.f32 -1.442695, %v3647_v9 }
 0x858   :  { %v1807_v38 = vpop.f32.mrf.mxu0  ;;  %2874 = vmatmul.mubr.msk.f32.gmra.mxu1 %vm461_vm15, %v1819_v54  ;;  %v1423_v54 = vadd.f32 %v3639_v23, %v3658_v20 }
 0x859   :  { %v1820_v40 = vmul.f32 %v1807_v38, %v1188_v55  ;;  %2972 = vpow2.f32 %v2530_v32 }
 0x85a   :  { %v2529_v38 = vmul.f32 -1.442695, %v1423_v54 }
 0x85b   :  { %2876 = vmatprep.mubr.msk.f32.mxu1 %vm461_vm15, %v1820_v40 }
 0x85c   :  { %2877 = vmatmul.mubr.msk.f32.gmra.mxu1 %vm461_vm15, %v1821_v59  ;;  %2974 = vpow2.f32 %v2529_v38 }
 0x85d   :  { %2904 = vmatprep.mubr.msk.f32.mxu1 %vm1981_vm3, %v3700_v63  ;;  %2976 = vpow2.f32 %v2528_v14 }
 0x85e   :  { %2978 = vpow2.f32 %v2527_v41 }
 0x85f   :  { %2980 = vpow2.f32 %v2526_v53 }
 0x866   :  { %v2973_v9 = vpop.eup %2972 }
 0x914   :  { %v2872_v46 = vpop.f32.mrf.mxu1 }
 0x915   :  { %v3705_v17 = vmul.f32 0.35355338, %v2872_v46 }
 0x916   :  { %v1906_v56 = vpop.f32.mrf.mxu1 }
 0x917   :  { %v3697_v58 = vmul.f32 0.35355338, %v1906_v56  ;;  %v1454_v56 = vadd.f32 1.0, %v2973_v9 }
 0x918   :  { %v2875_v60 = vpop.f32.mrf.mxu1 }
 0x919   :  { %1941 = vxpose.xlu1.b32.start [1/6] (short) (narrow) %v3697_v58, 8  ;;  %v3713_v7 = vmul.f32 0.35355338, %v2875_v60  ;;  %v2975_v60 = vpop.eup %2974  ;;  %2982 = vrcp.f32 %v1454_v56 }
 0x91a   :  { %v1916_v62 = vpop.f32.mrf.mxu1 }
 0x91b   :  { %v3708_v8 = vmul.f32 0.35355338, %v1916_v62  ;;  %v1453_v62 = vadd.f32 1.0, %v2975_v60 }
 0x91c   :  { %v2878_v1 = vpop.f32.mrf.mxu1 }
 0x91d   :  { %1942 = vxpose.xlu1.b32.cont [2/6] (short) (narrow) %v3705_v17, 8  ;;  %v3719_v19 = vmul.f32 0.35355338, %v2878_v1  ;;  %v2977_v1 = vpop.eup %2976  ;;  %2984 = vrcp.f32 %v1453_v62 }
 0x91e   :  { %v1926_v10 = vpop.f32.mrf.mxu1  ;;  %v1452_v2 = vadd.f32 1.0, %v2977_v1  ;;  %v2979_v11 = vpop.eup %2978 }
 0x91f   :  { %v3716_v18 = vmul.f32 0.35355338, %v1926_v10  ;;  %v1451_v10 = vadd.f32 1.0, %v2979_v11  ;;  %v2981_v16 = vpop.eup %2980 }
 0x920   :  { %2986 = vrcp.f32 %v1452_v2  ;;  %v1450_v12 = vadd.f32 1.0, %v2981_v16 }
 0x921   :  { %1943 = vxpose.xlu1.b32.cont [3/6] (short) (narrow) %v3708_v8, 8  ;;  %2988 = vrcp.f32 %v1451_v10 }
 0x922   :  { %2990 = vrcp.f32 %v1450_v12 }
 0x925   :  { %1944 = vxpose.xlu1.b32.cont [4/6] (short) (narrow) %v3713_v7, 8 }
 0x926   :  { %v2983_v42 = vpop.eup %2982 }
 0x929   :  { %1945 = vxpose.xlu1.b32.cont [5/6] (short) (narrow) %v3716_v18, 8 }
 0x92a   :  { %v2985_v3 = vpop.eup %2984 }
 0x92d   :  { %1946 = vxpose.xlu1.b32.end [6/6] (short) (narrow) %v3719_v19, 8 }
 0x94b   :  { %1469 = vperm.xlu1 %2939, %v2971_v5   ;;  %v2987_v5 = vpop.eup %2986 }
 0x995   :  { %v1957_v35 = vpop.trf.xlu1 }
 0x996   :  { %v1978_v39 = vrot.slane %v1957_v35, %v1977_v33  ;;  %v1991_v43 = vrot.slane %v1957_v35, %v1990_v29  ;;  %v2003_v50 = vrot.slane %v1957_v35, %v2002_v24  ;;  %v2015_v55 = vrot.slane %v1957_v35, %v2014_v48  ;;  %v2989_v33 = vpop.eup %2988 }
 0x997   :  { %v2991_v29 = vpop.eup %2990 }
 0x998   :  { %v1980_v47 = vsel %vm1974_vm4, %v1978_v39, -1e+30  ;;  %v1993_v49 = vsel %vm1974_vm4, %v1991_v43, -1e+30  ;;  %v2005_v51 = vsel %vm1974_vm4, %v2003_v50, -1e+30 }
 0x999   :  { %v1985_v44 = vsel %vm1981_vm3, %v1980_v47, -inf  ;;  %v1997_v21 = vsel %vm1981_vm3, %v1993_v49, -inf  ;;  %v2009_v27 = vsel %vm1981_vm3, %v2005_v51, -inf  ;;  %v1979_v28 = vsel %vm1973_vm5, %v1978_v39, -1e+30 }
 0x99a   :  { %1986 = vmax.xlane.f32.xlu0 %v1985_v44  ;;  %v1982_v52 = vsel %vm1981_vm3, %v1979_v28, -inf  ;;  %v1992_v37 = vsel %vm1973_vm5, %v1991_v43, -1e+30  ;;  %v2017_v40 = vsel %vm1974_vm4, %v2015_v55, -1e+30 }
 0x99b   :  { %v1994_v57 = vsel %vm1981_vm3, %v1992_v37, -inf  ;;  %v2021_v59 = vsel %vm1981_vm3, %v2017_v40, -inf  ;;  %v2004_v23 = vsel %vm1973_vm5, %v2003_v50, -1e+30  ;;  %v2016_v45 = vsel %vm1973_vm5, %v2015_v55, -1e+30 }
 0x99c   :  { %v2006_v20 = vsel %vm1981_vm3, %v2004_v23, -inf  ;;  %v2018_v46 = vsel %vm1981_vm3, %v2016_v45, -inf }
 0x99e   :  { %1998 = vmax.xlane.f32.xlu0 %v1997_v21 }
 0x9a2   :  { %2010 = vmax.xlane.f32.xlu0 %v2009_v27 }
 0x9a6   :  { %1983 = vmax.xlane.f32.xlu0 %v1982_v52 }
 0x9aa   :  { %1995 = vmax.xlane.f32.xlu0 %v1994_v57 }
 0x9ae   :  { %2022 = vmax.xlane.f32.xlu0 %v2021_v59 }
 0x9b2   :  { %2007 = vmax.xlane.f32.xlu0 %v2006_v20 }
 0x9b6   :  { %2019 = vmax.xlane.f32.xlu0 %v2018_v46 }
 0x9cc   :  { %1494 = vperm.xlu0 %2938, %v2983_v42  }
 0x9d0   :  { %1489 = vperm.xlu0 %2938, %v2985_v3  }
 0x9d4   :  { %1484 = vperm.xlu0 %2938, %v2987_v5  }
 0x9d8   :  { %1479 = vperm.xlu0 %2938, %v2989_v33  }
 0x9dc   :  { %1474 = vperm.xlu0 %2938, %v2991_v29  }
 0xa23   :  { %v1987_v35 = vpop.xlane.xlu0 %1986 }
 0xa27   :  { %v1999_v39 = vpop.xlane.xlu0 %1998 }
 0xa28   :  { %v2026_v44 = vsel %vm2024_vm6, %v1987_v35, %v1999_v39 }
 0xa2b   :  { %v2011_v43 = vpop.xlane.xlu0 %2010 }
 0xa2c   :  { %v2029_v49 = vsel %vm2027_vm7, %v2026_v44, %v2011_v43 }
 0xa2f   :  { %v1984_v24 = vpop.xlane.xlu0 %1983 }
 0xa33   :  { %v1996_v47 = vpop.xlane.xlu0 %1995 }
 0xa34   :  { %v2025_v27 = vsel %vm2024_vm6, %v1984_v24, %v1996_v47 }
 0xa37   :  { %v2023_v50 = vpop.xlane.xlu0 %2022 }
 0xa38   :  { %v2032_v21 = vsel %vm2030_vm8, %v2029_v49, %v2023_v50 }
 0xa39   :  { %2879 = vmatprep.subr.mxu0 %v2032_v21 }
 0xa3a   :  { %2880 = vmatpush3.msra.mxu0 %v2032_v21 }
 0xa3b   :  { %v2008_v51 = vpop.xlane.xlu0 %2007 }
 0xa3c   :  { %v2028_v28 = vsel %vm2027_vm7, %v2025_v27, %v2008_v51 }
 0xa3f   :  { %v2020_v48 = vpop.xlane.xlu0 %2019 }
 0xa40   :  { %v2031_v52 = vsel %vm2030_vm8, %v2028_v28, %v2020_v48 }
 0xa41   :  { %2881 = vmatprep.subr.mxu0 %v2031_v52 }
 0xa42   :  { %2882 = vmatpush3.msra.mxu0 %v2031_v52 }
 0xa43   :  { %2884 = vmatmul.mubr.msk.f32.vlgmr.msra.gmra.mxu0 %vm234_vm1, %v3220_v26 }
 0xa44   :  { %2886 = vmatprep.mubr.msk.f32.mxu0 %vm234_vm1, %v3217_v25 }
 0xa47   :  { %2887 = vmatmul.mubr.msk.f32.gmra.mxu0 %vm234_vm1, %v3230_v30  ;;  %v1495_v11 = vpop.permute.xlu0 %1494 }
 0xa48   :  { %2889 = vmatprep.mubr.msk.f32.mxu0 %vm234_vm1, %v3233_v31 }
 0xa4b   :  { %2890 = vmatmul.mubr.msk.f32.gmra.mxu0 %vm234_vm1, %v3240_v34 }
 0xa4c   :  { %2932 = vmatprep.mubr.msk.f32.mxu0 %vm1981_vm3, %v3700_v63 }
 0xb03   :  { %v2885_v32 = vpop.f32.mrf.mxu0 }
 0xb04   :  { %v2129_v41 = vsub.f32 %v3705_v17, %v2885_v32 }
 0xb05   :  { %v2099_v54 = vpop.f32.mrf.mxu0 }
 0xb06   :  { %v2128_v46 = vsub.f32 %v3697_v58, %v2099_v54  ;;  %v2136_v9 = vmul.f32 1.442695, %v2129_v41 }
 0xb07   :  { %v2888_v37 = vpop.f32.mrf.mxu0 }
 0xb08   :  { %v2131_v38 = vsub.f32 %v3713_v7, %v2888_v37  ;;  %v2134_v7 = vmul.f32 1.442695, %v2128_v46 }
 0xb09   :  { %v2109_v55 = vpop.f32.mrf.mxu0 }
 0xb0a   :  { %v2130_v14 = vsub.f32 %v3708_v8, %v2109_v55  ;;  %v2140_v45 = vmul.f32 1.442695, %v2131_v38  ;;  %v1470_v38 = vpop.permute.xlu1 %1469 }
 0xb0b   :  { %v2891_v57 = vpop.f32.mrf.mxu0 }
 0xb0c   :  { %v2133_v40 = vsub.f32 %v3719_v19, %v2891_v57  ;;  %v2138_v53 = vmul.f32 1.442695, %v2130_v14 }
 0xb0d   :  { %v2119_v59 = vpop.f32.mrf.mxu0 }
 0xb0e   :  { %v2144_v23 = vmul.f32 1.442695, %v2133_v40  ;;  %v2132_v20 = vsub.f32 %v3716_v18, %v2119_v59 }
 0xb10   :  { %2992 = vpow2.f32 %v2144_v23  ;;  %v2142_v63 = vmul.f32 1.442695, %v2132_v20 }
 0xb12   :  { %2994 = vpow2.f32 %v2142_v63  ;;  %v2364_v63 = vld [vmem:[%s3869_s2 + $0x28] sm:$0xff] }
 0xb13   :  { %2996 = vpow2.f32 %v2140_v45 }
 0xb14   :  { %2998 = vpow2.f32 %v2138_v53 }
 0xb15   :  { %3000 = vpow2.f32 %v2136_v9 }
 0xb16   :  { %3002 = vpow2.f32 %v2134_v7  ;;  %v2362_v7 = vld [vmem:[%s3869_s2 + $0x18] sm:$0xff] }
 0xb1d   :  { %v2993_v19 = vpop.eup %2992 }
 0xb1e   :  { %2892 = vmatprep.subr.mxu1 %v2993_v19 }
 0xb1f   :  { %v2995_v8 = vpop.eup %2994  ;;  %2893 = vmatpush3.msra.mxu1 %v2993_v19 }
 0xb20   :  { %2894 = vmatprep.subr.mxu1 %v2995_v8  ;;  %v2997_v18 = vpop.eup %2996 }
 0xb21   :  { %2895 = vmatpush3.msra.mxu1 %v2995_v8  ;;  %v2999_v17 = vpop.eup %2998 }
 0xb22   :  { %2896 = vmatprep.subr.mxu1 %v2997_v18  ;;  %v3778_v58 = vpop.eup %3000 }
 0xb23   :  { %2897 = vmatpush3.msra.mxu1 %v2997_v18  ;;  %v3781_v56 = vpop.eup %3002 }
 0xb24   :  { %2898 = vmatprep.subr.mxu1 %v2999_v17 }
 0xb25   :  { %2899 = vmatpush3.msra.mxu1 %v2999_v17 }
 0xb26   :  { %2900 = vmatprep.subr.mxu1 %v3778_v58 }
 0xb27   :  { %2901 = vmatpush3.msra.mxu1 %v3778_v58 }
 0xb28   :  { %2902 = vmatprep.subr.mxu1 %v3781_v56 }
 0xb29   :  { %2903 = vmatpush3.msra.mxu1 %v3781_v56 }
 0xb2a   :  { %2905 = vmatmul.mubr.msk.f32.vlgmr.msra.gmra.mxu1 %vm1981_vm3, %v3724_v36 }
 0xb2b   :  { %2911 = vmatprep.mubr.msk.f32.mxu1 %vm234_vm1, %v3212_v22 }
 0xbea   :  { %v2906_v60 = vpop.f32.mrf.mxu1 }
 0xbeb   :  { %2907 = vmatprep.subr.mxu1 %v2906_v60 }
 0xbec   :  { %v2218_v62 = vpop.f32.mrf.mxu1  ;;  %2908 = vmatpush3.msra.mxu1 %v2906_v60  ;;  %v2360_v60 = vld [vmem:[%s3869_s2 + $0x8] sm:$0xff] }
 0xbed   :  { %2909 = vmatprep.subr.mxu1 %v2218_v62 }
 0xbee   :  { %2910 = vmatpush3.msra.mxu1 %v2218_v62 }
 0xbef   :  { %2912 = vmatmul.mubr.msk.f32.vlgmr.msra.gmra.mxu1 %vm234_vm1, %v3220_v26 }
 0xbf0   :  { %2914 = vmatprep.mubr.msk.f32.mxu1 %vm234_vm1, %v3217_v25  ;;  %v1490_v25 = vpop.permute.xlu0 %1489 }
 0xbf3   :  { %2915 = vmatmul.mubr.msk.f32.gmra.mxu1 %vm234_vm1, %v3230_v30 }
 0xbf4   :  { %2917 = vmatprep.mubr.msk.f32.mxu1 %vm234_vm1, %v3233_v31  ;;  %v1485_v30 = vpop.permute.xlu0 %1484  ;;  %v2510_v31 = vld [vmem:[%s3868_s16] ss:$0 sm:$0xff] }
 0xbf5   :  { %v1314_v3 = vadd.f32 %v3496_v0, %v2510_v31  ;;  %v1319_v33 = vadd.f32 %v2510_v31, %v3502_v4  ;;  %v1309_v21 = vadd.f32 %v2510_v31, %v3498_v15  ;;  %v1304_v32 = vadd.f32 %v3492_v61, %v2510_v31 }
 0xbf6   :  { %v1299_v40 = vadd.f32 %v2510_v31, %v3494_v13  ;;  %v2363_v13 = vld [vmem:[%s3869_s2 + $0x20] sm:$0xff] }
 0xbf7   :  { %2918 = vmatmul.mubr.msk.f32.gmra.mxu1 %vm234_vm1, %v3240_v34  ;;  %v1324_v34 = vadd.f32 %v3500_v6, %v2510_v31  ;;  %v1501_v47 = vmul.f32 %v1490_v25, %v1319_v33  ;;  %v1500_v44 = vmul.f32 %v1485_v30, %v1314_v3  ;;  %vm2340_vm1 = vcmask 31744  }
 0xbf8   :  { %v1480_v24 = vpop.permute.xlu0 %1479  ;;  %v1497_v20 = vmul.f32 %v1470_v38, %v1299_v40 }
 0xbf9   :  { %v1502_v29 = vmul.f32 %v1495_v11, %v1324_v34  ;;  %v1499_v4 = vmul.f32 %v1480_v24, %v1309_v21 }
 0xbfc   :  { %v1475_v52 = vpop.permute.xlu0 %1474 }
 0xbfd   :  { %v1498_v57 = vmul.f32 %v1475_v52, %v1304_v32 }
 0xcaf   :  { %v2913_v22 = vpop.f32.mrf.mxu1 }
 0xcb1   :  { %v2293_v1 = vpop.f32.mrf.mxu1 }
 0xcb3   :  { %v2916_v2 = vpop.f32.mrf.mxu1 }
 0xcb4   :  { %3004 = vrcp.f32 %v2916_v2 }
 0xcb5   :  { %v2303_v10 = vpop.f32.mrf.mxu1 }
 0xcb7   :  { %v2919_v16 = vpop.f32.mrf.mxu1 }
 0xcb8   :  { %3006 = vrcp.f32 %v2919_v16 }
 0xcb9   :  { %3008 = vrcp.f32 %v2303_v10  ;;  %v2313_v26 = vpop.f32.mrf.mxu1 }
 0xcba   :  { %3010 = vrcp.f32 %v2313_v26 }
 0xcbb   :  { %3012 = vrcp.f32 %v2913_v22 }
 0xcbc   :  { %3014 = vrcp.f32 %v2293_v1  ;;  %v2359_v1 = vld [vmem:[%s3869_s2] sm:$0xff] }
 0xcc1   :  { %v3005_v12 = vpop.eup %3004 }
 0xcc2   :  { %v2329_v39 = vmul.f32 %v3005_v12, %v2997_v18 }
 0xcc4   :  { %v2337_v27 = vmul.f32 %v2329_v39, %v1500_v44 }
 0xcc5   :  { %v3007_v42 = vpop.eup %3006 }
 0xcc6   :  { %v3009_v5 = vpop.eup %3008  ;;  %v2333_v35 = vmul.f32 %v3007_v42, %v2993_v19  ;;  %v2350_v54 = vsel %vm2340_vm1, %v2337_v27, 0.0 }
 0xcc7   :  { %v3011_v43 = vpop.eup %3010  ;;  %v2327_v0 = vmul.f32 %v3009_v5, %v2999_v17  ;;  %v2361_v17 = vld [vmem:[%s3869_s2 + $0x10] sm:$0xff] }
 0xcc8   :  { %v2339_v49 = vmul.f32 %v2333_v35, %v1502_v29  ;;  %v2331_v50 = vmul.f32 %v3011_v43, %v2995_v8  ;;  %v3013_v28 = vpop.eup %3012 }
 0xcc9   :  { %v2336_v37 = vmul.f32 %v2327_v0, %v1499_v4  ;;  %v2325_v15 = vmul.f32 %v3013_v28, %v3778_v58  ;;  %v3015_v55 = vpop.eup %3014 }
 0xcca   :  { %v2356_v6 = vsel %vm2340_vm1, %v2339_v49, 0.0  ;;  %v2338_v51 = vmul.f32 %v2331_v50, %v1501_v47  ;;  %v2323_v23 = vmul.f32 %v3015_v55, %v3781_v56 }
 0xccb   :  { %2357 = vadd.xlane.f32.xlu0 %v2356_v6  ;;  %v2347_v59 = vsel %vm2340_vm1, %v2336_v37, 0.0  ;;  %v2335_v14 = vmul.f32 %v2325_v15, %v1498_v57 }
 0xccc   :  { %v2353_v48 = vsel %vm2340_vm1, %v2338_v51, 0.0  ;;  %v2334_v41 = vmul.f32 %v2323_v23, %v1497_v20 }
 0xccd   :  { %2354 = vadd.xlane.f32.xlu1 %v2353_v48  ;;  %v2344_v61 = vsel %vm2340_vm1, %v2335_v14, 0.0 }
 0xcce   :  { %v2341_v45 = vsel %vm2340_vm1, %v2334_v41, 0.0 }
 0xccf   :  { %2351 = vadd.xlane.f32.xlu0 %v2350_v54 }
 0xcd3   :  { %2348 = vadd.xlane.f32.xlu0 %v2347_v59 }
 0xcd7   :  { %2345 = vadd.xlane.f32.xlu0 %v2344_v61 }
 0xcdb   :  { %2342 = vadd.xlane.f32.xlu0 %v2341_v45 }
 0xd54   :  { %v2358_v46 = vpop.xlane.xlu0 %2357 }
 0xd55   :  { %v2370_v53 = vmul.f32 %v2364_v63, %v2358_v46 }
 0xd56   :  { %v2355_v9 = vpop.xlane.xlu1 %2354 }
 0xd57   :  { %v2369_v19 = vmul.f32 %v2363_v13, %v2355_v9  ;;  %2920 = vmatprep.subr.mxu0 %v2370_v53 }
 0xd58   :  { %2921 = vmatpush3.msra.mxu0 %v2370_v53  ;;  %v2352_v8 = vpop.xlane.xlu0 %2351 }
 0xd59   :  { %v2368_v18 = vmul.f32 %v2362_v7, %v2352_v8  ;;  %2922 = vmatprep.subr.mxu0 %v2369_v19 }
 0xd5a   :  { %2923 = vmatpush3.msra.mxu0 %v2369_v19 }
 0xd5b   :  { %2924 = vmatprep.subr.mxu0 %v2368_v18 }
 0xd5c   :  { %v2349_v58 = vpop.xlane.xlu0 %2348  ;;  %2925 = vmatpush3.msra.mxu0 %v2368_v18 }
 0xd5d   :  { %v2367_v56 = vmul.f32 %v2361_v17, %v2349_v58 }
 0xd5f   :  { %2926 = vmatprep.subr.mxu0 %v2367_v56 }
 0xd60   :  { %v2346_v62 = vpop.xlane.xlu0 %2345  ;;  %2927 = vmatpush3.msra.mxu0 %v2367_v56 }
 0xd61   :  { %v2366_v22 = vmul.f32 %v2360_v60, %v2346_v62 }
 0xd63   :  { %2928 = vmatprep.subr.mxu0 %v2366_v22 }
 0xd64   :  { %v2343_v2 = vpop.xlane.xlu0 %2342  ;;  %2929 = vmatpush3.msra.mxu0 %v2366_v22 }
 0xd65   :  { %v2365_v11 = vmul.f32 %v2359_v1, %v2343_v2 }
 0xd67   :  { %2930 = vmatprep.subr.mxu0 %v2365_v11 }
 0xd68   :  { %2931 = vmatpush3.msra.mxu0 %v2365_v11 }
 0xd69   :  { %2933 = vmatmul.mubr.msk.f32.vlgmr.msra.gmra.mxu0 %vm1981_vm3, %v3724_v36 }
 0xe29   :  { %v2934_v10 = vpop.f32.mrf.mxu0 }
 0xe2a   :  { %v2447_v16 = vmul.f32 0.25, %v2934_v10 }
 0xe2b   :  { %v2437_v26 = vpop.f32.mrf.mxu0 }
 0xe2c   :  { %2449 = vst.msk [vmem:[%s3870_s25 + $0x8] sm:$0xff] %vm2030_vm8, %v2447_v16  ;;  %v2446_v25 = vmul.f32 0.25, %v2437_v26 }
 0xe2e   :  { %2448 = vst.msk [vmem:[%s3870_s25] sm:$0xff] %vm2030_vm8, %v2446_v25 }

</bundles_post_ra>
